<compile_context>
chip_gen: v7x
topology: tpu7x:2x2x1
jax: 0.10.0
libtpu: 0.0.40
codegen_flags: <defaults>
</compile_context>

<pallas_src>
import numpy as np
import jax
import jax.numpy as jnp
from jax import lax
from jax.experimental import pallas as pl
from jax.experimental.pallas import tpu as pltpu


# ----------------------------------------------------------------------------
# PyTorch-style (align_corners=False) bilinear interpolation matrix
# ----------------------------------------------------------------------------
def bilinear_matrix(in_size, out_size):
    scale = in_size / out_size
    i = np.arange(out_size, dtype=np.float64)
    src = np.maximum((i + 0.5) * scale - 0.5, 0.0)      # PyTorch clamps src >= 0
    i0 = np.minimum(np.floor(src).astype(np.int64), in_size - 1)
    i1 = np.minimum(i0 + 1, in_size - 1)
    w1 = (src - i0).astype(np.float32)
    w0 = 1.0 - w1
    A = np.zeros((out_size, in_size), dtype=np.float32)
    A[np.arange(out_size), i0] += w0
    A[np.arange(out_size), i1] += w1
    return jnp.asarray(A)


# ----------------------------------------------------------------------------
# Fused separable bilinear resize kernel:  out[bc] = A_h @ X[bc] @ A_w^T
# One grid step per (batch, channel); both matmuls stay in VMEM/vregs.
# ----------------------------------------------------------------------------
def _resize_kernel(ah_ref, awt_ref, x_ref, o_ref):
    x = x_ref[0]                                                         # (H, W) f32
    t = jnp.dot(ah_ref[...], x, preferred_element_type=jnp.float32)      # (112, W)
    r = jnp.dot(t, awt_ref[...], preferred_element_type=jnp.float32)     # (112, 112)
    o_ref[0] = r.astype(o_ref.dtype)


def bilinear_resize_112(x, out_dtype=jnp.bfloat16):
    """x: (B, C, H, W) f32 -> (B, C, 112, 112) out_dtype, one pallas_call."""
    B, C, H, W = x.shape
    A_h = bilinear_matrix(H, 112)            # (112, H)
    A_wT = bilinear_matrix(W, 112).T         # (W, 112)
    xr = x.reshape(B * C, H, W)
    out = pl.pallas_call(
        _resize_kernel,
        out_shape=jax.ShapeDtypeStruct((B * C, 112, 112), out_dtype),
        grid_spec=pltpu.PrefetchScalarGridSpec(
            num_scalar_prefetch=0,
            grid=(B * C,),
            in_specs=[
                pl.BlockSpec((112, H), lambda i: (0, 0)),      # A_h   (resident)
                pl.BlockSpec((W, 112), lambda i: (0, 0)),      # A_w^T (resident)
                pl.BlockSpec((1, H, W), lambda i: (i, 0, 0)),  # per-channel image
            ],
            out_specs=pl.BlockSpec((1, 112, 112), lambda i: (i, 0, 0)),
        ),
        compiler_params=pltpu.CompilerParams(
            dimension_semantics=("parallel",)),   # v7x: both TCs can take channels
    )(A_h, A_wT, xr)
    return out.reshape(B, C, 112, 112)


# ----------------------------------------------------------------------------
# Fused facenet (flatten + linear, bf16 operands, f32 accumulator) + cosine loss
# ----------------------------------------------------------------------------
def _make_facenet_cosine_kernel(n_pairs):
    def kernel(a_ref, w_ref, b_ref, o_ref, acc_ref):
        k = pl.program_id(0)

        @pl.when(k == 0)
        def _():
            acc_ref[...] = jnp.zeros_like(acc_ref)

        acc_ref[...] += jnp.dot(a_ref[...], w_ref[...],
                                preferred_element_type=jnp.float32)

        @pl.when(k == pl.num_programs(0) - 1)
        def _():
            feat = acc_ref[...] + b_ref[...]                  # (MP, F) f32
            fx = feat[0:n_pairs, :]                           # features of x rows
            fy = feat[n_pairs:2 * n_pairs, :]                 # features of y rows
            dot = jnp.sum(fx * fy, axis=-1, keepdims=True)
            nx2 = jnp.sum(fx * fx, axis=-1, keepdims=True)
            ny2 = jnp.sum(fy * fy, axis=-1, keepdims=True)
            # 1 - dot / max(||x||*||y||, 1e-8) == 1 - dot * rsqrt(max(nx2*ny2, 1e-16))
            inv = lax.rsqrt(jnp.maximum(nx2 * ny2, 1e-16))
            loss = 1.0 - dot * inv                            # (n_pairs, 1)
            o_ref[...] = jnp.broadcast_to(loss, o_ref.shape)  # lane-dense write

    return kernel


def facenet_cosine_loss(flat_pad, w_bf16, b2d, n_pairs, *, tk=12544):
    """flat_pad: (MP, K) bf16, rows = [x_0..x_{n-1}, y_0..y_{n-1}, zero pad...]
       w_bf16:   (K, F) bf16 facenet projection
       b2d:      (1, F) f32 bias
       returns   (n_pairs,) f32 loss = 1 - cos(feat_x, feat_y)"""
    MP, K = flat_pad.shape
    K2, F = w_bf16.shape
    assert K == K2
    if K % tk != 0:
        tk = K                                   # single K step fallback
    out = pl.pallas_call(
        _make_facenet_cosine_kernel(n_pairs),
        out_shape=jax.ShapeDtypeStruct((n_pairs, 128), jnp.float32),
        grid_spec=pltpu.PrefetchScalarGridSpec(
            num_scalar_prefetch=0,
            grid=(K // tk,),
            in_specs=[
                pl.BlockSpec((MP, tk), lambda k: (0, k)),   # activations (bf16)
                pl.BlockSpec((tk, F), lambda k: (k, 0)),    # weight tile (bf16)
                pl.BlockSpec((1, F), lambda k: (0, 0)),     # bias (f32, resident)
            ],
            out_specs=pl.BlockSpec((n_pairs, 128), lambda k: (0, 0)),
            scratch_shapes=[pltpu.VMEM((MP, F), jnp.float32)],
        ),
        compiler_params=pltpu.CompilerParams(
            dimension_semantics=("arbitrary",),
            # bf16 weight tile (tk, F) double-buffered is ~6.4 MiB: fits the
            # default scoped VMEM on v5e/v6e/v7x; set an explicit cap anyway.
            vmem_limit_bytes=32 * 1024 * 1024),
    )(flat_pad, w_bf16, b2d)
    return out[:, 0]


# ----------------------------------------------------------------------------
# IDLoss forward: resize(x,y) -> facenet -> 1 - cosine_similarity
# ----------------------------------------------------------------------------
def id_loss(x, y, w_face_bf16, b_face):
    """x, y: (N, C, H, W) f32; w_face_bf16: (C*112*112, F) bf16; b_face: (F,) f32."""
    N, C, H, W = x.shape
    # y.detach() only affects gradients; the forward pass is identical.
    xy = jnp.concatenate([x, y], axis=0)                     # (2N, C, H, W)
    xy112 = bilinear_resize_112(xy)                          # (2N, C, 112, 112) bf16
    flat = xy112.reshape(2 * N, C * 112 * 112)               # contiguous reshape
    MP = max(8, ((2 * N + 7) // 8) * 8)                      # full-sublane LHS
    flat_pad = jnp.pad(flat, ((0, MP - 2 * N), (0, 0)))
    b2d = b_face.reshape(1, -1).astype(jnp.float32)
    return facenet_cosine_loss(flat_pad, w_face_bf16, b2d, n_pairs=N)


if __name__ == "__main__":
    key = jax.random.PRNGKey(0)
    kx, ky, kw, kb = jax.random.split(key, 4)

    N, C, H, W = 2, 3, 16, 16
    FEAT_DIM = 128

    x = jax.random.normal(kx, (N, C, H, W), dtype=jnp.float32)
    y = jax.random.normal(ky, (N, C, H, W), dtype=jnp.float32)

    K_in = C * 112 * 112
    w_face = jax.random.normal(kw, (K_in, FEAT_DIM), dtype=jnp.float32) / np.sqrt(K_in)
    b_face = jax.random.normal(kb, (FEAT_DIM,), dtype=jnp.float32) * 0.01

    # One-time bf16 weight cast OUTSIDE jit: the hot path streams 9.6 MB / call
    # instead of 19.3 MB (and instead of 2x19.3 MB in the un-batched version).
    w_face_bf16 = w_face.astype(jnp.bfloat16)

    loss = jax.jit(id_loss)(x, y, w_face_bf16, b_face)
    loss = jax.block_until_ready(loss)
    assert loss.shape == (N,) and loss.dtype == jnp.float32

    # Plain-JAX reference (same bilinear matrices, same bf16 weight) sanity check.
    A_h = bilinear_matrix(H, 112)
    A_w = bilinear_matrix(W, 112)

    def ref_resize(img):
        return jnp.einsum('ph,nchw,qw->ncpq', A_h, img, A_w)

    w_ref = w_face_bf16.astype(jnp.float32)
    fx = ref_resize(x).reshape(N, -1) @ w_ref + b_face
    fy = ref_resize(y).reshape(N, -1) @ w_ref + b_face
    cos = jnp.sum(fx * fy, axis=-1) / jnp.maximum(
        jnp.linalg.norm(fx, axis=-1) * jnp.linalg.norm(fy, axis=-1), 1e-8)
    ref = 1.0 - cos
    np.testing.assert_allclose(np.asarray(loss), np.asarray(ref), atol=5e-2)

    print("KERNEL_OK")
</pallas_src>

<mosaic_0001>
module attributes {stable_mosaic.version = 11 : i64} {
  func.func @_resize_kernel(%arg0: i32, %arg1: memref<112x16xf32, #tpu.memory_space<vmem>>, %arg2: memref<16x112xf32, #tpu.memory_space<vmem>>, %arg3: memref<1x16x16xf32, #tpu.memory_space<vmem>>, %arg4: memref<1x112x112xbf16, #tpu.memory_space<vmem>>) attributes {dimension_semantics = [#tpu.dimension_semantics<parallel>], iteration_bounds = array<i64: 12>, scalar_prefetch = 0 : i64, scratch_operands = 0 : i64, tpu.core_type = #tpu.core_type<tc>, window_params = [{pipeline_mode = #tpu.pipeline_mode<synchronous>, transform_indices = @transform_0, window_bounds = array<i64: 112, 16>}, {pipeline_mode = #tpu.pipeline_mode<synchronous>, transform_indices = @transform_1, window_bounds = array<i64: 16, 112>}, {transform_indices = @transform_2, window_bounds = array<i64: 1, 16, 16>}, {transform_indices = @transform_3, window_bounds = array<i64: 1, 112, 112>}]} {
    %c0 = arith.constant 0 : index
    %c0_0 = arith.constant 0 : index
    %c0_1 = arith.constant 0 : index
    %0 = vector.load %arg3[%c0, %c0_0, %c0_1] : memref<1x16x16xf32, #tpu.memory_space<vmem>>, vector<1x16x16xf32>
    %1 = vector.shape_cast %0 : vector<1x16x16xf32> to vector<16x16xf32>
    %c0_2 = arith.constant 0 : index
    %c0_3 = arith.constant 0 : index
    %2 = vector.load %arg1[%c0_2, %c0_3] : memref<112x16xf32, #tpu.memory_space<vmem>>, vector<112x16xf32>
    %cst = arith.constant dense<0.000000e+00> : vector<112x16xf32>
    %3 = tpu.matmul %2, %1, %cst {dimension_numbers = #tpu.dot_dimension_numbers<[1], [0], [0], [1], [0, 0, 1, 1], [], []>} : vector<112x16xf32>, vector<16x16xf32>, vector<112x16xf32> -> vector<112x16xf32>
    %c0_4 = arith.constant 0 : index
    %c0_5 = arith.constant 0 : index
    %4 = vector.load %arg2[%c0_4, %c0_5] : memref<16x112xf32, #tpu.memory_space<vmem>>, vector<16x112xf32>
    %cst_6 = arith.constant dense<0.000000e+00> : vector<112x112xf32>
    %5 = tpu.matmul %3, %4, %cst_6 {dimension_numbers = #tpu.dot_dimension_numbers<[1], [0], [0], [1], [0, 0, 1, 1], [], []>} : vector<112x16xf32>, vector<16x112xf32>, vector<112x112xf32> -> vector<112x112xf32>
    %6 = arith.truncf %5 : vector<112x112xf32> to vector<112x112xbf16>
    %c0_7 = arith.constant 0 : index
    %c0_8 = arith.constant 0 : index
    %c0_9 = arith.constant 0 : index
    %7 = vector.load %arg4[%c0_7, %c0_8, %c0_9] : memref<1x112x112xbf16, #tpu.memory_space<vmem>>, vector<1x112x112xbf16>
    %8 = vector.shape_cast %7 : vector<1x112x112xbf16> to vector<112x112xbf16>
    %9 = vector.shape_cast %6 : vector<112x112xbf16> to vector<1x112x112xbf16>
    tpu.vector_store %arg4[%c0_7, %c0_8, %c0_9], %9 {strides = array<i32>} : memref<1x112x112xbf16, #tpu.memory_space<vmem>>, vector<1x112x112xbf16>,
    return
  }
  func.func @transform_0(%arg0: i32) -> (i32, i32) {
    %c0_i32 = arith.constant 0 : i32
    %c0_i32_0 = arith.constant 0 : i32
    %c0_i32_1 = arith.constant 0 : i32
    return %c0_i32, %c0_i32_0 : i32, i32
  }
  func.func @transform_1(%arg0: i32) -> (i32, i32) {
    %c0_i32 = arith.constant 0 : i32
    %c0_i32_0 = arith.constant 0 : i32
    %c0_i32_1 = arith.constant 0 : i32
    return %c0_i32, %c0_i32_0 : i32, i32
  }
  func.func @transform_2(%arg0: i32) -> (i32, i32, i32) {
    %c0_i32 = arith.constant 0 : i32
    %c0_i32_0 = arith.constant 0 : i32
    %c0_i32_1 = arith.constant 0 : i32
    return %arg0, %c0_i32, %c0_i32_0 : i32, i32, i32
  }
  func.func @transform_3(%arg0: i32) -> (i32, i32, i32) {
    %c0_i32 = arith.constant 0 : i32
    %c0_i32_0 = arith.constant 0 : i32
    %c0_i32_1 = arith.constant 0 : i32
    return %arg0, %c0_i32, %c0_i32_0 : i32, i32, i32
  }
}

module attributes {stable_mosaic.version = 11 : i64} {
  func.func @kernel(%arg0: i32, %arg1: memref<8x12544xbf16, #tpu.memory_space<vmem>>, %arg2: memref<12544x128xbf16, #tpu.memory_space<vmem>>, %arg3: memref<1x128xf32, #tpu.memory_space<vmem>>, %arg4: memref<2x128xf32, #tpu.memory_space<vmem>>, %arg5: memref<8x128xf32, #tpu.memory_space<vmem>>) attributes {dimension_semantics = [#tpu.dimension_semantics<arbitrary>], iteration_bounds = array<i64: 3>, scalar_prefetch = 0 : i64, scratch_operands = 1 : i64, tpu.core_type = #tpu.core_type<tc>, window_params = [{transform_indices = @transform_0, window_bounds = array<i64: 8, 12544>}, {transform_indices = @transform_1, window_bounds = array<i64: 12544, 128>}, {pipeline_mode = #tpu.pipeline_mode<synchronous>, transform_indices = @transform_2, window_bounds = array<i64: 1, 128>}, {pipeline_mode = #tpu.pipeline_mode<synchronous>, transform_indices = @transform_3, window_bounds = array<i64: 2, 128>}]} {
    %c0_i32 = arith.constant 0 : i32
    %0 = arith.cmpi eq, %arg0, %c0_i32 : i32
    %1 = arith.extui %0 : i1 to i32
    %c0_i32_0 = arith.constant 0 : i32
    %2 = arith.cmpi ne, %1, %c0_i32_0 : i32
    scf.if %2 {
      %cst_9 = arith.constant 0.000000e+00 : f32
      %12 = vector.broadcast %cst_9 : f32 to vector<8x128xf32>
      %c0_10 = arith.constant 0 : index
      %c0_11 = arith.constant 0 : index
      %13 = vector.load %arg5[%c0_10, %c0_11] : memref<8x128xf32, #tpu.memory_space<vmem>>, vector<8x128xf32>
      tpu.vector_store %arg5[%c0_10, %c0_11], %12 {strides = array<i32>} : memref<8x128xf32, #tpu.memory_space<vmem>>, vector<8x128xf32>,
    } else {
    }
    %c0 = arith.constant 0 : index
    %c0_1 = arith.constant 0 : index
    %3 = vector.load %arg5[%c0, %c0_1] : memref<8x128xf32, #tpu.memory_space<vmem>>, vector<8x128xf32>
    %c0_2 = arith.constant 0 : index
    %c0_3 = arith.constant 0 : index
    %4 = vector.load %arg1[%c0_2, %c0_3] : memref<8x12544xbf16, #tpu.memory_space<vmem>>, vector<8x12544xbf16>
    %c0_4 = arith.constant 0 : index
    %c0_5 = arith.constant 0 : index
    %5 = vector.load %arg2[%c0_4, %c0_5] : memref<12544x128xbf16, #tpu.memory_space<vmem>>, vector<12544x128xbf16>
    %cst = arith.constant dense<0.000000e+00> : vector<8x128xf32>
    %6 = tpu.matmul %4, %5, %cst {dimension_numbers = #tpu.dot_dimension_numbers<[1], [0], [0], [1], [0, 0, 1, 1], [], []>} : vector<8x12544xbf16>, vector<12544x128xbf16>, vector<8x128xf32> -> vector<8x128xf32>
    %7 = arith.addf %3, %6 : vector<8x128xf32>
    %c0_6 = arith.constant 0 : index
    %c0_7 = arith.constant 0 : index
    %8 = vector.load %arg5[%c0_6, %c0_7] : memref<8x128xf32, #tpu.memory_space<vmem>>, vector<8x128xf32>
    tpu.vector_store %arg5[%c0_6, %c0_7], %7 {strides = array<i32>} : memref<8x128xf32, #tpu.memory_space<vmem>>, vector<8x128xf32>,
    %c2_i32 = arith.constant 2 : i32
    %9 = arith.cmpi eq, %arg0, %c2_i32 : i32
    %10 = arith.extui %9 : i1 to i32
    %c0_i32_8 = arith.constant 0 : i32
    %11 = arith.cmpi ne, %10, %c0_i32_8 : i32
    scf.if %11 {
      %c0_9 = arith.constant 0 : index
      %c0_10 = arith.constant 0 : index
      %12 = vector.load %arg5[%c0_9, %c0_10] : memref<8x128xf32, #tpu.memory_space<vmem>>, vector<8x128xf32>
      %c0_11 = arith.constant 0 : index
      %c0_12 = arith.constant 0 : index
      %13 = vector.load %arg3[%c0_11, %c0_12] : memref<1x128xf32, #tpu.memory_space<vmem>>, vector<1x128xf32>
      %14 = vector.broadcast %13 : vector<1x128xf32> to vector<8x128xf32>
      %15 = arith.addf %12, %14 : vector<8x128xf32>
      %16 = vector.extract_strided_slice %15 {offsets = [0, 0], sizes = [2, 128], strides = [1, 1]} : vector<8x128xf32> to vector<2x128xf32>
      %17 = vector.extract_strided_slice %15 {offsets = [2, 0], sizes = [2, 128], strides = [1, 1]} : vector<8x128xf32> to vector<2x128xf32>
      %18 = arith.mulf %16, %17 : vector<2x128xf32>
      %cst_13 = arith.constant dense<0.000000e+00> : vector<2xf32>
      %19 = vector.multi_reduction <add>, %18, %cst_13 [1] : vector<2x128xf32> to vector<2xf32>
      %20 = vector.shape_cast %19 : vector<2xf32> to vector<2x1xf32>
      %21 = arith.mulf %16, %16 : vector<2x128xf32>
      %cst_14 = arith.constant dense<0.000000e+00> : vector<2xf32>
      %22 = vector.multi_reduction <add>, %21, %cst_14 [1] : vector<2x128xf32> to vector<2xf32>
      %23 = vector.shape_cast %22 : vector<2xf32> to vector<2x1xf32>
      %24 = arith.mulf %17, %17 : vector<2x128xf32>
      %cst_15 = arith.constant dense<0.000000e+00> : vector<2xf32>
      %25 = vector.multi_reduction <add>, %24, %cst_15 [1] : vector<2x128xf32> to vector<2xf32>
      %26 = vector.shape_cast %25 : vector<2xf32> to vector<2x1xf32>
      %27 = arith.mulf %23, %26 : vector<2x1xf32>
      %cst_16 = arith.constant 1.000000e-16 : f32
      %28 = vector.broadcast %cst_16 : f32 to vector<2x1xf32>
      %29 = arith.maximumf %27, %28 : vector<2x1xf32>
      %30 = math.rsqrt %29 : vector<2x1xf32>
      %31 = arith.mulf %20, %30 : vector<2x1xf32>
      %cst_17 = arith.constant 1.000000e+00 : f32
      %32 = vector.broadcast %cst_17 : f32 to vector<2x1xf32>
      %33 = arith.subf %32, %31 : vector<2x1xf32>
      %34 = vector.shape_cast %33 : vector<2x1xf32> to vector<2x1xf32>
      %35 = vector.broadcast %34 : vector<2x1xf32> to vector<2x128xf32>
      %c0_18 = arith.constant 0 : index
      %c0_19 = arith.constant 0 : index
      %36 = vector.load %arg4[%c0_18, %c0_19] : memref<2x128xf32, #tpu.memory_space<vmem>>, vector<2x128xf32>
      tpu.vector_store %arg4[%c0_18, %c0_19], %35 {strides = array<i32>} : memref<2x128xf32, #tpu.memory_space<vmem>>, vector<2x128xf32>,
    } else {
    }
    return
  }
  func.func @transform_0(%arg0: i32) -> (i32, i32) {
    %c0_i32 = arith.constant 0 : i32
    %c0_i32_0 = arith.constant 0 : i32
    return %c0_i32, %arg0 : i32, i32
  }
  func.func @transform_1(%arg0: i32) -> (i32, i32) {
    %c0_i32 = arith.constant 0 : i32
    %c0_i32_0 = arith.constant 0 : i32
    return %arg0, %c0_i32 : i32, i32
  }
  func.func @transform_2(%arg0: i32) -> (i32, i32) {
    %c0_i32 = arith.constant 0 : i32
    %c0_i32_0 = arith.constant 0 : i32
    %c0_i32_1 = arith.constant 0 : i32
    return %c0_i32, %c0_i32_0 : i32, i32
  }
  func.func @transform_3(%arg0: i32) -> (i32, i32) {
    %c0_i32 = arith.constant 0 : i32
    %c0_i32_0 = arith.constant 0 : i32
    %c0_i32_1 = arith.constant 0 : i32
    return %c0_i32, %c0_i32_0 : i32, i32
  }
}

</mosaic_0001>

<bundles_post_ra>
// kernel: id_loss.2
= control target key start
LH: loop header
LB: loop body
LE: loop exit
PB: predicated region body
PF: predicated region fallthrough
CT: control target
= control target key end

     0   :  { %8 = vsyncpa [#allocation3], 0  ;;  %s1166_s0 = inlined_call_operand.hbm [shape: f32[112,16], index: 0, kind: input, shape index: {}]   ;;  %s1167_s1 = inlined_call_operand.hbm [shape: f32[16,112], index: 1, kind: input, shape index: {}]   ;;  %s1168_s2 = inlined_call_operand.vmem [shape: f32[12,16,16], index: 2, kind: input, shape index: {}]   ;;  %s1169_s3 = inlined_call_operand.vmem [shape: bf16[12,112,112], index: 3, kind: output, shape index: {}]  }
   0x1   :  { %9 = vsyncpa [#allocation5], 0  ;;  %s1011_s12 = smov 0  }
   0x2 LB: > { %s1017_s13 = sadd.s32 4294967295, %s985_s12   ;;  %p724_p0 = scmp.ge.s32.totalorder %s985_s12, 1  ;;  %s985_s12 = sphi %s1011_s12, %s15_s12  }
   0x3   : > { %p114_p1 = scmp.lt.s32.totalorder %s985_s12, 13  ;;  %s987_s14 = smov [#allocation2]  }
   0x4   : > { %s126_s15 = sshll.u32 %s987_s14, 4  ;;  %p1170_p3 = scmp.eq.s32.totalorder %s1017_s13, 0  ;;  %s127_s15 = int_to_ptr.vmem [resolvable:$true] %s126_s15 }
   0x5   : > { %p1021_p2 = pnand %p724_p0, %p114_p1  ;;  %s988_s17 = smov [#allocation4]  }
   0x6   : > { %s139_s18 = sshll.u32 %s988_s17, 4  ;;  %s915_s22 = scalar_lea.hbm %s1166_s0, 1792  ;;  %s1034_s18 = int_to_ptr.vmem [resolvable:$true] %s139_s18 }
   0x7   : > { %s1172_s16 = scalar_select %p1021_p2, 1, 0 }
   0x8   : > { %p892_p4 = pneg %p1021_p2  ;;  %p916_p6 = scmp.ne.s32.totalorder %s1166_s0, %s915_s22 }
   0x9   : > { %p922_p10 = scmp.lt.u32.totalorder %s915_s22, %s1166_s0 }
   0xa   : > { %p1030_p5 = pnand %p1170_p3, %p892_p4 }
   0xc   : > { %p917_p7 = pneg %p1030_p5 }
   0xe   : > { %p918_p8 = pnand %p917_p7, %p916_p6 }
  0x10   : > { %p919_p9 = pneg %p918_p8 }
  0x12   : > { %p924_p11 = pnand %p922_p10, %p919_p9 }
  0x14   : > { %927 = shalt.err (!%p924_p11)
}
  0x15   : > { %s928_s27 = scalar_lea.vmem %s127_s15, 1792  ;;  %p936_p1 = scmp.lt.s32.totalorder %s127_s15, %s127_s15 }
  0x16   : > { %p929_p12 = scmp.ne.s32.totalorder %s127_s15, %s928_s27  ;;  %p937_p4 = scmp.lt.s32.totalorder %s928_s27, %s928_s27 }
  0x18   : > { %p931_p13 = pnand %p929_p12, %p917_p7  ;;  %p938_p3 = por %p937_p4, %p936_p1 }
  0x1a   : > { %p932_p0 = pneg %p931_p13 }
  0x1c   : > { %p939_p2 = pnand %p938_p3, %p932_p0 }
  0x1e   : > { %942 = shalt.err (!%p939_p2)
}
  0x1f   : > { %s989_s28 = smov 128   ;;  %s990_s29 = smov 8  }
  0x20   : > { %895 = dma.hbm_to_vmem [thread:$0]  (!%p1030_p5), %s1166_s0, 1792, %s127_s15, [#allocation3], %s989_s28, %s989_s28, %s990_s29  }
  0x21   : > { %s943_s7 = scalar_lea.hbm %s1167_s1, 256 }
  0x22   : > { %p944_p6 = scmp.ne.s32.totalorder %s1167_s1, %s943_s7  ;;  %p950_p8 = scmp.lt.u32.totalorder %s943_s7, %s1167_s1 }
  0x24   : > { %p946_p2 = pnand %p944_p6, %p917_p7 }
  0x26   : > { %p947_p3 = pneg %p946_p2 }
  0x28   : > { %p952_p9 = pnand %p950_p8, %p947_p3 }
  0x2a   : > { %955 = shalt.err (!%p952_p9)
}
  0x2b   : > { %s956_s14 = scalar_lea.vmem %s1034_s18, 256  ;;  %p964_p13 = scmp.lt.s32.totalorder %s1034_s18, %s1034_s18 }
  0x2c   : > { %p957_p10 = scmp.ne.s32.totalorder %s1034_s18, %s956_s14  ;;  %p965_p0 = scmp.lt.s32.totalorder %s956_s14, %s956_s14 }
  0x2e   : > { %p959_p11 = pnand %p957_p10, %p917_p7  ;;  %p966_p1 = por %p965_p0, %p964_p13 }
  0x30   : > { %p960_p12 = pneg %p959_p11 }
  0x32   : > { %p967_p4 = pnand %p966_p1, %p960_p12 }
  0x34   : > { %970 = shalt.err (!%p967_p4)
}
  0x35   : > { %898 = dma.hbm_to_vmem [thread:$0]  (!%p1030_p5), %s1167_s1, 256, %s1034_s18, [#allocation5], %s989_s28, %s989_s28, %s990_s29  }
  0x36   : > { %p1174_p6 = scmp.ne.s32.totalorder %s1172_s16, 0 }
  0x37   : > { %p1175_p2 = scmp.eq.s32.totalorder (!%p1174_p6), %s1017_s13, 0 }
  0x38   : > { %163 = sbr.rel (%p1174_p6) target bundleno = 533 (0x215), region = 32 }
  0x3f   : > { %976 = dma.done.wait (%p1175_p2), [#allocation3], 1792   ;;  %p1176_p7 = pmov %p1175_p2 }
  0x40   : > { %p1177_p3 = pmov %p1175_p2 }
  0x41   : > { %978 = vsyncadd (%p1176_p7), [#allocation3], 4294965504 }
  0x42   : > { %980 = dma.done.wait (%p1177_p3), [#allocation5], 256   ;;  %p1178_p8 = pmov %p1175_p2 }
  0x43   : > { %p191_p9 = scmp.lt.s32.totalorder %s1017_s13, 11  ;;  %vm217_vm0 = vcmask 130048   ;;  %v203_v2 = vld [vmem:[#allocation2] sm:$0xff]  ;;  %v204_v4 = vld [vmem:[#allocation2 + $0x8] sm:$0xff]  ;;  %v205_v5 = vld [vmem:[#allocation2 + $0x10] sm:$0xff]  ;;  %vm630_vm1 = vcmask 912384  }
  0x44   : > { %982 = vsyncadd (%p1178_p8), [#allocation5], 4294967040  ;;  %829 = vmatprep.mubr.msk.f32.mxu0 %vm217_vm0, %v203_v2  ;;  %v395_v6 = vld [vmem:[#allocation4] sm:$0xff]  ;;  %v396_v7 = vld [vmem:[#allocation4 + $0x8] sm:$0xff] }
  0x45   : > { %s1180_s13 = smov (!%p191_p9, %s1017_s13), 11  ;;  %v879_v8 = vpack.c.bf16 %v396_v7, %v395_v6  ;;  %v206_v9 = vld [vmem:[#allocation2 + $0x18] sm:$0xff]  ;;  %v207_v10 = vld [vmem:[#allocation2 + $0x20] sm:$0xff]  ;;  %v208_v11 = vld [vmem:[#allocation2 + $0x28] sm:$0xff] }
  0x46   : > { %s778_s16 = sshll.u32 %s1180_s13, 4  ;;  %v209_v12 = vld [vmem:[#allocation2 + $0x30] sm:$0xff]  ;;  %v210_v13 = vld [vmem:[#allocation2 + $0x38] sm:$0xff]  ;;  %v211_v14 = vld [vmem:[#allocation2 + $0x40] sm:$0xff]  ;;  %s883_s21 = smul.u32 56, %s1180_s13 }
  0x47   : > { %s195_s20 = scalar_lea.vmem %s1168_s2, %s778_s16  ;;  %880 = vmatprep.subr.bf16.mxu1 %v879_v8  ;;  %v212_v15 = vld [vmem:[#allocation2 + $0x48] sm:$0xff]  ;;  %v213_v16 = vld [vmem:[#allocation2 + $0x50] sm:$0xff]  ;;  %v214_v17 = vld [vmem:[#allocation2 + $0x58] sm:$0xff] }
  0x48   : > { %v201_v0 = vld [vmem:[%s195_s20] sm:$0xff]  ;;  %v202_v1 = vld [vmem:[%s195_s20 + $0x8] sm:$0xff]  ;;  %882 = vmatpush3.bf16.msra.mxu1 %v879_v8  ;;  %s1133_s24 = scalar_lea.vmem %s1169_s3, %s883_s21 }
  0x49   : > { %v875_v3 = vpack.c.bf16 %v202_v1, %v201_v0  ;;  %v215_v18 = vld [vmem:[#allocation2 + $0x60] sm:$0xff]  ;;  %v216_v19 = vld [vmem:[#allocation2 + $0x68] sm:$0xff] }
  0x4b   : > { %876 = vmatprep.subr.bf16.mxu0 %v875_v3 }
  0x4c   : > { %878 = vmatpush3.bf16.msra.mxu0 %v875_v3 }
  0x4f   : > { %830 = vmatmul.mubr.msk.f32.vlgmr.msra.gmra.mrb[0].mxu0 %vm217_vm0, %v204_v4 }
  0x50   : > { %832 = vmatprep.mubr.msk.f32.mxu0 %vm217_vm0, %v205_v5 }
  0x53   : > { %833 = vmatmul.mubr.msk.f32.gmra.mrb[2].mxu0 %vm217_vm0, %v206_v9 }
  0x54   : > { %835 = vmatprep.mubr.msk.f32.mxu0 %vm217_vm0, %v207_v10 }
  0x57   : > { %836 = vmatmul.mubr.msk.f32.gmra.mrb[4].mxu0 %vm217_vm0, %v208_v11 }
  0x58   : > { %838 = vmatprep.mubr.msk.f32.mxu0 %vm217_vm0, %v209_v12 }
  0x5b   : > { %839 = vmatmul.mubr.msk.f32.gmra.mrb[6].mxu0 %vm217_vm0, %v210_v13 }
  0x5c   : > { %841 = vmatprep.mubr.msk.f32.mxu0 %vm217_vm0, %v211_v14 }
  0x5f   : > { %842 = vmatmul.mubr.msk.f32.gmra.mrb[8].mxu0 %vm217_vm0, %v212_v15 }
  0x60   : > { %844 = vmatprep.mubr.msk.f32.mxu0 %vm217_vm0, %v213_v16 }
  0x63   : > { %845 = vmatmul.mubr.msk.f32.gmra.mrb[10].mxu0 %vm217_vm0, %v214_v17 }
  0x64   : > { %847 = vmatprep.mubr.msk.f32.mxu0 %vm217_vm0, %v215_v18 }
  0x67   : > { %848 = vmatmul.mubr.msk.f32.gmra.mrb[12].mxu0 %vm217_vm0, %v216_v19 }
 0x122   : > { %v831_v20 = vpop.f32.mrb[0].mxu0 }
 0x123   : > { %v326_v21 = vpop.f32.mrb[1].mxu0 }
 0x124   : > { %854 = vmatprep.mubr.msk.f32.mxu1 %vm217_vm0, %v326_v21 }
 0x125   : > { %855 = vmatmul.mubr.msk.f32.vlgmr.msra.gmra.mrb[0].mxu1 %vm217_vm0, %v831_v20 }
 0x126   : > { %v834_v22 = vpop.f32.mrb[2].mxu0 }
 0x127   : > { %v336_v23 = vpop.f32.mrb[3].mxu0 }
 0x128   : > { %857 = vmatprep.mubr.msk.f32.mxu1 %vm217_vm0, %v336_v23 }
 0x129   : > { %858 = vmatmul.mubr.msk.f32.gmra.mrb[2].mxu1 %vm217_vm0, %v834_v22 }
 0x12a   : > { %v837_v24 = vpop.f32.mrb[4].mxu0 }
 0x12b   : > { %v346_v25 = vpop.f32.mrb[5].mxu0 }
 0x12c   : > { %860 = vmatprep.mubr.msk.f32.mxu1 %vm217_vm0, %v346_v25 }
 0x12d   : > { %861 = vmatmul.mubr.msk.f32.gmra.mrb[4].mxu1 %vm217_vm0, %v837_v24 }
 0x12e   : > { %v840_v26 = vpop.f32.mrb[6].mxu0 }
 0x12f   : > { %v356_v27 = vpop.f32.mrb[7].mxu0 }
 0x130   : > { %863 = vmatprep.mubr.msk.f32.mxu1 %vm217_vm0, %v356_v27 }
 0x131   : > { %864 = vmatmul.mubr.msk.f32.gmra.mrb[6].mxu1 %vm217_vm0, %v840_v26 }
 0x132   : > { %v843_v28 = vpop.f32.mrb[8].mxu0 }
 0x133   : > { %v366_v29 = vpop.f32.mrb[9].mxu0 }
 0x134   : > { %866 = vmatprep.mubr.msk.f32.mxu1 %vm217_vm0, %v366_v29 }
 0x135   : > { %867 = vmatmul.mubr.msk.f32.gmra.mrb[8].mxu1 %vm217_vm0, %v843_v28 }
 0x136   : > { %v846_v30 = vpop.f32.mrb[10].mxu0 }
 0x137   : > { %v376_v31 = vpop.f32.mrb[11].mxu0 }
 0x138   : > { %869 = vmatprep.mubr.msk.f32.mxu1 %vm217_vm0, %v376_v31 }
 0x139   : > { %870 = vmatmul.mubr.msk.f32.gmra.mrb[10].mxu1 %vm217_vm0, %v846_v30 }
 0x13a   : > { %v849_v32 = vpop.f32.mrb[12].mxu0 }
 0x13b   : > { %v386_v33 = vpop.f32.mrb[13].mxu0 }
 0x13c   : > { %872 = vmatprep.mubr.msk.f32.mxu1 %vm217_vm0, %v386_v33 }
 0x13d   : > { %873 = vmatmul.mubr.msk.f32.gmra.mrb[12].mxu1 %vm217_vm0, %v849_v32 }
 0x1f8   : > { %v856_v34 = vpop.f32.mrb[0].mxu1 }
 0x1f9   : > { %v780_v35 = vpack.c.bf16 %v856_v34, %v856_v34  ;;  %v505_v36 = vpop.f32.mrb[1].mxu1 }
 0x1fa   : > { %v779_v37 = vpack.c.bf16 %v505_v36, %v505_v36 }
 0x1fb   : > { %632 = vst.msk [vmem:[%s1133_s24 + $0x4] sm:$0xf] %vm630_vm1, %v780_v35 }
 0x1fc   : > { %631 = vst.msk [vmem:[%s1133_s24] sm:$0xf] %vm630_vm1, %v779_v37  ;;  %v859_v38 = vpop.f32.mrb[2].mxu1 }
 0x1fd   : > { %v782_v39 = vpack.c.bf16 %v859_v38, %v859_v38  ;;  %v515_v40 = vpop.f32.mrb[3].mxu1 }
 0x1fe   : > { %v781_v41 = vpack.c.bf16 %v515_v40, %v515_v40 }
 0x1ff   : > { %634 = vst.msk [vmem:[%s1133_s24 + $0xc] sm:$0xf] %vm630_vm1, %v782_v39 }
 0x200   : > { %633 = vst.msk [vmem:[%s1133_s24 + $0x8] sm:$0xf] %vm630_vm1, %v781_v41  ;;  %v862_v42 = vpop.f32.mrb[4].mxu1 }
 0x201   : > { %v784_v43 = vpack.c.bf16 %v862_v42, %v862_v42  ;;  %v525_v44 = vpop.f32.mrb[5].mxu1 }
 0x202   : > { %v783_v45 = vpack.c.bf16 %v525_v44, %v525_v44 }
 0x203   : > { %636 = vst.msk [vmem:[%s1133_s24 + $0x14] sm:$0xf] %vm630_vm1, %v784_v43 }
 0x204   : > { %635 = vst.msk [vmem:[%s1133_s24 + $0x10] sm:$0xf] %vm630_vm1, %v783_v45  ;;  %v865_v46 = vpop.f32.mrb[6].mxu1 }
 0x205   : > { %v786_v47 = vpack.c.bf16 %v865_v46, %v865_v46  ;;  %v535_v48 = vpop.f32.mrb[7].mxu1 }
 0x206   : > { %v785_v49 = vpack.c.bf16 %v535_v48, %v535_v48 }
 0x207   : > { %638 = vst.msk [vmem:[%s1133_s24 + $0x1c] sm:$0xf] %vm630_vm1, %v786_v47 }
 0x208   : > { %637 = vst.msk [vmem:[%s1133_s24 + $0x18] sm:$0xf] %vm630_vm1, %v785_v49  ;;  %v868_v50 = vpop.f32.mrb[8].mxu1 }
 0x209   : > { %v788_v51 = vpack.c.bf16 %v868_v50, %v868_v50  ;;  %v545_v52 = vpop.f32.mrb[9].mxu1 }
 0x20a   : > { %v787_v53 = vpack.c.bf16 %v545_v52, %v545_v52 }
 0x20b   : > { %640 = vst.msk [vmem:[%s1133_s24 + $0x24] sm:$0xf] %vm630_vm1, %v788_v51 }
 0x20c   : > { %639 = vst.msk [vmem:[%s1133_s24 + $0x20] sm:$0xf] %vm630_vm1, %v787_v53  ;;  %v871_v54 = vpop.f32.mrb[10].mxu1 }
 0x20d   : > { %v790_v55 = vpack.c.bf16 %v871_v54, %v871_v54  ;;  %v555_v56 = vpop.f32.mrb[11].mxu1 }
 0x20e   : > { %v789_v57 = vpack.c.bf16 %v555_v56, %v555_v56 }
 0x20f   : > { %642 = vst.msk [vmem:[%s1133_s24 + $0x2c] sm:$0xf] %vm630_vm1, %v790_v55 }
 0x210   : > { %641 = vst.msk [vmem:[%s1133_s24 + $0x28] sm:$0xf] %vm630_vm1, %v789_v57  ;;  %v874_v58 = vpop.f32.mrb[12].mxu1 }
 0x211   : > { %v792_v59 = vpack.c.bf16 %v874_v58, %v874_v58  ;;  %v565_v60 = vpop.f32.mrb[13].mxu1 }
 0x212   : > { %v791_v61 = vpack.c.bf16 %v565_v60, %v565_v60 }
 0x213   : > { %644 = vst.msk [vmem:[%s1133_s24 + $0x34] sm:$0xf] %vm630_vm1, %v792_v59 }
 0x214   : > { %643 = vst.msk [vmem:[%s1133_s24 + $0x30] sm:$0xf] %vm630_vm1, %v791_v61 }
 0x215 PF: > { %s15_s12 = sadd.s32 1, %s985_s12  }
 0x216   : > { %p12_p5 = scmp.ge.s32.totalorder %s15_s12, 14  }
 0x218   :  { %14 = sbr.rel (!%p12_p5) target bundleno = 2 (0x2), region = 71 }
 0x21f   :  { %666 = vsyncpa [#allocation3], 1 }
 0x220   :  { %668 = vsyncpa [#allocation3 + $0x1], 1 }
 0x221   :  { %669 = vsyncpa [#allocation5], 1 }

// kernel: id_loss.3
= control target key start
LH: loop header
LB: loop body
LE: loop exit
PB: predicated region body
PF: predicated region fallthrough
CT: control target
= control target key end

     0   :  { %8 = vsyncpa [#allocation4], 0  ;;  %s13028_s0 = inlined_call_operand.vmem [shape: bf16[8,37632], index: 0, kind: input, shape index: {}]   ;;  %s13029_s1 = inlined_call_operand.hbm [shape: bf16[37632,128], index: 1, kind: input, shape index: {}]   ;;  %s13030_s2 = inlined_call_operand.hbm [shape: f32[1,128], index: 2, kind: input, shape index: {}]   ;;  %s13031_s3 = inlined_call_operand.vmem [shape: f32[2,128], index: 3, kind: output, shape index: {}]  }
   0x1   :  { %10 = vsyncpa [#allocation4 + $0x1], 0 }
   0x2   :  { %11 = vsyncpa [#allocation6], 0  ;;  %s11989_s12 = smov 0   ;;  %s11991_s13 = smov 0  }
   0x3   :  { %s11993_s14 = smov 0   ;;  %s11995_s15 = smov 0  }
   0x4 LB: > { %s12008_s16 = sadd.s32 4294967295, %s11961_s15   ;;  %s12011_s17 = sadd.s32 1, %s11961_s15   ;;  %s11961_s15 = sphi %s11995_s15, %s13050_s15   ;;  %s11957_s14 = sphi %s11993_s14, %s13049_s14   ;;  %s11953_s13 = sphi %s11991_s13, %s13048_s13   ;;  %s11949_s12 = sphi %s11989_s12, %s13047_s12  }
   0x5   : > { %s47_s18 = ssub.s32 %s11961_s15, %s12011_s17  ;;  %s50_s19 = sadd.s32 1, %s11957_s14 }
   0x6   : > { %p48_p0 = scmp.eq.s32.totalorder %s47_s18, 0  ;;  %p57_p1 = scmp.ne.s32.totalorder %s11957_s14, %s11953_s13 }
   0x7   : > { %p58_p2 = scmp.eq.s32.totalorder %s11961_s15, 0  ;;  %p63_p3 = scmp.ne.s32.totalorder %s11953_s13, %s11949_s12 }
   0x8   : > { %s12021_s20 = scalar_select %p48_p0, %s11957_s14, %s50_s19  }
   0x9   : > { %p12023_p4 = por %p58_p2, %p57_p1  ;;  %p13032_p5 = scmp.eq.s32.totalorder %s12008_s16, 0 }
   0xa   : > { %p8950_p6 = scmp.ge.s32.totalorder %s11961_s15, 1  ;;  %p116_p7 = scmp.lt.s32.totalorder %s11961_s15, 4 }
   0xb   : > { %p12032_p8 = por %p13032_p5, %p63_p3  ;;  %s11963_s24 = smov [#allocation5]  }
   0xc   : > { %p12037_p10 = pnand %p8950_p6, %p116_p7  ;;  %s129_s25 = sshll.u32 %s11963_s24, 4  ;;  %s130_s25 = int_to_ptr.vmem [resolvable:$true] %s129_s25 }
   0xd   : > { %s13037_s22 = scalar_select %p12032_p8, 1, 0 }
   0xe   : > { %s13038_s23 = scalar_select %p12037_p10, 1, 0 }
   0xf   : > { %p10931_p11 = pneg %p12037_p10  ;;  %p10940_p12 = scmp.lt.s32.totalorder %s11961_s15, 3 }
  0x10   : > { %s149_s26 = sand.u32 1, %s11957_s14   ;;  %s9844_s30 = smul.u32 100352, %s11961_s15 }
  0x11   : > { %p12047_p13 = pnand %p10931_p11, %p13032_p5  ;;  %p12053_p0 = pnand %p10940_p12, %p12023_p4 }
  0x12   : > { %s10923_s29 = smul.u32 6272, %s149_s26  ;;  %s11865_s6 = scalar_lea.hbm %s13030_s2, 16 }
  0x13   : > { %s13040_s28 = scalar_select %p12053_p0, 1, 0 }
  0x14   : > { %p11866_p1 = scmp.ne.s32.totalorder %s13030_s2, %s11865_s6  ;;  %p11867_p2 = pneg %p12047_p13 }
  0x15   : > { %p11872_p4 = scmp.lt.u32.totalorder %s11865_s6, %s13030_s2 }
  0x16   : > { %p11868_p3 = pnand %p11867_p2, %p11866_p1 }
  0x18   : > { %p11869_p6 = pneg %p11868_p3 }
  0x1a   : > { %p11874_p7 = pnand %p11872_p4, %p11869_p6 }
  0x1c   : > { %11877 = shalt.err (!%p11874_p7)
}
  0x1d   : > { %s11878_s11 = scalar_lea.vmem %s130_s25, 16  ;;  %s11885_s12 = scalar_lea.vmem %s130_s25, 32 }
  0x1e   : > { %p11879_p11 = scmp.ne.s32.totalorder %s130_s25, %s11878_s11  ;;  %p11886_p5 = scmp.lt.s32.totalorder %s130_s25, %s130_s25 }
  0x1f   : > { %p11887_p8 = scmp.lt.s32.totalorder %s11885_s12, %s11878_s11 }
  0x20   : > { %p11881_p12 = pnand %p11879_p11, %p11867_p2 }
  0x21   : > { %p11888_p10 = por %p11887_p8, %p11886_p5 }
  0x22   : > { %p11882_p9 = pneg %p11881_p12 }
  0x24   : > { %p11889_p0 = pnand %p11888_p10, %p11882_p9 }
  0x26   : > { %11892 = shalt.err (!%p11889_p0)
}
  0x27   : > { %10934 = dma.hbm_to_vmem [thread:$0]  (!%p12047_p13), %s13030_s2, 16, %s130_s25, [#allocation6]  }
  0x28   : > { %s12077_s24 = scalar_lea.hbm %s13029_s1, %s9844_s30  ;;  %s153_s4 = scalar_lea.vmem [#allocation3], %s10923_s29 }
  0x29   : > { %s160_s5 = sshll.u32 %s153_s4, 4  ;;  %s12081_s27 = scalar_lea.sflag [#allocation4], %s149_s26  ;;  %s12079_s5 = int_to_ptr.vmem [resolvable:$true] %s160_s5 }
  0x2a   : > { %s11893_s6 = scalar_lea.hbm %s12077_s24, 100352  ;;  %p13041_p8 = scmp.ne.s32.totalorder %s13040_s28, 0 }
  0x2b   : > { %p11894_p5 = scmp.ne.s32.totalorder %s12077_s24, %s11893_s6  ;;  %s11898_s7 = scalar_lea.hbm %s13029_s1, 301056 }
  0x2c   : > { %p11895_p9 = pneg %p13041_p8  ;;  %p11899_p0 = scmp.lt.u32.totalorder %s12077_s24, %s13029_s1 }
  0x2d   : > { %p11900_p1 = scmp.lt.u32.totalorder %s11898_s7, %s11893_s6  ;;  %p11902_p3 = scmp.lt.u32.totalorder %s11893_s6, %s12077_s24 }
  0x2e   : > { %p11896_p10 = pnand %p11895_p9, %p11894_p5 }
  0x2f   : > { %p11901_p2 = por %p11900_p1, %p11899_p0 }
  0x30   : > { %p11897_p13 = pneg %p11896_p10 }
  0x31   : > { %p11903_p6 = por %p11902_p3, %p11901_p2 }
  0x33   : > { %p11904_p4 = pnand %p11903_p6, %p11897_p13 }
  0x35   : > { %11907 = shalt.err (!%p11904_p4)
}
  0x36   : > { %s11908_s26 = scalar_lea.vmem %s12079_s5, 100352  ;;  %s11964_s29 = smov [#allocation3]  }
  0x37   : > { %p11909_p7 = scmp.ne.s32.totalorder %s12079_s5, %s11908_s26  ;;  %s11913_s10 = sshll.u32 %s11964_s29, 4  ;;  %s11914_s10 = int_to_ptr.vmem [resolvable:$false] %s11913_s10 }
  0x38   : > { %s11915_s11 = scalar_lea.vmem %s11914_s10, 200704  ;;  %p11916_p5 = scmp.lt.s32.totalorder %s12079_s5, %s11914_s10 }
  0x39   : > { %p11911_p11 = pnand %p11909_p7, %p11895_p9  ;;  %p11917_p10 = scmp.lt.s32.totalorder %s11915_s11, %s11908_s26 }
  0x3b   : > { %p11912_p12 = pneg %p11911_p11  ;;  %p11918_p0 = por %p11917_p10, %p11916_p5 }
  0x3d   : > { %p11919_p1 = pnand %p11918_p0, %p11912_p12 }
  0x3f   : > { %11922 = shalt.err (!%p11919_p1)
}
  0x40   : > { %s11965_s12 = smov 64   ;;  %s11966_s15 = smov 4  }
  0x41   : > { %10938 = dma.hbm_to_vmem [thread:$0]  (!%p13041_p8), %s12077_s24, 100352, %s12079_s5, %s12081_s27, %s11965_s12, %s11965_s12, %s11966_s15  }
  0x42   : > { %p13042_p9 = scmp.ne.s32.totalorder %s13038_s23, 0 }
  0x43   : > { %s174_s18 = sand.u32 (!%p13042_p9), 1, %s11953_s13   ;;  %p13043_p13 = scmp.ne.s32.totalorder (!%p13042_p9), %s13037_s22, 0 }
  0x44   : > { %172 = sbr.rel (%p13042_p9) target bundleno = 1416 (0x588), region = 32  ;;  %s175_s21 = scalar_lea.sflag (!%p13042_p9), [#allocation4], %s174_s18 }
  0x45   : > { %s10924_s19 = smul.u32 (!%p13042_p9), 6272, %s174_s18 }
  0x47   : > { %s12112_s4 = scalar_lea.vmem (!%p13042_p9), [#allocation3], %s10924_s19 }
  0x4b   : > { %11940 = dma.done.wait (%p13043_p13), %s175_s21, 100352  }
  0x4c   : > { %11942 = vsyncadd (%p13043_p13), %s175_s21, 4294866944  ;;  %p13044_p2 = scmp.eq.s32.totalorder %s12008_s16, 0 }
  0x4e   : > { %11944 = dma.done.wait (%p13044_p2), [#allocation6], 16   ;;  %p13045_p8 = pmov %p13044_p2 }
  0x4f   : > { %s205_s23 = smul.u32 98, %s12008_s16  ;;  %p13046_p6 = scmp.ne.s32.totalorder %s12008_s16, 0 }
  0x50   : > { %11946 = vsyncadd (%p13045_p8), [#allocation6], 4294967280  ;;  %v11967_v0 = vmov (!%p13046_p6), 0.0  }
  0x51   : > { %p206_p3 = scmp.lt.s32.totalorder %s205_s23, 293  ;;  %216 = sbr.rel (%p13046_p6) target bundleno = 88 (0x58), region = 44  ;;  %217 = vst [vmem:[#allocation2] sm:$0xff] (!%p13046_p6), %v11967_v0 }
  0x53   : > { %s13052_s23 = smov (!%p206_p3, %s205_s23), 293 }
  0x54   : > { %s8956_s28 = sshll.u32 %s13052_s23, 2 }
  0x55   : > { %s12126_s27 = scalar_lea.vmem %s13028_s0, %s8956_s28 }
  0x58 PF: > { %v10979_v1 = vld [vmem:[%s12112_s4 + $0x40] sm:$0xff]   ;;  %v10983_v5 = vld [vmem:[%s12112_s4 + $0x48] sm:$0xff]   ;;  %v10987_v9 = vld [vmem:[%s12112_s4 + $0x50] sm:$0xff]   ;;  %p9840_p4 = scmp.ne.s32.totalorder %s12008_s16, 2 }
  0x59   : > { %v10980_v2 = vld [vmem:[%s12112_s4 + $0xc0] sm:$0xff]   ;;  %9845 = vmatprep.subr.bf16.mxu0 %v10979_v1  ;;  %v10984_v6 = vld [vmem:[%s12112_s4 + $0xc8] sm:$0xff]   ;;  %v10988_v10 = vld [vmem:[%s12112_s4 + $0xd0] sm:$0xff]   ;;  %vm8870_vm0 = vcmask (!%p9840_p4), 1043458   ;;  %vm8862_vm1 = vcmask (!%p9840_p4), 1041408  }
  0x5a   : > { %v10981_v3 = vld [vmem:[%s12112_s4] sm:$0xff]   ;;  %9867 = vmatprep.subr.bf16.mxu1 %v10980_v2  ;;  %v10985_v7 = vld [vmem:[%s12112_s4 + $0x8] sm:$0xff]   ;;  %v10989_v11 = vld [vmem:[%s12112_s4 + $0x10] sm:$0xff]  }
  0x5b   : > { %v10982_v4 = vld [vmem:[%s12112_s4 + $0x80] sm:$0xff]   ;;  %9846 = vmatpush3.bf16.msra.mxu0 %v10981_v3  ;;  %v10986_v8 = vld [vmem:[%s12112_s4 + $0x88] sm:$0xff]   ;;  %v10990_v12 = vld [vmem:[%s12112_s4 + $0x90] sm:$0xff]  }
  0x5c   : > { %9868 = vmatpush3.bf16.msra.mxu1 %v10982_v4  ;;  %9847 = vmatprep.subr.bf16.mxu0 %v10983_v5  ;;  %v10991_v13 = vld [vmem:[%s12112_s4 + $0x58] sm:$0xff]   ;;  %v10995_v17 = vld [vmem:[%s12112_s4 + $0x60] sm:$0xff]   ;;  %v10999_v21 = vld [vmem:[%s12112_s4 + $0x68] sm:$0xff]  }
  0x5d   : > { %9869 = vmatprep.subr.bf16.mxu1 %v10984_v6  ;;  %v10992_v14 = vld [vmem:[%s12112_s4 + $0xd8] sm:$0xff]   ;;  %v10996_v18 = vld [vmem:[%s12112_s4 + $0xe0] sm:$0xff]   ;;  %v11000_v22 = vld [vmem:[%s12112_s4 + $0xe8] sm:$0xff]  }
  0x5e   : > { %v10993_v15 = vld [vmem:[%s12112_s4 + $0x18] sm:$0xff]   ;;  %v10997_v19 = vld [vmem:[%s12112_s4 + $0x20] sm:$0xff]   ;;  %v11001_v23 = vld [vmem:[%s12112_s4 + $0x28] sm:$0xff]  }
  0x5f   : > { %9848 = vmatpush3.bf16.msra.mxu0 %v10985_v7  ;;  %v10994_v16 = vld [vmem:[%s12112_s4 + $0x98] sm:$0xff]   ;;  %v10998_v20 = vld [vmem:[%s12112_s4 + $0xa0] sm:$0xff]   ;;  %v11002_v24 = vld [vmem:[%s12112_s4 + $0xa8] sm:$0xff]  }
  0x60   : > { %9870 = vmatpush3.bf16.msra.mxu1 %v10986_v8  ;;  %9849 = vmatprep.subr.bf16.mxu0 %v10987_v9  ;;  %v11003_v25 = vld [vmem:[%s12112_s4 + $0x70] sm:$0xff]   ;;  %v11007_v29 = vld [vmem:[%s12112_s4 + $0x78] sm:$0xff]   ;;  %v220_v34 = vld [vmem:[%s12126_s27 + $0x8] sm:$0xff] }
  0x61   : > { %9871 = vmatprep.subr.bf16.mxu1 %v10988_v10  ;;  %v11004_v26 = vld [vmem:[%s12112_s4 + $0xf0] sm:$0xff]   ;;  %v11008_v30 = vld [vmem:[%s12112_s4 + $0xf8] sm:$0xff]   ;;  %v8960_v37 = vcombine.low %v220_v34, %v220_v34  ;;  %v8961_v38 = vcombine.high %v220_v34, %v220_v34  ;;  %v11015_v39 = vld [vmem:[%s12112_s4 + $0x140] sm:$0xff]  }
  0x62   : > { %v11005_v27 = vld [vmem:[%s12112_s4 + $0x30] sm:$0xff]   ;;  %v11009_v31 = vld [vmem:[%s12112_s4 + $0x38] sm:$0xff]   ;;  %v11016_v40 = vld [vmem:[%s12112_s4 + $0x100] sm:$0xff]  }
  0x63   : > { %9850 = vmatpush3.bf16.msra.mxu0 %v10989_v11  ;;  %v11006_v28 = vld [vmem:[%s12112_s4 + $0xb0] sm:$0xff]   ;;  %v11010_v32 = vld [vmem:[%s12112_s4 + $0xb8] sm:$0xff]   ;;  %6955 = vmatprep.mubr.bf16.mxu1 %v8961_v38  ;;  %v11017_v41 = vld [vmem:[%s12112_s4 + $0x1c0] sm:$0xff]  }
  0x64   : > { %9872 = vmatpush3.bf16.msra.mxu1 %v10990_v12  ;;  %9851 = vmatprep.subr.bf16.mxu0 %v10991_v13  ;;  %v219_v33 = vld [vmem:[%s12126_s27] sm:$0xff]  ;;  %v11018_v42 = vld [vmem:[%s12112_s4 + $0x180] sm:$0xff]   ;;  %v11019_v43 = vld [vmem:[%s12112_s4 + $0x148] sm:$0xff]  }
  0x65   : > { %9873 = vmatprep.subr.bf16.mxu1 %v10992_v14  ;;  %v8958_v35 = vcombine.low %v219_v33, %v219_v33  ;;  %v8959_v36 = vcombine.high %v219_v33, %v219_v33  ;;  %v11020_v44 = vld [vmem:[%s12112_s4 + $0x108] sm:$0xff]   ;;  %v11023_v47 = vld [vmem:[%s12112_s4 + $0x150] sm:$0xff]   ;;  %v11027_v51 = vld [vmem:[%s12112_s4 + $0x158] sm:$0xff]  }
  0x66   : > { %v11021_v45 = vld [vmem:[%s12112_s4 + $0x1c8] sm:$0xff]   ;;  %v11024_v48 = vld [vmem:[%s12112_s4 + $0x110] sm:$0xff]   ;;  %v11028_v52 = vld [vmem:[%s12112_s4 + $0x118] sm:$0xff]  }
  0x67   : > { %9852 = vmatpush3.bf16.msra.mxu0 %v10993_v15  ;;  %6915 = vmatprep.mubr.bf16.mxu0 %v8959_v36  ;;  %v11022_v46 = vld [vmem:[%s12112_s4 + $0x188] sm:$0xff]   ;;  %v11025_v49 = vld [vmem:[%s12112_s4 + $0x1d0] sm:$0xff]   ;;  %v11029_v53 = vld [vmem:[%s12112_s4 + $0x1d8] sm:$0xff]  }
  0x68   : > { %9874 = vmatpush3.bf16.msra.mxu1 %v10994_v16  ;;  %9853 = vmatprep.subr.bf16.mxu0 %v10995_v17  ;;  %v11026_v50 = vld [vmem:[%s12112_s4 + $0x190] sm:$0xff]   ;;  %v11030_v54 = vld [vmem:[%s12112_s4 + $0x198] sm:$0xff]   ;;  %v11031_v55 = vld [vmem:[%s12112_s4 + $0x160] sm:$0xff]  }
  0x69   : > { %9875 = vmatprep.subr.bf16.mxu1 %v10996_v18  ;;  %v11032_v56 = vld [vmem:[%s12112_s4 + $0x120] sm:$0xff]   ;;  %v11035_v59 = vld [vmem:[%s12112_s4 + $0x168] sm:$0xff]   ;;  %v11039_v63 = vld [vmem:[%s12112_s4 + $0x170] sm:$0xff]  }
  0x6a   : > { %v11033_v57 = vld [vmem:[%s12112_s4 + $0x1e0] sm:$0xff]   ;;  %v11036_v60 = vld [vmem:[%s12112_s4 + $0x128] sm:$0xff]   ;;  %v11040_v0 = vld [vmem:[%s12112_s4 + $0x130] sm:$0xff]  }
  0x6b   : > { %9854 = vmatpush3.bf16.msra.mxu0 %v10997_v19  ;;  %v11034_v58 = vld [vmem:[%s12112_s4 + $0x1a0] sm:$0xff]   ;;  %v11037_v61 = vld [vmem:[%s12112_s4 + $0x1e8] sm:$0xff]   ;;  %v11041_v1 = vld [vmem:[%s12112_s4 + $0x1f0] sm:$0xff]  }
  0x6c   : > { %9876 = vmatpush3.bf16.msra.mxu1 %v10998_v20  ;;  %9855 = vmatprep.subr.bf16.mxu0 %v10999_v21  ;;  %v11038_v62 = vld [vmem:[%s12112_s4 + $0x1a8] sm:$0xff]   ;;  %v11042_v2 = vld [vmem:[%s12112_s4 + $0x1b0] sm:$0xff]   ;;  %v11043_v3 = vld [vmem:[%s12112_s4 + $0x178] sm:$0xff]  }
  0x6d   : > { %9877 = vmatprep.subr.bf16.mxu1 %v11000_v22  ;;  %v11044_v4 = vld [vmem:[%s12112_s4 + $0x138] sm:$0xff]   ;;  %v221_v6 = vld [vmem:[%s12126_s27 + $0x10] sm:$0xff]  ;;  %v11049_v10 = vld [vmem:[%s12112_s4 + $0x240] sm:$0xff]  }
  0x6e   : > { %v11045_v5 = vld [vmem:[%s12112_s4 + $0x1f8] sm:$0xff]   ;;  %v8963_v7 = vcombine.high %v221_v6, %v221_v6  ;;  %v8962_v9 = vcombine.low %v221_v6, %v221_v6  ;;  %v222_v11 = vld [vmem:[%s12126_s27 + $0x18] sm:$0xff]  ;;  %v11052_v14 = vld [vmem:[%s12112_s4 + $0x200] sm:$0xff]  }
  0x6f   : > { %9856 = vmatpush3.bf16.msra.mxu0 %v11001_v23  ;;  %v11048_v8 = vld [vmem:[%s12112_s4 + $0x1b8] sm:$0xff]   ;;  %v8964_v12 = vcombine.low %v222_v11, %v222_v11  ;;  %v8965_v13 = vcombine.high %v222_v11, %v222_v11  ;;  %v11053_v15 = vld [vmem:[%s12112_s4 + $0x2c0] sm:$0xff]   ;;  %v11055_v17 = vld [vmem:[%s12112_s4 + $0x248] sm:$0xff]  }
  0x70   : > { %9878 = vmatpush3.bf16.msra.mxu1 %v11002_v24  ;;  %9857 = vmatprep.subr.bf16.mxu0 %v11003_v25  ;;  %v11054_v16 = vld [vmem:[%s12112_s4 + $0x280] sm:$0xff]   ;;  %v11056_v18 = vld [vmem:[%s12112_s4 + $0x208] sm:$0xff]   ;;  %v11059_v21 = vld [vmem:[%s12112_s4 + $0x250] sm:$0xff]  }
  0x71   : > { %9879 = vmatprep.subr.bf16.mxu1 %v11004_v26  ;;  %v11057_v19 = vld [vmem:[%s12112_s4 + $0x2c8] sm:$0xff]   ;;  %v11060_v22 = vld [vmem:[%s12112_s4 + $0x210] sm:$0xff]   ;;  %v11063_v25 = vld [vmem:[%s12112_s4 + $0x258] sm:$0xff]  }
  0x72   : > { %v11058_v20 = vld [vmem:[%s12112_s4 + $0x288] sm:$0xff]   ;;  %v11061_v23 = vld [vmem:[%s12112_s4 + $0x2d0] sm:$0xff]   ;;  %v11064_v26 = vld [vmem:[%s12112_s4 + $0x218] sm:$0xff]  }
  0x73   : > { %9858 = vmatpush3.bf16.msra.mxu0 %v11005_v27  ;;  %v11062_v24 = vld [vmem:[%s12112_s4 + $0x290] sm:$0xff]   ;;  %v11065_v27 = vld [vmem:[%s12112_s4 + $0x2d8] sm:$0xff]   ;;  %v11071_v33 = vld [vmem:[%s12112_s4 + $0x268] sm:$0xff]  }
  0x74   : > { %9880 = vmatpush3.bf16.msra.mxu1 %v11006_v28  ;;  %9859 = vmatprep.subr.bf16.mxu0 %v11007_v29  ;;  %v11066_v28 = vld [vmem:[%s12112_s4 + $0x298] sm:$0xff]   ;;  %v11067_v29 = vld [vmem:[%s12112_s4 + $0x260] sm:$0xff]   ;;  %v11072_v34 = vld [vmem:[%s12112_s4 + $0x228] sm:$0xff]  }
  0x75   : > { %9881 = vmatprep.subr.bf16.mxu1 %v11008_v30  ;;  %v11068_v30 = vld [vmem:[%s12112_s4 + $0x220] sm:$0xff]   ;;  %v11074_v36 = vld [vmem:[%s12112_s4 + $0x2a8] sm:$0xff]   ;;  %v11076_v38 = vld [vmem:[%s12112_s4 + $0x230] sm:$0xff]  }
  0x76   : > { %v11106_v6 = vld [vmem:[%s12112_s4 + $0x3a0] sm:$0xff]   ;;  %v11111_v11 = vld [vmem:[%s12112_s4 + $0x370] sm:$0xff]  }
  0x77   : > { %9860 = vmatpush3.bf16.msra.mxu0 %v11009_v31  ;;  %v11069_v31 = vld [vmem:[%s12112_s4 + $0x2e0] sm:$0xff]  }
  0x78   : > { %9882 = vmatpush3.bf16.msra.mxu1 %v11010_v32  ;;  %9889 = vmatprep.subr.bf16.mxu0 %v11015_v39  ;;  %v11070_v32 = vld [vmem:[%s12112_s4 + $0x2a0] sm:$0xff]   ;;  %v11077_v39 = vld [vmem:[%s12112_s4 + $0x2f0] sm:$0xff]  }
  0x79   : > { %9911 = vmatprep.subr.bf16.mxu1 %v11017_v41  ;;  %v11079_v41 = vld [vmem:[%s12112_s4 + $0x278] sm:$0xff]  }
  0x7a   : > { %6916 = vmatmul.mubr.bf16.vlgmr.msra.gmra.mrb[0].mxu0 %v8958_v35  ;;  %v11073_v35 = vld [vmem:[%s12112_s4 + $0x2e8] sm:$0xff]  }
  0x7b   : > { %6956 = vmatmul.mubr.bf16.vlgmr.msra.gmra.mrb[0].mxu1 %v8960_v37  ;;  %9890 = vmatpush3.bf16.msra.mxu0 %v11016_v40  ;;  %v11075_v37 = vld [vmem:[%s12112_s4 + $0x270] sm:$0xff]  }
  0x7c   : > { %9912 = vmatpush3.bf16.msra.mxu1 %v11018_v42  ;;  %9891 = vmatprep.subr.bf16.mxu0 %v11019_v43  ;;  %v11078_v40 = vld [vmem:[%s12112_s4 + $0x2b0] sm:$0xff]   ;;  %v11080_v42 = vld [vmem:[%s12112_s4 + $0x238] sm:$0xff]  }
  0x7d   : > { %9913 = vmatprep.subr.bf16.mxu1 %v11021_v45  ;;  %6995 = vmatprep.mubr.bf16.mxu0 %v8963_v7  ;;  %v11081_v43 = vld [vmem:[%s12112_s4 + $0x2f8] sm:$0xff]   ;;  %v11107_v7 = vld [vmem:[%s12112_s4 + $0x368] sm:$0xff]  }
  0x7e   : > { %7035 = vmatprep.mubr.bf16.mxu1 %v8965_v13  ;;  %v11113_v13 = vld [vmem:[%s12112_s4 + $0x3f0] sm:$0xff]  }
  0x7f   : > { %9892 = vmatpush3.bf16.msra.mxu0 %v11020_v44  ;;  %v223_v44 = vld [vmem:[%s12126_s27 + $0x20] sm:$0xff] }
  0x80   : > { %9914 = vmatpush3.bf16.msra.mxu1 %v11022_v46  ;;  %9893 = vmatprep.subr.bf16.mxu0 %v11023_v47  ;;  %v8966_v45 = vcombine.low %v223_v44, %v223_v44  ;;  %v8967_v46 = vcombine.high %v223_v44, %v223_v44  ;;  %v11084_v47 = vld [vmem:[%s12112_s4 + $0x2b8] sm:$0xff]   ;;  %v11142_v44 = vld [vmem:[%s12112_s4 + $0x4a0] sm:$0xff]  }
  0x81   : > { %9915 = vmatprep.subr.bf16.mxu1 %v11025_v49  ;;  %v224_v49 = vld [vmem:[%s12126_s27 + $0x28] sm:$0xff] }
  0x83   : > { %9894 = vmatpush3.bf16.msra.mxu0 %v11024_v48  ;;  %v11085_v48 = vld [vmem:[%s12112_s4 + $0x340] sm:$0xff]  }
  0x84   : > { %9916 = vmatpush3.bf16.msra.mxu1 %v11026_v50  ;;  %9895 = vmatprep.subr.bf16.mxu0 %v11027_v51  ;;  %v8968_v50 = vcombine.low %v224_v49, %v224_v49  ;;  %v8969_v51 = vcombine.high %v224_v49, %v224_v49  ;;  %v11147_v49 = vld [vmem:[%s12112_s4 + $0x470] sm:$0xff]  }
  0x85   : > { %9917 = vmatprep.subr.bf16.mxu1 %v11029_v53  ;;  %v11089_v53 = vld [vmem:[%s12112_s4 + $0x3c0] sm:$0xff]  }
  0x87   : > { %9896 = vmatpush3.bf16.msra.mxu0 %v11028_v52  ;;  %v11088_v52 = vld [vmem:[%s12112_s4 + $0x300] sm:$0xff]  }
  0x88   : > { %9918 = vmatpush3.bf16.msra.mxu1 %v11030_v54  ;;  %9897 = vmatprep.subr.bf16.mxu0 %v11031_v55  ;;  %v11090_v54 = vld [vmem:[%s12112_s4 + $0x380] sm:$0xff]   ;;  %v11091_v55 = vld [vmem:[%s12112_s4 + $0x348] sm:$0xff]  }
  0x89   : > { %9919 = vmatprep.subr.bf16.mxu1 %v11033_v57  ;;  %v11093_v57 = vld [vmem:[%s12112_s4 + $0x3c8] sm:$0xff]  }
  0x8b   : > { %9898 = vmatpush3.bf16.msra.mxu0 %v11032_v56  ;;  %v11092_v56 = vld [vmem:[%s12112_s4 + $0x308] sm:$0xff]  }
  0x8c   : > { %9920 = vmatpush3.bf16.msra.mxu1 %v11034_v58  ;;  %9899 = vmatprep.subr.bf16.mxu0 %v11035_v59  ;;  %v11094_v58 = vld [vmem:[%s12112_s4 + $0x388] sm:$0xff]   ;;  %v11095_v59 = vld [vmem:[%s12112_s4 + $0x350] sm:$0xff]  }
  0x8d   : > { %9921 = vmatprep.subr.bf16.mxu1 %v11037_v61  ;;  %v11097_v61 = vld [vmem:[%s12112_s4 + $0x3d0] sm:$0xff]  }
  0x8f   : > { %9900 = vmatpush3.bf16.msra.mxu0 %v11036_v60  ;;  %v11096_v60 = vld [vmem:[%s12112_s4 + $0x310] sm:$0xff]  }
  0x90   : > { %9922 = vmatpush3.bf16.msra.mxu1 %v11038_v62  ;;  %9901 = vmatprep.subr.bf16.mxu0 %v11039_v63  ;;  %v11098_v62 = vld [vmem:[%s12112_s4 + $0x390] sm:$0xff]   ;;  %v11099_v63 = vld [vmem:[%s12112_s4 + $0x358] sm:$0xff]  }
  0x91   : > { %9923 = vmatprep.subr.bf16.mxu1 %v11041_v1  ;;  %v11101_v1 = vld [vmem:[%s12112_s4 + $0x3d8] sm:$0xff]  }
  0x93   : > { %9902 = vmatpush3.bf16.msra.mxu0 %v11040_v0  ;;  %v11100_v0 = vld [vmem:[%s12112_s4 + $0x318] sm:$0xff]  }
  0x94   : > { %9924 = vmatpush3.bf16.msra.mxu1 %v11042_v2  ;;  %9903 = vmatprep.subr.bf16.mxu0 %v11043_v3  ;;  %v11102_v2 = vld [vmem:[%s12112_s4 + $0x398] sm:$0xff]   ;;  %v11103_v3 = vld [vmem:[%s12112_s4 + $0x360] sm:$0xff]  }
  0x95   : > { %9925 = vmatprep.subr.bf16.mxu1 %v11045_v5  ;;  %v11105_v5 = vld [vmem:[%s12112_s4 + $0x3e0] sm:$0xff]  }
  0x97   : > { %9904 = vmatpush3.bf16.msra.mxu0 %v11044_v4  ;;  %v11104_v4 = vld [vmem:[%s12112_s4 + $0x320] sm:$0xff]  }
  0x98   : > { %9926 = vmatpush3.bf16.msra.mxu1 %v11048_v8  ;;  %9933 = vmatprep.subr.bf16.mxu0 %v11049_v10  ;;  %v11108_v8 = vld [vmem:[%s12112_s4 + $0x328] sm:$0xff]  }
  0x99   : > { %9955 = vmatprep.subr.bf16.mxu1 %v11053_v15  ;;  %v11110_v10 = vld [vmem:[%s12112_s4 + $0x3a8] sm:$0xff]   ;;  %v11115_v15 = vld [vmem:[%s12112_s4 + $0x378] sm:$0xff]  }
  0x9a   : > { %6996 = vmatmul.mubr.bf16.vlgmr.msra.gmra.mrb[4].mxu0 %v8962_v9  ;;  %v11109_v9 = vld [vmem:[%s12112_s4 + $0x3e8] sm:$0xff]  }
  0x9b   : > { %9934 = vmatpush3.bf16.msra.mxu0 %v11052_v14  ;;  %7036 = vmatmul.mubr.bf16.vlgmr.msra.gmra.mrb[4].mxu1 %v8964_v12  ;;  %v11112_v12 = vld [vmem:[%s12112_s4 + $0x330] sm:$0xff]  }
  0x9c   : > { %9956 = vmatpush3.bf16.msra.mxu1 %v11054_v16  ;;  %9935 = vmatprep.subr.bf16.mxu0 %v11055_v17  ;;  %v11114_v14 = vld [vmem:[%s12112_s4 + $0x3b0] sm:$0xff]   ;;  %v11116_v16 = vld [vmem:[%s12112_s4 + $0x338] sm:$0xff]  }
  0x9d   : > { %9957 = vmatprep.subr.bf16.mxu1 %v11057_v19  ;;  %7075 = vmatprep.mubr.bf16.mxu0 %v8967_v46  ;;  %v11117_v17 = vld [vmem:[%s12112_s4 + $0x3f8] sm:$0xff]   ;;  %v11144_v46 = vld [vmem:[%s12112_s4 + $0x428] sm:$0xff]  }
  0x9e   : > { %7115 = vmatprep.mubr.bf16.mxu1 %v8969_v51  ;;  %v11149_v51 = vld [vmem:[%s12112_s4 + $0x4f0] sm:$0xff]  }
  0x9f   : > { %9936 = vmatpush3.bf16.msra.mxu0 %v11056_v18  ;;  %v225_v18 = vld [vmem:[%s12126_s27 + $0x30] sm:$0xff] }
  0xa0   : > { %9958 = vmatpush3.bf16.msra.mxu1 %v11058_v20  ;;  %9937 = vmatprep.subr.bf16.mxu0 %v11059_v21  ;;  %v8970_v19 = vcombine.low %v225_v18, %v225_v18  ;;  %v8971_v20 = vcombine.high %v225_v18, %v225_v18  ;;  %v11120_v21 = vld [vmem:[%s12112_s4 + $0x3b8] sm:$0xff]   ;;  %v11178_v18 = vld [vmem:[%s12112_s4 + $0x5a0] sm:$0xff]  }
  0xa1   : > { %9959 = vmatprep.subr.bf16.mxu1 %v11061_v23  ;;  %v226_v23 = vld [vmem:[%s12126_s27 + $0x38] sm:$0xff] }
  0xa3   : > { %9938 = vmatpush3.bf16.msra.mxu0 %v11060_v22  ;;  %v11121_v22 = vld [vmem:[%s12112_s4 + $0x440] sm:$0xff]  }
  0xa4   : > { %9960 = vmatpush3.bf16.msra.mxu1 %v11062_v24  ;;  %9939 = vmatprep.subr.bf16.mxu0 %v11063_v25  ;;  %v8972_v24 = vcombine.low %v226_v23, %v226_v23  ;;  %v8973_v25 = vcombine.high %v226_v23, %v226_v23  ;;  %v11183_v23 = vld [vmem:[%s12112_s4 + $0x570] sm:$0xff]  }
  0xa5   : > { %9961 = vmatprep.subr.bf16.mxu1 %v11065_v27  ;;  %v11125_v27 = vld [vmem:[%s12112_s4 + $0x4c0] sm:$0xff]  }
  0xa7   : > { %9940 = vmatpush3.bf16.msra.mxu0 %v11064_v26  ;;  %v11124_v26 = vld [vmem:[%s12112_s4 + $0x400] sm:$0xff]  }
  0xa8   : > { %9962 = vmatpush3.bf16.msra.mxu1 %v11066_v28  ;;  %9941 = vmatprep.subr.bf16.mxu0 %v11067_v29  ;;  %v11126_v28 = vld [vmem:[%s12112_s4 + $0x480] sm:$0xff]   ;;  %v11127_v29 = vld [vmem:[%s12112_s4 + $0x448] sm:$0xff]  }
  0xa9   : > { %9963 = vmatprep.subr.bf16.mxu1 %v11069_v31  ;;  %v11129_v31 = vld [vmem:[%s12112_s4 + $0x4c8] sm:$0xff]  }
  0xab   : > { %9942 = vmatpush3.bf16.msra.mxu0 %v11068_v30  ;;  %v11128_v30 = vld [vmem:[%s12112_s4 + $0x408] sm:$0xff]  }
  0xac   : > { %9964 = vmatpush3.bf16.msra.mxu1 %v11070_v32  ;;  %9943 = vmatprep.subr.bf16.mxu0 %v11071_v33  ;;  %v11130_v32 = vld [vmem:[%s12112_s4 + $0x488] sm:$0xff]   ;;  %v11131_v33 = vld [vmem:[%s12112_s4 + $0x450] sm:$0xff]  }
  0xad   : > { %9965 = vmatprep.subr.bf16.mxu1 %v11073_v35  ;;  %v11133_v35 = vld [vmem:[%s12112_s4 + $0x4d0] sm:$0xff]  }
  0xaf   : > { %9944 = vmatpush3.bf16.msra.mxu0 %v11072_v34  ;;  %v11132_v34 = vld [vmem:[%s12112_s4 + $0x410] sm:$0xff]  }
  0xb0   : > { %9966 = vmatpush3.bf16.msra.mxu1 %v11074_v36  ;;  %9945 = vmatprep.subr.bf16.mxu0 %v11075_v37  ;;  %v11134_v36 = vld [vmem:[%s12112_s4 + $0x490] sm:$0xff]   ;;  %v11135_v37 = vld [vmem:[%s12112_s4 + $0x458] sm:$0xff]  }
  0xb1   : > { %9967 = vmatprep.subr.bf16.mxu1 %v11077_v39  ;;  %v11137_v39 = vld [vmem:[%s12112_s4 + $0x4d8] sm:$0xff]  }
  0xb3   : > { %9946 = vmatpush3.bf16.msra.mxu0 %v11076_v38  ;;  %v11136_v38 = vld [vmem:[%s12112_s4 + $0x418] sm:$0xff]  }
  0xb4   : > { %9968 = vmatpush3.bf16.msra.mxu1 %v11078_v40  ;;  %9947 = vmatprep.subr.bf16.mxu0 %v11079_v41  ;;  %v11138_v40 = vld [vmem:[%s12112_s4 + $0x498] sm:$0xff]   ;;  %v11139_v41 = vld [vmem:[%s12112_s4 + $0x460] sm:$0xff]  }
  0xb5   : > { %9969 = vmatprep.subr.bf16.mxu1 %v11081_v43  ;;  %v11141_v43 = vld [vmem:[%s12112_s4 + $0x4e0] sm:$0xff]  }
  0xb7   : > { %9948 = vmatpush3.bf16.msra.mxu0 %v11080_v42  ;;  %v11140_v42 = vld [vmem:[%s12112_s4 + $0x420] sm:$0xff]  }
  0xb8   : > { %9970 = vmatpush3.bf16.msra.mxu1 %v11084_v47  ;;  %9977 = vmatprep.subr.bf16.mxu0 %v11085_v48  ;;  %v11145_v47 = vld [vmem:[%s12112_s4 + $0x4e8] sm:$0xff]  }
  0xb9   : > { %9999 = vmatprep.subr.bf16.mxu1 %v11089_v53  ;;  %v11146_v48 = vld [vmem:[%s12112_s4 + $0x4a8] sm:$0xff]   ;;  %v11151_v53 = vld [vmem:[%s12112_s4 + $0x478] sm:$0xff]  }
  0xba   : > { %7076 = vmatmul.mubr.bf16.vlgmr.msra.gmra.mrb[8].mxu0 %v8966_v45  ;;  %v11143_v45 = vld [vmem:[%s12112_s4 + $0x468] sm:$0xff]  }
  0xbb   : > { %9978 = vmatpush3.bf16.msra.mxu0 %v11088_v52  ;;  %7116 = vmatmul.mubr.bf16.vlgmr.msra.gmra.mrb[8].mxu1 %v8968_v50  ;;  %v11148_v50 = vld [vmem:[%s12112_s4 + $0x430] sm:$0xff]  }
  0xbc   : > { %10000 = vmatpush3.bf16.msra.mxu1 %v11090_v54  ;;  %9979 = vmatprep.subr.bf16.mxu0 %v11091_v55  ;;  %v11150_v52 = vld [vmem:[%s12112_s4 + $0x4b0] sm:$0xff]   ;;  %v11152_v54 = vld [vmem:[%s12112_s4 + $0x438] sm:$0xff]  }
  0xbd   : > { %10001 = vmatprep.subr.bf16.mxu1 %v11093_v57  ;;  %7155 = vmatprep.mubr.bf16.mxu0 %v8971_v20  ;;  %v11153_v55 = vld [vmem:[%s12112_s4 + $0x4f8] sm:$0xff]   ;;  %v11180_v20 = vld [vmem:[%s12112_s4 + $0x528] sm:$0xff]  }
  0xbe   : > { %7195 = vmatprep.mubr.bf16.mxu1 %v8973_v25  ;;  %v11185_v25 = vld [vmem:[%s12112_s4 + $0x5f0] sm:$0xff]  }
  0xbf   : > { %9980 = vmatpush3.bf16.msra.mxu0 %v11092_v56  ;;  %v227_v56 = vld [vmem:[%s12126_s27 + $0x40] sm:$0xff] }
  0xc0   : > { %10002 = vmatpush3.bf16.msra.mxu1 %v11094_v58  ;;  %9981 = vmatprep.subr.bf16.mxu0 %v11095_v59  ;;  %v8974_v57 = vcombine.low %v227_v56, %v227_v56  ;;  %v8975_v58 = vcombine.high %v227_v56, %v227_v56  ;;  %v11156_v59 = vld [vmem:[%s12112_s4 + $0x4b8] sm:$0xff]   ;;  %v11214_v56 = vld [vmem:[%s12112_s4 + $0x6a0] sm:$0xff]  }
  0xc1   : > { %10003 = vmatprep.subr.bf16.mxu1 %v11097_v61  ;;  %v228_v61 = vld [vmem:[%s12126_s27 + $0x48] sm:$0xff] }
  0xc3   : > { %9982 = vmatpush3.bf16.msra.mxu0 %v11096_v60  ;;  %v11157_v60 = vld [vmem:[%s12112_s4 + $0x540] sm:$0xff]  }
  0xc4   : > { %10004 = vmatpush3.bf16.msra.mxu1 %v11098_v62  ;;  %9983 = vmatprep.subr.bf16.mxu0 %v11099_v63  ;;  %v8976_v62 = vcombine.low %v228_v61, %v228_v61  ;;  %v8977_v63 = vcombine.high %v228_v61, %v228_v61  ;;  %v11219_v61 = vld [vmem:[%s12112_s4 + $0x670] sm:$0xff]  }
  0xc5   : > { %10005 = vmatprep.subr.bf16.mxu1 %v11101_v1  ;;  %v11161_v1 = vld [vmem:[%s12112_s4 + $0x5c0] sm:$0xff]  }
  0xc7   : > { %9984 = vmatpush3.bf16.msra.mxu0 %v11100_v0  ;;  %v11160_v0 = vld [vmem:[%s12112_s4 + $0x500] sm:$0xff]  }
  0xc8   : > { %10006 = vmatpush3.bf16.msra.mxu1 %v11102_v2  ;;  %9985 = vmatprep.subr.bf16.mxu0 %v11103_v3  ;;  %v11162_v2 = vld [vmem:[%s12112_s4 + $0x580] sm:$0xff]   ;;  %v11163_v3 = vld [vmem:[%s12112_s4 + $0x548] sm:$0xff]  }
  0xc9   : > { %10007 = vmatprep.subr.bf16.mxu1 %v11105_v5  ;;  %v11165_v5 = vld [vmem:[%s12112_s4 + $0x5c8] sm:$0xff]  }
  0xcb   : > { %9986 = vmatpush3.bf16.msra.mxu0 %v11104_v4  ;;  %v11164_v4 = vld [vmem:[%s12112_s4 + $0x508] sm:$0xff]  }
  0xcc   : > { %10008 = vmatpush3.bf16.msra.mxu1 %v11106_v6  ;;  %9987 = vmatprep.subr.bf16.mxu0 %v11107_v7  ;;  %v11166_v6 = vld [vmem:[%s12112_s4 + $0x588] sm:$0xff]   ;;  %v11167_v7 = vld [vmem:[%s12112_s4 + $0x550] sm:$0xff]  }
  0xcd   : > { %10009 = vmatprep.subr.bf16.mxu1 %v11109_v9  ;;  %v11169_v9 = vld [vmem:[%s12112_s4 + $0x5d0] sm:$0xff]  }
  0xcf   : > { %9988 = vmatpush3.bf16.msra.mxu0 %v11108_v8  ;;  %v11168_v8 = vld [vmem:[%s12112_s4 + $0x510] sm:$0xff]  }
  0xd0   : > { %10010 = vmatpush3.bf16.msra.mxu1 %v11110_v10  ;;  %9989 = vmatprep.subr.bf16.mxu0 %v11111_v11  ;;  %v11170_v10 = vld [vmem:[%s12112_s4 + $0x590] sm:$0xff]   ;;  %v11171_v11 = vld [vmem:[%s12112_s4 + $0x558] sm:$0xff]  }
  0xd1   : > { %10011 = vmatprep.subr.bf16.mxu1 %v11113_v13  ;;  %v11173_v13 = vld [vmem:[%s12112_s4 + $0x5d8] sm:$0xff]  }
  0xd3   : > { %9990 = vmatpush3.bf16.msra.mxu0 %v11112_v12  ;;  %v11172_v12 = vld [vmem:[%s12112_s4 + $0x518] sm:$0xff]  }
  0xd4   : > { %10012 = vmatpush3.bf16.msra.mxu1 %v11114_v14  ;;  %9991 = vmatprep.subr.bf16.mxu0 %v11115_v15  ;;  %v11174_v14 = vld [vmem:[%s12112_s4 + $0x598] sm:$0xff]   ;;  %v11175_v15 = vld [vmem:[%s12112_s4 + $0x560] sm:$0xff]  }
  0xd5   : > { %10013 = vmatprep.subr.bf16.mxu1 %v11117_v17  ;;  %v11177_v17 = vld [vmem:[%s12112_s4 + $0x5e0] sm:$0xff]  }
  0xd7   : > { %9992 = vmatpush3.bf16.msra.mxu0 %v11116_v16  ;;  %v11176_v16 = vld [vmem:[%s12112_s4 + $0x520] sm:$0xff]  }
  0xd8   : > { %10014 = vmatpush3.bf16.msra.mxu1 %v11120_v21  ;;  %10021 = vmatprep.subr.bf16.mxu0 %v11121_v22  ;;  %v11181_v21 = vld [vmem:[%s12112_s4 + $0x5e8] sm:$0xff]  }
  0xd9   : > { %10043 = vmatprep.subr.bf16.mxu1 %v11125_v27  ;;  %v11182_v22 = vld [vmem:[%s12112_s4 + $0x5a8] sm:$0xff]   ;;  %v11187_v27 = vld [vmem:[%s12112_s4 + $0x578] sm:$0xff]  }
  0xda   : > { %7156 = vmatmul.mubr.bf16.vlgmr.msra.gmra.mrb[12].mxu0 %v8970_v19  ;;  %v11179_v19 = vld [vmem:[%s12112_s4 + $0x568] sm:$0xff]  }
  0xdb   : > { %10022 = vmatpush3.bf16.msra.mxu0 %v11124_v26  ;;  %7196 = vmatmul.mubr.bf16.vlgmr.msra.gmra.mrb[12].mxu1 %v8972_v24  ;;  %v11184_v24 = vld [vmem:[%s12112_s4 + $0x530] sm:$0xff]  }
  0xdc   : > { %10044 = vmatpush3.bf16.msra.mxu1 %v11126_v28  ;;  %10023 = vmatprep.subr.bf16.mxu0 %v11127_v29  ;;  %v11186_v26 = vld [vmem:[%s12112_s4 + $0x5b0] sm:$0xff]   ;;  %v11188_v28 = vld [vmem:[%s12112_s4 + $0x538] sm:$0xff]  }
  0xdd   : > { %10045 = vmatprep.subr.bf16.mxu1 %v11129_v31  ;;  %7235 = vmatprep.mubr.bf16.mxu0 %v8975_v58  ;;  %v11189_v29 = vld [vmem:[%s12112_s4 + $0x5f8] sm:$0xff]   ;;  %v11216_v58 = vld [vmem:[%s12112_s4 + $0x628] sm:$0xff]  }
  0xde   : > { %7275 = vmatprep.mubr.bf16.mxu1 %v8977_v63  ;;  %v11221_v63 = vld [vmem:[%s12112_s4 + $0x6f0] sm:$0xff]  }
  0xdf   : > { %10024 = vmatpush3.bf16.msra.mxu0 %v11128_v30  ;;  %v229_v30 = vld [vmem:[%s12126_s27 + $0x50] sm:$0xff] }
  0xe0   : > { %10046 = vmatpush3.bf16.msra.mxu1 %v11130_v32  ;;  %10025 = vmatprep.subr.bf16.mxu0 %v11131_v33  ;;  %v8978_v31 = vcombine.low %v229_v30, %v229_v30  ;;  %v8979_v32 = vcombine.high %v229_v30, %v229_v30  ;;  %v11192_v33 = vld [vmem:[%s12112_s4 + $0x5b8] sm:$0xff]  }
  0xe1   : > { %10047 = vmatprep.subr.bf16.mxu1 %v11133_v35  ;;  %v230_v35 = vld [vmem:[%s12126_s27 + $0x58] sm:$0xff] }
  0xe3   : > { %10026 = vmatpush3.bf16.msra.mxu0 %v11132_v34  ;;  %v11193_v34 = vld [vmem:[%s12112_s4 + $0x640] sm:$0xff]  }
  0xe4   : > { %10048 = vmatpush3.bf16.msra.mxu1 %v11134_v36  ;;  %10027 = vmatprep.subr.bf16.mxu0 %v11135_v37  ;;  %v8980_v36 = vcombine.low %v230_v35, %v230_v35  ;;  %v8981_v37 = vcombine.high %v230_v35, %v230_v35 }
  0xe5   : > { %10049 = vmatprep.subr.bf16.mxu1 %v11137_v39  ;;  %v11197_v39 = vld [vmem:[%s12112_s4 + $0x6c0] sm:$0xff]  }
  0xe7   : > { %10028 = vmatpush3.bf16.msra.mxu0 %v11136_v38  ;;  %v11196_v38 = vld [vmem:[%s12112_s4 + $0x600] sm:$0xff]  }
  0xe8   : > { %10050 = vmatpush3.bf16.msra.mxu1 %v11138_v40  ;;  %10029 = vmatprep.subr.bf16.mxu0 %v11139_v41  ;;  %v11198_v40 = vld [vmem:[%s12112_s4 + $0x680] sm:$0xff]   ;;  %v11199_v41 = vld [vmem:[%s12112_s4 + $0x648] sm:$0xff]  }
  0xe9   : > { %10051 = vmatprep.subr.bf16.mxu1 %v11141_v43  ;;  %v11201_v43 = vld [vmem:[%s12112_s4 + $0x6c8] sm:$0xff]  }
  0xeb   : > { %10030 = vmatpush3.bf16.msra.mxu0 %v11140_v42  ;;  %v11200_v42 = vld [vmem:[%s12112_s4 + $0x608] sm:$0xff]  }
  0xec   : > { %10052 = vmatpush3.bf16.msra.mxu1 %v11142_v44  ;;  %10031 = vmatprep.subr.bf16.mxu0 %v11143_v45  ;;  %v11202_v44 = vld [vmem:[%s12112_s4 + $0x688] sm:$0xff]   ;;  %v11203_v45 = vld [vmem:[%s12112_s4 + $0x650] sm:$0xff]  }
  0xed   : > { %10053 = vmatprep.subr.bf16.mxu1 %v11145_v47  ;;  %v11205_v47 = vld [vmem:[%s12112_s4 + $0x6d0] sm:$0xff]  }
  0xef   : > { %10032 = vmatpush3.bf16.msra.mxu0 %v11144_v46  ;;  %v11204_v46 = vld [vmem:[%s12112_s4 + $0x610] sm:$0xff]  }
  0xf0   : > { %10054 = vmatpush3.bf16.msra.mxu1 %v11146_v48  ;;  %10033 = vmatprep.subr.bf16.mxu0 %v11147_v49  ;;  %v11206_v48 = vld [vmem:[%s12112_s4 + $0x690] sm:$0xff]   ;;  %v11207_v49 = vld [vmem:[%s12112_s4 + $0x658] sm:$0xff]  }
  0xf1   : > { %10055 = vmatprep.subr.bf16.mxu1 %v11149_v51  ;;  %v11209_v51 = vld [vmem:[%s12112_s4 + $0x6d8] sm:$0xff]  }
  0xf3   : > { %10034 = vmatpush3.bf16.msra.mxu0 %v11148_v50  ;;  %v11208_v50 = vld [vmem:[%s12112_s4 + $0x618] sm:$0xff]  }
  0xf4   : > { %10056 = vmatpush3.bf16.msra.mxu1 %v11150_v52  ;;  %10035 = vmatprep.subr.bf16.mxu0 %v11151_v53  ;;  %v11210_v52 = vld [vmem:[%s12112_s4 + $0x698] sm:$0xff]   ;;  %v11211_v53 = vld [vmem:[%s12112_s4 + $0x660] sm:$0xff]  }
  0xf5   : > { %10057 = vmatprep.subr.bf16.mxu1 %v11153_v55  ;;  %v11213_v55 = vld [vmem:[%s12112_s4 + $0x6e0] sm:$0xff]  }
  0xf7   : > { %10036 = vmatpush3.bf16.msra.mxu0 %v11152_v54  ;;  %v11212_v54 = vld [vmem:[%s12112_s4 + $0x620] sm:$0xff]  }
  0xf8   : > { %10058 = vmatpush3.bf16.msra.mxu1 %v11156_v59  ;;  %10065 = vmatprep.subr.bf16.mxu0 %v11157_v60  ;;  %v11217_v59 = vld [vmem:[%s12112_s4 + $0x6e8] sm:$0xff]  }
  0xf9   : > { %10087 = vmatprep.subr.bf16.mxu1 %v11161_v1  ;;  %v11218_v60 = vld [vmem:[%s12112_s4 + $0x6a8] sm:$0xff]   ;;  %v11223_v1 = vld [vmem:[%s12112_s4 + $0x678] sm:$0xff]  }
  0xfa   : > { %7236 = vmatmul.mubr.bf16.vlgmr.msra.gmra.mrb[16].mxu0 %v8974_v57  ;;  %v11215_v57 = vld [vmem:[%s12112_s4 + $0x668] sm:$0xff]  }
  0xfb   : > { %10066 = vmatpush3.bf16.msra.mxu0 %v11160_v0  ;;  %7276 = vmatmul.mubr.bf16.vlgmr.msra.gmra.mrb[16].mxu1 %v8976_v62  ;;  %v11220_v62 = vld [vmem:[%s12112_s4 + $0x630] sm:$0xff]  }
  0xfc   : > { %10088 = vmatpush3.bf16.msra.mxu1 %v11162_v2  ;;  %10067 = vmatprep.subr.bf16.mxu0 %v11163_v3  ;;  %v11222_v0 = vld [vmem:[%s12112_s4 + $0x6b0] sm:$0xff]   ;;  %v11224_v2 = vld [vmem:[%s12112_s4 + $0x638] sm:$0xff]  }
  0xfd   : > { %10089 = vmatprep.subr.bf16.mxu1 %v11165_v5  ;;  %7315 = vmatprep.mubr.bf16.mxu0 %v8979_v32  ;;  %v11225_v3 = vld [vmem:[%s12112_s4 + $0x6f8] sm:$0xff]   ;;  %v11250_v32 = vld [vmem:[%s12112_s4 + $0x7a0] sm:$0xff]  }
  0xfe   : > { %7355 = vmatprep.mubr.bf16.mxu1 %v8981_v37  ;;  %v11251_v37 = vld [vmem:[%s12112_s4 + $0x768] sm:$0xff]  }
  0xff   : > { %10068 = vmatpush3.bf16.msra.mxu0 %v11164_v4  ;;  %v231_v4 = vld [vmem:[%s12126_s27 + $0x60] sm:$0xff] }
 0x100   : > { %10090 = vmatpush3.bf16.msra.mxu1 %v11166_v6  ;;  %10069 = vmatprep.subr.bf16.mxu0 %v11167_v7  ;;  %v8982_v5 = vcombine.low %v231_v4, %v231_v4  ;;  %v8983_v6 = vcombine.high %v231_v4, %v231_v4  ;;  %v11228_v7 = vld [vmem:[%s12112_s4 + $0x6b8] sm:$0xff]   ;;  %v11275_v4 = vld [vmem:[%s12112_s4 + $0x850] sm:$0xff]  }
 0x101   : > { %10091 = vmatprep.subr.bf16.mxu1 %v11169_v9  ;;  %v232_v9 = vld [vmem:[%s12126_s27 + $0x68] sm:$0xff] }
 0x103   : > { %10070 = vmatpush3.bf16.msra.mxu0 %v11168_v8  ;;  %v11229_v8 = vld [vmem:[%s12112_s4 + $0x740] sm:$0xff]  }
 0x104   : > { %10092 = vmatpush3.bf16.msra.mxu1 %v11170_v10  ;;  %10071 = vmatprep.subr.bf16.mxu0 %v11171_v11  ;;  %v8984_v10 = vcombine.low %v232_v9, %v232_v9  ;;  %v8985_v11 = vcombine.high %v232_v9, %v232_v9  ;;  %v11280_v9 = vld [vmem:[%s12112_s4 + $0x818] sm:$0xff]  }
 0x105   : > { %10093 = vmatprep.subr.bf16.mxu1 %v11173_v13  ;;  %v11233_v13 = vld [vmem:[%s12112_s4 + $0x7c0] sm:$0xff]  }
 0x107   : > { %10072 = vmatpush3.bf16.msra.mxu0 %v11172_v12  ;;  %v11232_v12 = vld [vmem:[%s12112_s4 + $0x700] sm:$0xff]  }
 0x108   : > { %10094 = vmatpush3.bf16.msra.mxu1 %v11174_v14  ;;  %10073 = vmatprep.subr.bf16.mxu0 %v11175_v15  ;;  %v11234_v14 = vld [vmem:[%s12112_s4 + $0x780] sm:$0xff]   ;;  %v11235_v15 = vld [vmem:[%s12112_s4 + $0x748] sm:$0xff]  }
 0x109   : > { %10095 = vmatprep.subr.bf16.mxu1 %v11177_v17  ;;  %v11237_v17 = vld [vmem:[%s12112_s4 + $0x7c8] sm:$0xff]  }
 0x10b   : > { %10074 = vmatpush3.bf16.msra.mxu0 %v11176_v16  ;;  %v11236_v16 = vld [vmem:[%s12112_s4 + $0x708] sm:$0xff]  }
 0x10c   : > { %10096 = vmatpush3.bf16.msra.mxu1 %v11178_v18  ;;  %10075 = vmatprep.subr.bf16.mxu0 %v11179_v19  ;;  %v11238_v18 = vld [vmem:[%s12112_s4 + $0x788] sm:$0xff]   ;;  %v11239_v19 = vld [vmem:[%s12112_s4 + $0x750] sm:$0xff]  }
 0x10d   : > { %10097 = vmatprep.subr.bf16.mxu1 %v11181_v21  ;;  %v11241_v21 = vld [vmem:[%s12112_s4 + $0x7d0] sm:$0xff]  }
 0x10f   : > { %10076 = vmatpush3.bf16.msra.mxu0 %v11180_v20  ;;  %v11240_v20 = vld [vmem:[%s12112_s4 + $0x710] sm:$0xff]  }
 0x110   : > { %10098 = vmatpush3.bf16.msra.mxu1 %v11182_v22  ;;  %10077 = vmatprep.subr.bf16.mxu0 %v11183_v23  ;;  %v11242_v22 = vld [vmem:[%s12112_s4 + $0x790] sm:$0xff]   ;;  %v11243_v23 = vld [vmem:[%s12112_s4 + $0x758] sm:$0xff]  }
 0x111   : > { %10099 = vmatprep.subr.bf16.mxu1 %v11185_v25  ;;  %v11245_v25 = vld [vmem:[%s12112_s4 + $0x7d8] sm:$0xff]  }
 0x113   : > { %10078 = vmatpush3.bf16.msra.mxu0 %v11184_v24  ;;  %v11244_v24 = vld [vmem:[%s12112_s4 + $0x718] sm:$0xff]  }
 0x114   : > { %10100 = vmatpush3.bf16.msra.mxu1 %v11186_v26  ;;  %10079 = vmatprep.subr.bf16.mxu0 %v11187_v27  ;;  %v11246_v26 = vld [vmem:[%s12112_s4 + $0x798] sm:$0xff]   ;;  %v11247_v27 = vld [vmem:[%s12112_s4 + $0x760] sm:$0xff]  }
 0x115   : > { %10101 = vmatprep.subr.bf16.mxu1 %v11189_v29  ;;  %v11249_v29 = vld [vmem:[%s12112_s4 + $0x7e0] sm:$0xff]  }
 0x117   : > { %10080 = vmatpush3.bf16.msra.mxu0 %v11188_v28  ;;  %v11248_v28 = vld [vmem:[%s12112_s4 + $0x720] sm:$0xff]  }
 0x118   : > { %10102 = vmatpush3.bf16.msra.mxu1 %v11192_v33  ;;  %10109 = vmatprep.subr.bf16.mxu0 %v11193_v34 }
 0x119   : > { %10131 = vmatprep.subr.bf16.mxu1 %v11197_v39  ;;  %v11252_v39 = vld [vmem:[%s12112_s4 + $0x728] sm:$0xff]  }
 0x11a   : > { %7316 = vmatmul.mubr.bf16.vlgmr.msra.gmra.mrb[20].mxu0 %v8978_v31 }
 0x11b   : > { %10110 = vmatpush3.bf16.msra.mxu0 %v11196_v38  ;;  %7356 = vmatmul.mubr.bf16.vlgmr.msra.gmra.mrb[20].mxu1 %v8980_v36 }
 0x11c   : > { %10132 = vmatpush3.bf16.msra.mxu1 %v11198_v40  ;;  %10111 = vmatprep.subr.bf16.mxu0 %v11199_v41 }
 0x11d   : > { %10133 = vmatprep.subr.bf16.mxu1 %v11201_v43  ;;  %7395 = vmatprep.mubr.bf16.mxu0 %v8983_v6  ;;  %v11277_v6 = vld [vmem:[%s12112_s4 + $0x8d0] sm:$0xff]  }
 0x11e   : > { %7435 = vmatprep.mubr.bf16.mxu1 %v8985_v11  ;;  %v11282_v11 = vld [vmem:[%s12112_s4 + $0x898] sm:$0xff]  }
 0x11f   : > { %10112 = vmatpush3.bf16.msra.mxu0 %v11200_v42  ;;  %v11253_v42 = vld [vmem:[%s12112_s4 + $0x7e8] sm:$0xff]  }
 0x120   : > { %10134 = vmatpush3.bf16.msra.mxu1 %v11202_v44  ;;  %10113 = vmatprep.subr.bf16.mxu0 %v11203_v45  ;;  %v11254_v44 = vld [vmem:[%s12112_s4 + $0x7a8] sm:$0xff]  }
 0x121   : > { %10135 = vmatprep.subr.bf16.mxu1 %v11205_v47  ;;  %v11256_v47 = vld [vmem:[%s12112_s4 + $0x730] sm:$0xff]  }
 0x123   : > { %10114 = vmatpush3.bf16.msra.mxu0 %v11204_v46  ;;  %v11255_v46 = vld [vmem:[%s12112_s4 + $0x770] sm:$0xff]  }
 0x124   : > { %10136 = vmatpush3.bf16.msra.mxu1 %v11206_v48  ;;  %10115 = vmatprep.subr.bf16.mxu0 %v11207_v49  ;;  %v11257_v48 = vld [vmem:[%s12112_s4 + $0x7f0] sm:$0xff]  }
 0x125   : > { %10137 = vmatprep.subr.bf16.mxu1 %v11209_v51  ;;  %v11258_v49 = vld [vmem:[%s12112_s4 + $0x7b0] sm:$0xff]   ;;  %v11260_v51 = vld [vmem:[%s12112_s4 + $0x738] sm:$0xff]  }
 0x127   : > { %10116 = vmatpush3.bf16.msra.mxu0 %v11208_v50  ;;  %v11259_v50 = vld [vmem:[%s12112_s4 + $0x778] sm:$0xff]  }
 0x128   : > { %10138 = vmatpush3.bf16.msra.mxu1 %v11210_v52  ;;  %10117 = vmatprep.subr.bf16.mxu0 %v11211_v53  ;;  %v11261_v52 = vld [vmem:[%s12112_s4 + $0x7f8] sm:$0xff]   ;;  %v233_v53 = vld [vmem:[%s12126_s27 + $0x70] sm:$0xff] }
 0x129   : > { %10139 = vmatprep.subr.bf16.mxu1 %v11213_v55  ;;  %v8987_v55 = vcombine.high %v233_v53, %v233_v53 }
 0x12b   : > { %10118 = vmatpush3.bf16.msra.mxu0 %v11212_v54  ;;  %v8986_v54 = vcombine.low %v233_v53, %v233_v53  ;;  %v11310_v53 = vld [vmem:[%s12112_s4 + $0x988] sm:$0xff]  }
 0x12c   : > { %10140 = vmatpush3.bf16.msra.mxu1 %v11214_v56  ;;  %10119 = vmatprep.subr.bf16.mxu0 %v11215_v57  ;;  %v11264_v56 = vld [vmem:[%s12112_s4 + $0x7b8] sm:$0xff]   ;;  %v11265_v57 = vld [vmem:[%s12112_s4 + $0x840] sm:$0xff]  }
 0x12d   : > { %10141 = vmatprep.subr.bf16.mxu1 %v11217_v59 }
 0x12f   : > { %10120 = vmatpush3.bf16.msra.mxu0 %v11216_v58  ;;  %v234_v58 = vld [vmem:[%s12126_s27 + $0x78] sm:$0xff] }
 0x130   : > { %10142 = vmatpush3.bf16.msra.mxu1 %v11218_v60  ;;  %10121 = vmatprep.subr.bf16.mxu0 %v11219_v61  ;;  %v8988_v59 = vcombine.low %v234_v58, %v234_v58  ;;  %v8989_v60 = vcombine.high %v234_v58, %v234_v58  ;;  %v11268_v61 = vld [vmem:[%s12112_s4 + $0x800] sm:$0xff]   ;;  %v11315_v58 = vld [vmem:[%s12112_s4 + $0x958] sm:$0xff]  }
 0x131   : > { %10143 = vmatprep.subr.bf16.mxu1 %v11221_v63  ;;  %v11270_v63 = vld [vmem:[%s12112_s4 + $0x880] sm:$0xff]  }
 0x133   : > { %10122 = vmatpush3.bf16.msra.mxu0 %v11220_v62  ;;  %v11269_v62 = vld [vmem:[%s12112_s4 + $0x8c0] sm:$0xff]  }
 0x134   : > { %10144 = vmatpush3.bf16.msra.mxu1 %v11222_v0  ;;  %10123 = vmatprep.subr.bf16.mxu0 %v11223_v1  ;;  %v11271_v0 = vld [vmem:[%s12112_s4 + $0x848] sm:$0xff]  }
 0x135   : > { %10145 = vmatprep.subr.bf16.mxu1 %v11225_v3  ;;  %v11272_v1 = vld [vmem:[%s12112_s4 + $0x808] sm:$0xff]  }
 0x136   : > { %v11274_v3 = vld [vmem:[%s12112_s4 + $0x888] sm:$0xff]  }
 0x137   : > { %10124 = vmatpush3.bf16.msra.mxu0 %v11224_v2  ;;  %v11273_v2 = vld [vmem:[%s12112_s4 + $0x8c8] sm:$0xff]  }
 0x138   : > { %10146 = vmatpush3.bf16.msra.mxu1 %v11228_v7  ;;  %10153 = vmatprep.subr.bf16.mxu0 %v11229_v8  ;;  %v11278_v7 = vld [vmem:[%s12112_s4 + $0x890] sm:$0xff]   ;;  %v11279_v8 = vld [vmem:[%s12112_s4 + $0x858] sm:$0xff]  }
 0x139   : > { %10175 = vmatprep.subr.bf16.mxu1 %v11233_v13  ;;  %v11284_v13 = vld [vmem:[%s12112_s4 + $0x820] sm:$0xff]  }
 0x13a   : > { %7396 = vmatmul.mubr.bf16.vlgmr.msra.gmra.mrb[24].mxu0 %v8982_v5  ;;  %v11276_v5 = vld [vmem:[%s12112_s4 + $0x810] sm:$0xff]  }
 0x13b   : > { %10154 = vmatpush3.bf16.msra.mxu0 %v11232_v12  ;;  %7436 = vmatmul.mubr.bf16.vlgmr.msra.gmra.mrb[24].mxu1 %v8984_v10  ;;  %v11281_v10 = vld [vmem:[%s12112_s4 + $0x8d8] sm:$0xff]   ;;  %v11283_v12 = vld [vmem:[%s12112_s4 + $0x860] sm:$0xff]  }
 0x13c   : > { %10176 = vmatpush3.bf16.msra.mxu1 %v11234_v14  ;;  %10155 = vmatprep.subr.bf16.mxu0 %v11235_v15  ;;  %v11285_v14 = vld [vmem:[%s12112_s4 + $0x8e0] sm:$0xff]  }
 0x13d   : > { %10177 = vmatprep.subr.bf16.mxu1 %v11237_v17  ;;  %7475 = vmatprep.mubr.bf16.mxu0 %v8987_v55  ;;  %v11312_v55 = vld [vmem:[%s12112_s4 + $0x910] sm:$0xff]  }
 0x13e   : > { %7515 = vmatprep.mubr.bf16.mxu1 %v8989_v60  ;;  %v11317_v60 = vld [vmem:[%s12112_s4 + $0x9d8] sm:$0xff]  }
 0x13f   : > { %10156 = vmatpush3.bf16.msra.mxu0 %v11236_v16  ;;  %v11286_v16 = vld [vmem:[%s12112_s4 + $0x8a0] sm:$0xff]  }
 0x140   : > { %10178 = vmatpush3.bf16.msra.mxu1 %v11238_v18  ;;  %10157 = vmatprep.subr.bf16.mxu0 %v11239_v19  ;;  %v11287_v19 = vld [vmem:[%s12112_s4 + $0x868] sm:$0xff]  }
 0x141   : > { %10179 = vmatprep.subr.bf16.mxu1 %v11241_v21 }
 0x143   : > { %10158 = vmatpush3.bf16.msra.mxu0 %v11240_v20 }
 0x144   : > { %10180 = vmatpush3.bf16.msra.mxu1 %v11242_v22  ;;  %10159 = vmatprep.subr.bf16.mxu0 %v11243_v23  ;;  %v11288_v22 = vld [vmem:[%s12112_s4 + $0x828] sm:$0xff]  }
 0x145   : > { %10181 = vmatprep.subr.bf16.mxu1 %v11245_v25 }
 0x147   : > { %10160 = vmatpush3.bf16.msra.mxu0 %v11244_v24 }
 0x148   : > { %10182 = vmatpush3.bf16.msra.mxu1 %v11246_v26  ;;  %10161 = vmatprep.subr.bf16.mxu0 %v11247_v27  ;;  %v11289_v27 = vld [vmem:[%s12112_s4 + $0x8e8] sm:$0xff]  }
 0x149   : > { %10183 = vmatprep.subr.bf16.mxu1 %v11249_v29  ;;  %v11290_v29 = vld [vmem:[%s12112_s4 + $0x8a8] sm:$0xff]  }
 0x14b   : > { %10162 = vmatpush3.bf16.msra.mxu0 %v11248_v28 }
 0x14c   : > { %10184 = vmatpush3.bf16.msra.mxu1 %v11250_v32  ;;  %10163 = vmatprep.subr.bf16.mxu0 %v11251_v37  ;;  %v11291_v32 = vld [vmem:[%s12112_s4 + $0x870] sm:$0xff]   ;;  %v11296_v37 = vld [vmem:[%s12112_s4 + $0x838] sm:$0xff]  }
 0x14d   : > { %v9861_v30 = vpop.f32.mrb[0].mxu0  ;;  %10185 = vmatprep.subr.bf16.mxu1 %v11253_v42  ;;  %v11300_v42 = vld [vmem:[%s12112_s4 + $0x8b8] sm:$0xff]  }
 0x14e   : > { %v9883_v31 = vpop.f32.mrb[0].mxu1  ;;  %v9862_v33 = vpop.f32.mrb[1].mxu0 }
 0x14f   : > { %v9884_v34 = vpop.f32.mrb[1].mxu1  ;;  %v9863_v35 = vadd.f32 %v9862_v33, %v9861_v30  ;;  %v9864_v38 = vpop.f32.mrb[2].mxu0  ;;  %10164 = vmatpush3.bf16.msra.mxu0 %v11252_v39  ;;  %v11292_v33 = vld [vmem:[%s12112_s4 + $0x830] sm:$0xff]   ;;  %v235_v39 = vld [vmem:[%s12126_s27 + $0x80] sm:$0xff] }
 0x150   : > { %v9885_v36 = vadd.f32 %v9884_v34, %v9883_v31  ;;  %v9865_v40 = vpop.f32.mrb[3].mxu0  ;;  %v9886_v43 = vpop.f32.mrb[2].mxu1  ;;  %10186 = vmatpush3.bf16.msra.mxu1 %v11254_v44  ;;  %10165 = vmatprep.subr.bf16.mxu0 %v11255_v46  ;;  %v11293_v34 = vld [vmem:[%s12112_s4 + $0x8f0] sm:$0xff]   ;;  %v11297_v38 = vld [vmem:[%s12112_s4 + $0x8f8] sm:$0xff]   ;;  %v236_v44 = vld [vmem:[%s12126_s27 + $0x88] sm:$0xff] }
 0x151   : > { %v9887_v45 = vpop.f32.mrb[3].mxu1  ;;  %10187 = vmatprep.subr.bf16.mxu1 %v11257_v48  ;;  %v8990_v40 = vcombine.low %v235_v39, %v235_v39  ;;  %v11301_v43 = vld [vmem:[%s12112_s4 + $0x940] sm:$0xff]   ;;  %v8993_v46 = vcombine.high %v236_v44, %v236_v44 }
 0x152   : > { %v12390_v41 = vadd.f32 %v9885_v36, %v9863_v35  ;;  %v11294_v35 = vld [vmem:[%s12112_s4 + $0x8b0] sm:$0xff]   ;;  %v11295_v36 = vld [vmem:[%s12112_s4 + $0x878] sm:$0xff]   ;;  %v8992_v45 = vcombine.low %v236_v44, %v236_v44  ;;  %v11305_v48 = vld [vmem:[%s12112_s4 + $0x9c0] sm:$0xff]  }
 0x153   : > { %10166 = vmatpush3.bf16.msra.mxu0 %v11256_v47  ;;  %v11304_v47 = vld [vmem:[%s12112_s4 + $0x900] sm:$0xff]   ;;  %v11351_v44 = vld [vmem:[%s12112_s4 + $0xa58] sm:$0xff]  }
 0x154   : > { %10188 = vmatpush3.bf16.msra.mxu1 %v11258_v49  ;;  %10167 = vmatprep.subr.bf16.mxu0 %v11259_v50  ;;  %v11306_v49 = vld [vmem:[%s12112_s4 + $0x980] sm:$0xff]   ;;  %v11307_v50 = vld [vmem:[%s12112_s4 + $0x948] sm:$0xff]  }
 0x155   : > { %10189 = vmatprep.subr.bf16.mxu1 %v11261_v52  ;;  %v11309_v52 = vld [vmem:[%s12112_s4 + $0x9c8] sm:$0xff]  }
 0x157   : > { %10168 = vmatpush3.bf16.msra.mxu0 %v11260_v51  ;;  %v11308_v51 = vld [vmem:[%s12112_s4 + $0x908] sm:$0xff]  }
 0x158   : > { %10190 = vmatpush3.bf16.msra.mxu1 %v11264_v56  ;;  %10197 = vmatprep.subr.bf16.mxu0 %v11265_v57  ;;  %v11313_v56 = vld [vmem:[%s12112_s4 + $0x9d0] sm:$0xff]  }
 0x159   : > { %10219 = vmatprep.subr.bf16.mxu1 %v11269_v62  ;;  %v11314_v57 = vld [vmem:[%s12112_s4 + $0x990] sm:$0xff]   ;;  %v11319_v62 = vld [vmem:[%s12112_s4 + $0x960] sm:$0xff]  }
 0x15a   : > { %7476 = vmatmul.mubr.bf16.vlgmr.msra.gmra.mrb[28].mxu0 %v8986_v54  ;;  %v11311_v54 = vld [vmem:[%s12112_s4 + $0x950] sm:$0xff]  }
 0x15b   : > { %10198 = vmatpush3.bf16.msra.mxu0 %v11268_v61  ;;  %7516 = vmatmul.mubr.bf16.vlgmr.msra.gmra.mrb[28].mxu1 %v8988_v59  ;;  %v11316_v59 = vld [vmem:[%s12112_s4 + $0x918] sm:$0xff]  }
 0x15c   : > { %10220 = vmatpush3.bf16.msra.mxu1 %v11270_v63  ;;  %10199 = vmatprep.subr.bf16.mxu0 %v11271_v0  ;;  %v11318_v61 = vld [vmem:[%s12112_s4 + $0x998] sm:$0xff]   ;;  %v11320_v63 = vld [vmem:[%s12112_s4 + $0x920] sm:$0xff]  }
 0x15d   : > { %10221 = vmatprep.subr.bf16.mxu1 %v11273_v2  ;;  %7595 = vmatprep.mubr.bf16.mxu1 %v8993_v46  ;;  %v11353_v46 = vld [vmem:[%s12112_s4 + $0xad8] sm:$0xff]  }
 0x15f   : > { %10200 = vmatpush3.bf16.msra.mxu0 %v11272_v1  ;;  %v11321_v1 = vld [vmem:[%s12112_s4 + $0x9e0] sm:$0xff]  }
 0x160   : > { %10222 = vmatpush3.bf16.msra.mxu1 %v11274_v3  ;;  %10201 = vmatprep.subr.bf16.mxu0 %v11275_v4  ;;  %v11322_v3 = vld [vmem:[%s12112_s4 + $0x9a0] sm:$0xff]  }
 0x161   : > { %10223 = vmatprep.subr.bf16.mxu1 %v11277_v6  ;;  %v11323_v6 = vld [vmem:[%s12112_s4 + $0x968] sm:$0xff]  }
 0x163   : > { %10202 = vmatpush3.bf16.msra.mxu0 %v11276_v5 }
 0x164   : > { %10224 = vmatpush3.bf16.msra.mxu1 %v11278_v7  ;;  %10203 = vmatprep.subr.bf16.mxu0 %v11279_v8 }
 0x165   : > { %10225 = vmatprep.subr.bf16.mxu1 %v11281_v10 }
 0x167   : > { %10204 = vmatpush3.bf16.msra.mxu0 %v11280_v9  ;;  %v11324_v9 = vld [vmem:[%s12112_s4 + $0x928] sm:$0xff]  }
 0x168   : > { %10226 = vmatpush3.bf16.msra.mxu1 %v11282_v11  ;;  %10205 = vmatprep.subr.bf16.mxu0 %v11283_v12  ;;  %v11325_v12 = vld [vmem:[%s12112_s4 + $0x9e8] sm:$0xff]  }
 0x169   : > { %10227 = vmatprep.subr.bf16.mxu1 %v11285_v14  ;;  %v11326_v14 = vld [vmem:[%s12112_s4 + $0x9a8] sm:$0xff]  }
 0x16b   : > { %10206 = vmatpush3.bf16.msra.mxu0 %v11284_v13 }
 0x16c   : > { %10228 = vmatpush3.bf16.msra.mxu1 %v11286_v16  ;;  %10207 = vmatprep.subr.bf16.mxu0 %v11287_v19  ;;  %v11328_v19 = vld [vmem:[%s12112_s4 + $0x930] sm:$0xff]  }
 0x16d   : > { %v9905_v15 = vpop.f32.mrb[4].mxu0  ;;  %10229 = vmatprep.subr.bf16.mxu1 %v11289_v27 }
 0x16e   : > { %v9906_v17 = vpop.f32.mrb[5].mxu0  ;;  %v9927_v21 = vpop.f32.mrb[4].mxu1 }
 0x16f   : > { %v9907_v18 = vadd.f32 %v9906_v17, %v9905_v15  ;;  %v9908_v20 = vpop.f32.mrb[6].mxu0  ;;  %v9928_v24 = vpop.f32.mrb[5].mxu1  ;;  %10208 = vmatpush3.bf16.msra.mxu0 %v11288_v22  ;;  %v11327_v17 = vld [vmem:[%s12112_s4 + $0x970] sm:$0xff]   ;;  %v11331_v22 = vld [vmem:[%s12112_s4 + $0x978] sm:$0xff]  }
 0x170   : > { %v9909_v23 = vpop.f32.mrb[7].mxu0  ;;  %v9929_v26 = vadd.f32 %v9928_v24, %v9927_v21  ;;  %v9930_v28 = vpop.f32.mrb[6].mxu1  ;;  %10230 = vmatpush3.bf16.msra.mxu1 %v11290_v29  ;;  %10209 = vmatprep.subr.bf16.mxu0 %v11291_v32  ;;  %v11329_v20 = vld [vmem:[%s12112_s4 + $0x9f0] sm:$0xff]   ;;  %v11333_v24 = vld [vmem:[%s12112_s4 + $0x9f8] sm:$0xff]   ;;  %v11337_v29 = vld [vmem:[%s12112_s4 + $0xa40] sm:$0xff]  }
 0x171   : > { %v6998_v25 = vadd.f32 %v9907_v18, %v12390_v41  ;;  %v9931_v30 = vpop.f32.mrb[7].mxu1  ;;  %10231 = vmatprep.subr.bf16.mxu1 %v11293_v34  ;;  %v8991_v41 = vcombine.high %v235_v39, %v235_v39  ;;  %v11330_v21 = vld [vmem:[%s12112_s4 + $0x9b0] sm:$0xff]   ;;  %v11332_v23 = vld [vmem:[%s12112_s4 + $0x938] sm:$0xff]   ;;  %v11341_v34 = vld [vmem:[%s12112_s4 + $0xac0] sm:$0xff]  }
 0x172   : > { %v11336_v28 = vld [vmem:[%s12112_s4 + $0x9b8] sm:$0xff]   ;;  %v238_v30 = vld [vmem:[%s12126_s27 + $0x98] sm:$0xff]  ;;  %v11346_v39 = vld [vmem:[%s12112_s4 + $0xa88] sm:$0xff]  }
 0x173   : > { %v12429_v31 = vadd.f32 %v9929_v26, %v6998_v25  ;;  %10210 = vmatpush3.bf16.msra.mxu0 %v11292_v33  ;;  %7555 = vmatprep.mubr.bf16.mxu0 %v8991_v41  ;;  %v237_v25 = vld [vmem:[%s12126_s27 + $0x90] sm:$0xff]  ;;  %v8997_v32 = vcombine.high %v238_v30, %v238_v30  ;;  %v11340_v33 = vld [vmem:[%s12112_s4 + $0xa00] sm:$0xff]   ;;  %v11348_v41 = vld [vmem:[%s12112_s4 + $0xa10] sm:$0xff]  }
 0x174   : > { %10232 = vmatpush3.bf16.msra.mxu1 %v11294_v35  ;;  %10211 = vmatprep.subr.bf16.mxu0 %v11295_v36  ;;  %v8994_v26 = vcombine.low %v237_v25, %v237_v25  ;;  %v8995_v27 = vcombine.high %v237_v25, %v237_v25  ;;  %v11342_v35 = vld [vmem:[%s12112_s4 + $0xa80] sm:$0xff]   ;;  %v11343_v36 = vld [vmem:[%s12112_s4 + $0xa48] sm:$0xff]  }
 0x175   : > { %10233 = vmatprep.subr.bf16.mxu1 %v11297_v38  ;;  %v11345_v38 = vld [vmem:[%s12112_s4 + $0xac8] sm:$0xff]  }
 0x176   : > { %v11382_v25 = vld [vmem:[%s12112_s4 + $0xb88] sm:$0xff]  }
 0x177   : > { %10212 = vmatpush3.bf16.msra.mxu0 %v11296_v37  ;;  %v11344_v37 = vld [vmem:[%s12112_s4 + $0xa08] sm:$0xff]  }
 0x178   : > { %10234 = vmatpush3.bf16.msra.mxu1 %v11300_v42  ;;  %10241 = vmatprep.subr.bf16.mxu0 %v11301_v43  ;;  %v11349_v42 = vld [vmem:[%s12112_s4 + $0xad0] sm:$0xff]  }
 0x179   : > { %10263 = vmatprep.subr.bf16.mxu1 %v11305_v48  ;;  %v11350_v43 = vld [vmem:[%s12112_s4 + $0xa90] sm:$0xff]   ;;  %v11355_v48 = vld [vmem:[%s12112_s4 + $0xa60] sm:$0xff]  }
 0x17a   : > { %7556 = vmatmul.mubr.bf16.vlgmr.msra.gmra.mrb[32].mxu0 %v8990_v40  ;;  %v11347_v40 = vld [vmem:[%s12112_s4 + $0xa50] sm:$0xff]  }
 0x17b   : > { %10242 = vmatpush3.bf16.msra.mxu0 %v11304_v47  ;;  %7596 = vmatmul.mubr.bf16.vlgmr.msra.gmra.mrb[32].mxu1 %v8992_v45  ;;  %v11352_v45 = vld [vmem:[%s12112_s4 + $0xa18] sm:$0xff]  }
 0x17c   : > { %10264 = vmatpush3.bf16.msra.mxu1 %v11306_v49  ;;  %10243 = vmatprep.subr.bf16.mxu0 %v11307_v50  ;;  %v11354_v47 = vld [vmem:[%s12112_s4 + $0xa98] sm:$0xff]   ;;  %v11356_v50 = vld [vmem:[%s12112_s4 + $0xa20] sm:$0xff]  }
 0x17d   : > { %10265 = vmatprep.subr.bf16.mxu1 %v11309_v52  ;;  %7635 = vmatprep.mubr.bf16.mxu0 %v8995_v27  ;;  %v11357_v52 = vld [vmem:[%s12112_s4 + $0xae0] sm:$0xff]   ;;  %v11384_v27 = vld [vmem:[%s12112_s4 + $0xb10] sm:$0xff]  }
 0x17e   : > { %7675 = vmatprep.mubr.bf16.mxu1 %v8997_v32  ;;  %v11389_v32 = vld [vmem:[%s12112_s4 + $0xbd8] sm:$0xff]  }
 0x17f   : > { %10244 = vmatpush3.bf16.msra.mxu0 %v11308_v51 }
 0x180   : > { %10266 = vmatpush3.bf16.msra.mxu1 %v11310_v53  ;;  %10245 = vmatprep.subr.bf16.mxu0 %v11311_v54 }
 0x181   : > { %10267 = vmatprep.subr.bf16.mxu1 %v11313_v56 }
 0x183   : > { %10246 = vmatpush3.bf16.msra.mxu0 %v11312_v55  ;;  %v11358_v55 = vld [vmem:[%s12112_s4 + $0xaa0] sm:$0xff]  }
 0x184   : > { %10268 = vmatpush3.bf16.msra.mxu1 %v11314_v57  ;;  %10247 = vmatprep.subr.bf16.mxu0 %v11315_v58  ;;  %v11359_v58 = vld [vmem:[%s12112_s4 + $0xa68] sm:$0xff]  }
 0x185   : > { %10269 = vmatprep.subr.bf16.mxu1 %v11317_v60  ;;  %v11360_v60 = vld [vmem:[%s12112_s4 + $0xa28] sm:$0xff]  }
 0x187   : > { %10248 = vmatpush3.bf16.msra.mxu0 %v11316_v59 }
 0x188   : > { %10270 = vmatpush3.bf16.msra.mxu1 %v11318_v61  ;;  %10249 = vmatprep.subr.bf16.mxu0 %v11319_v62 }
 0x189   : > { %10271 = vmatprep.subr.bf16.mxu1 %v11321_v1  ;;  %v11362_v1 = vld [vmem:[%s12112_s4 + $0xaa8] sm:$0xff]  }
 0x18b   : > { %10250 = vmatpush3.bf16.msra.mxu0 %v11320_v63  ;;  %v11361_v63 = vld [vmem:[%s12112_s4 + $0xae8] sm:$0xff]  }
 0x18c   : > { %10272 = vmatpush3.bf16.msra.mxu1 %v11322_v3  ;;  %10251 = vmatprep.subr.bf16.mxu0 %v11323_v6  ;;  %v11365_v6 = vld [vmem:[%s12112_s4 + $0xaf0] sm:$0xff]  }
 0x18d   : > { %v9949_v0 = vpop.f32.mrb[8].mxu0  ;;  %10273 = vmatprep.subr.bf16.mxu1 %v11325_v12 }
 0x18e   : > { %v9950_v2 = vpop.f32.mrb[9].mxu0  ;;  %v9971_v7 = vpop.f32.mrb[8].mxu1 }
 0x18f   : > { %v9951_v4 = vadd.f32 %v9950_v2, %v9949_v0  ;;  %v9952_v5 = vpop.f32.mrb[10].mxu0  ;;  %v9972_v11 = vpop.f32.mrb[9].mxu1  ;;  %10252 = vmatpush3.bf16.msra.mxu0 %v11324_v9  ;;  %v11368_v9 = vld [vmem:[%s12112_s4 + $0xa38] sm:$0xff]  }
 0x190   : > { %v9953_v10 = vpop.f32.mrb[11].mxu0  ;;  %v9973_v13 = vadd.f32 %v9972_v11, %v9971_v7  ;;  %v9974_v15 = vpop.f32.mrb[10].mxu1  ;;  %10274 = vmatpush3.bf16.msra.mxu1 %v11326_v14  ;;  %10253 = vmatprep.subr.bf16.mxu0 %v11327_v17  ;;  %v11364_v5 = vld [vmem:[%s12112_s4 + $0xa30] sm:$0xff]   ;;  %v239_v11 = vld [vmem:[%s12126_s27 + $0xa0] sm:$0xff] }
 0x191   : > { %v7078_v8 = vadd.f32 %v9951_v4, %v12429_v31  ;;  %v9975_v18 = vpop.f32.mrb[11].mxu1  ;;  %10275 = vmatprep.subr.bf16.mxu1 %v11329_v20  ;;  %v8996_v31 = vcombine.low %v238_v30, %v238_v30  ;;  %v11363_v4 = vld [vmem:[%s12112_s4 + $0xa70] sm:$0xff]   ;;  %v11369_v10 = vld [vmem:[%s12112_s4 + $0xaf8] sm:$0xff]   ;;  %v8998_v12 = vcombine.low %v239_v11, %v239_v11  ;;  %v11373_v15 = vld [vmem:[%s12112_s4 + $0xb40] sm:$0xff]  }
 0x192   : > { %v11366_v7 = vld [vmem:[%s12112_s4 + $0xab0] sm:$0xff]   ;;  %v11372_v14 = vld [vmem:[%s12112_s4 + $0xab8] sm:$0xff]   ;;  %v11377_v20 = vld [vmem:[%s12112_s4 + $0xbc0] sm:$0xff]  }
 0x193   : > { %v12466_v16 = vadd.f32 %v9973_v13, %v7078_v8  ;;  %10254 = vmatpush3.bf16.msra.mxu0 %v11328_v19  ;;  %v11367_v8 = vld [vmem:[%s12112_s4 + $0xa78] sm:$0xff]   ;;  %v8999_v13 = vcombine.high %v239_v11, %v239_v11  ;;  %v11376_v19 = vld [vmem:[%s12112_s4 + $0xb00] sm:$0xff]   ;;  %v11418_v11 = vld [vmem:[%s12112_s4 + $0xc88] sm:$0xff]  }
 0x194   : > { %10276 = vmatpush3.bf16.msra.mxu1 %v11330_v21  ;;  %10255 = vmatprep.subr.bf16.mxu0 %v11331_v22  ;;  %v11378_v21 = vld [vmem:[%s12112_s4 + $0xb80] sm:$0xff]   ;;  %v11379_v22 = vld [vmem:[%s12112_s4 + $0xb48] sm:$0xff]   ;;  %v11387_v30 = vld [vmem:[%s12112_s4 + $0xb58] sm:$0xff]  }
 0x195   : > { %10277 = vmatprep.subr.bf16.mxu1 %v11333_v24  ;;  %v11381_v24 = vld [vmem:[%s12112_s4 + $0xbc8] sm:$0xff]  }
 0x197   : > { %10256 = vmatpush3.bf16.msra.mxu0 %v11332_v23  ;;  %v11380_v23 = vld [vmem:[%s12112_s4 + $0xb08] sm:$0xff]  }
 0x198   : > { %10278 = vmatpush3.bf16.msra.mxu1 %v11336_v28  ;;  %10285 = vmatprep.subr.bf16.mxu0 %v11337_v29  ;;  %v11385_v28 = vld [vmem:[%s12112_s4 + $0xbd0] sm:$0xff]  }
 0x199   : > { %10307 = vmatprep.subr.bf16.mxu1 %v11341_v34  ;;  %v11386_v29 = vld [vmem:[%s12112_s4 + $0xb90] sm:$0xff]   ;;  %v11391_v34 = vld [vmem:[%s12112_s4 + $0xb60] sm:$0xff]  }
 0x19a   : > { %7636 = vmatmul.mubr.bf16.vlgmr.msra.gmra.mrb[36].mxu0 %v8994_v26  ;;  %v11383_v26 = vld [vmem:[%s12112_s4 + $0xb50] sm:$0xff]  }
 0x19b   : > { %10286 = vmatpush3.bf16.msra.mxu0 %v11340_v33  ;;  %7676 = vmatmul.mubr.bf16.vlgmr.msra.gmra.mrb[36].mxu1 %v8996_v31  ;;  %v11388_v31 = vld [vmem:[%s12112_s4 + $0xb18] sm:$0xff]  }
 0x19c   : > { %10308 = vmatpush3.bf16.msra.mxu1 %v11342_v35  ;;  %10287 = vmatprep.subr.bf16.mxu0 %v11343_v36  ;;  %v11390_v33 = vld [vmem:[%s12112_s4 + $0xb98] sm:$0xff]   ;;  %v11392_v36 = vld [vmem:[%s12112_s4 + $0xb20] sm:$0xff]  }
 0x19d   : > { %10309 = vmatprep.subr.bf16.mxu1 %v11345_v38  ;;  %7715 = vmatprep.mubr.bf16.mxu0 %v8999_v13  ;;  %v11393_v38 = vld [vmem:[%s12112_s4 + $0xbe0] sm:$0xff]   ;;  %v11420_v13 = vld [vmem:[%s12112_s4 + $0xc10] sm:$0xff]  }
 0x19f   : > { %10288 = vmatpush3.bf16.msra.mxu0 %v11344_v37 }
 0x1a0   : > { %10310 = vmatpush3.bf16.msra.mxu1 %v11346_v39  ;;  %10289 = vmatprep.subr.bf16.mxu0 %v11347_v40 }
 0x1a1   : > { %10311 = vmatprep.subr.bf16.mxu1 %v11349_v42 }
 0x1a3   : > { %10290 = vmatpush3.bf16.msra.mxu0 %v11348_v41  ;;  %v11394_v41 = vld [vmem:[%s12112_s4 + $0xba0] sm:$0xff]  }
 0x1a4   : > { %10312 = vmatpush3.bf16.msra.mxu1 %v11350_v43  ;;  %10291 = vmatprep.subr.bf16.mxu0 %v11351_v44  ;;  %v11395_v44 = vld [vmem:[%s12112_s4 + $0xb68] sm:$0xff]  }
 0x1a5   : > { %10313 = vmatprep.subr.bf16.mxu1 %v11353_v46  ;;  %v11396_v46 = vld [vmem:[%s12112_s4 + $0xb28] sm:$0xff]  }
 0x1a7   : > { %10292 = vmatpush3.bf16.msra.mxu0 %v11352_v45 }
 0x1a8   : > { %10314 = vmatpush3.bf16.msra.mxu1 %v11354_v47  ;;  %10293 = vmatprep.subr.bf16.mxu0 %v11355_v48 }
 0x1a9   : > { %10315 = vmatprep.subr.bf16.mxu1 %v11357_v52 }
 0x1ab   : > { %10294 = vmatpush3.bf16.msra.mxu0 %v11356_v50 }
 0x1ac   : > { %10316 = vmatpush3.bf16.msra.mxu1 %v11358_v55  ;;  %10295 = vmatprep.subr.bf16.mxu0 %v11359_v58  ;;  %v11400_v55 = vld [vmem:[%s12112_s4 + $0xb30] sm:$0xff]   ;;  %v11403_v58 = vld [vmem:[%s12112_s4 + $0xb78] sm:$0xff]  }
 0x1ad   : > { %v9993_v49 = vpop.f32.mrb[12].mxu0  ;;  %10317 = vmatprep.subr.bf16.mxu1 %v11361_v63 }
 0x1ae   : > { %v9994_v51 = vpop.f32.mrb[13].mxu0  ;;  %v10015_v56 = vpop.f32.mrb[12].mxu1 }
 0x1af   : > { %v9995_v53 = vadd.f32 %v9994_v51, %v9993_v49  ;;  %v9996_v54 = vpop.f32.mrb[14].mxu0  ;;  %v10016_v61 = vpop.f32.mrb[13].mxu1  ;;  %10296 = vmatpush3.bf16.msra.mxu0 %v11360_v60  ;;  %v11397_v49 = vld [vmem:[%s12112_s4 + $0xbe8] sm:$0xff]   ;;  %v11405_v60 = vld [vmem:[%s12112_s4 + $0xbf8] sm:$0xff]  }
 0x1b0   : > { %v9997_v59 = vpop.f32.mrb[15].mxu0  ;;  %v10017_v62 = vadd.f32 %v10016_v61, %v10015_v56  ;;  %v10018_v0 = vpop.f32.mrb[14].mxu1  ;;  %10318 = vmatpush3.bf16.msra.mxu1 %v11362_v1  ;;  %10297 = vmatprep.subr.bf16.mxu0 %v11363_v4  ;;  %v11398_v51 = vld [vmem:[%s12112_s4 + $0xba8] sm:$0xff]   ;;  %v11399_v54 = vld [vmem:[%s12112_s4 + $0xb70] sm:$0xff]   ;;  %v11409_v1 = vld [vmem:[%s12112_s4 + $0xc40] sm:$0xff]  }
 0x1b1   : > { %v7158_v57 = vadd.f32 %v9995_v53, %v12466_v16  ;;  %v10019_v2 = vpop.f32.mrb[15].mxu1  ;;  %10319 = vmatprep.subr.bf16.mxu1 %v11365_v6  ;;  %v240_v16 = vld [vmem:[%s12126_s27 + $0xa8] sm:$0xff]  ;;  %v11401_v56 = vld [vmem:[%s12112_s4 + $0xbf0] sm:$0xff]   ;;  %v11404_v59 = vld [vmem:[%s12112_s4 + $0xb38] sm:$0xff]  }
 0x1b2   : > { %v9000_v17 = vcombine.low %v240_v16, %v240_v16  ;;  %v9001_v18 = vcombine.high %v240_v16, %v240_v16  ;;  %v241_v61 = vld [vmem:[%s12126_s27 + $0xb0] sm:$0xff]  ;;  %v11408_v0 = vld [vmem:[%s12112_s4 + $0xbb8] sm:$0xff]   ;;  %v242_v2 = vld [vmem:[%s12126_s27 + $0xb8] sm:$0xff] }
 0x1b3   : > { %v12503_v3 = vadd.f32 %v10017_v62, %v7158_v57  ;;  %10298 = vmatpush3.bf16.msra.mxu0 %v11364_v5  ;;  %v11402_v57 = vld [vmem:[%s12112_s4 + $0xbb0] sm:$0xff]   ;;  %v9002_v62 = vcombine.low %v241_v61, %v241_v61  ;;  %v9003_v63 = vcombine.high %v241_v61, %v241_v61  ;;  %v9005_v4 = vcombine.high %v242_v2, %v242_v2  ;;  %v11412_v5 = vld [vmem:[%s12112_s4 + $0xc00] sm:$0xff]   ;;  %v11423_v16 = vld [vmem:[%s12112_s4 + $0xc58] sm:$0xff]  }
 0x1b4   : > { %10320 = vmatpush3.bf16.msra.mxu1 %v11366_v7  ;;  %10299 = vmatprep.subr.bf16.mxu0 %v11367_v8  ;;  %v11413_v6 = vld [vmem:[%s12112_s4 + $0xcc0] sm:$0xff]   ;;  %v11415_v8 = vld [vmem:[%s12112_s4 + $0xc48] sm:$0xff]  }
 0x1b5   : > { %10321 = vmatprep.subr.bf16.mxu1 %v11369_v10  ;;  %7755 = vmatprep.mubr.bf16.mxu1 %v9001_v18  ;;  %v11414_v7 = vld [vmem:[%s12112_s4 + $0xc80] sm:$0xff]   ;;  %v11417_v10 = vld [vmem:[%s12112_s4 + $0xcc8] sm:$0xff]   ;;  %v11425_v18 = vld [vmem:[%s12112_s4 + $0xcd8] sm:$0xff]  }
 0x1b6   : > { %v11454_v61 = vld [vmem:[%s12112_s4 + $0xd88] sm:$0xff]  }
 0x1b7   : > { %10300 = vmatpush3.bf16.msra.mxu0 %v11368_v9  ;;  %v11416_v9 = vld [vmem:[%s12112_s4 + $0xc08] sm:$0xff]  }
 0x1b8   : > { %10322 = vmatpush3.bf16.msra.mxu1 %v11372_v14  ;;  %10329 = vmatprep.subr.bf16.mxu0 %v11373_v15  ;;  %v11421_v14 = vld [vmem:[%s12112_s4 + $0xcd0] sm:$0xff]  }
 0x1b9   : > { %10351 = vmatprep.subr.bf16.mxu1 %v11377_v20  ;;  %v11422_v15 = vld [vmem:[%s12112_s4 + $0xc90] sm:$0xff]   ;;  %v11427_v20 = vld [vmem:[%s12112_s4 + $0xc60] sm:$0xff]  }
 0x1ba   : > { %7716 = vmatmul.mubr.bf16.vlgmr.msra.gmra.mrb[40].mxu0 %v8998_v12  ;;  %v11419_v12 = vld [vmem:[%s12112_s4 + $0xc50] sm:$0xff]  }
 0x1bb   : > { %10330 = vmatpush3.bf16.msra.mxu0 %v11376_v19  ;;  %7756 = vmatmul.mubr.bf16.vlgmr.msra.gmra.mrb[40].mxu1 %v9000_v17  ;;  %v11424_v17 = vld [vmem:[%s12112_s4 + $0xc18] sm:$0xff]  }
 0x1bc   : > { %10352 = vmatpush3.bf16.msra.mxu1 %v11378_v21  ;;  %10331 = vmatprep.subr.bf16.mxu0 %v11379_v22  ;;  %v11426_v19 = vld [vmem:[%s12112_s4 + $0xc98] sm:$0xff]   ;;  %v11428_v22 = vld [vmem:[%s12112_s4 + $0xc20] sm:$0xff]  }
 0x1bd   : > { %10353 = vmatprep.subr.bf16.mxu1 %v11381_v24  ;;  %7795 = vmatprep.mubr.bf16.mxu0 %v9003_v63  ;;  %v11429_v24 = vld [vmem:[%s12112_s4 + $0xce0] sm:$0xff]   ;;  %v11456_v63 = vld [vmem:[%s12112_s4 + $0xd10] sm:$0xff]  }
 0x1be   : > { %7835 = vmatprep.mubr.bf16.mxu1 %v9005_v4  ;;  %v11461_v4 = vld [vmem:[%s12112_s4 + $0xdd8] sm:$0xff]  }
 0x1bf   : > { %10332 = vmatpush3.bf16.msra.mxu0 %v11380_v23 }
 0x1c0   : > { %10354 = vmatpush3.bf16.msra.mxu1 %v11382_v25  ;;  %10333 = vmatprep.subr.bf16.mxu0 %v11383_v26 }
 0x1c1   : > { %10355 = vmatprep.subr.bf16.mxu1 %v11385_v28 }
 0x1c3   : > { %10334 = vmatpush3.bf16.msra.mxu0 %v11384_v27  ;;  %v11430_v27 = vld [vmem:[%s12112_s4 + $0xca0] sm:$0xff]  }
 0x1c4   : > { %10356 = vmatpush3.bf16.msra.mxu1 %v11386_v29  ;;  %10335 = vmatprep.subr.bf16.mxu0 %v11387_v30  ;;  %v11431_v30 = vld [vmem:[%s12112_s4 + $0xc68] sm:$0xff]  }
 0x1c5   : > { %10357 = vmatprep.subr.bf16.mxu1 %v11389_v32  ;;  %v11432_v32 = vld [vmem:[%s12112_s4 + $0xc28] sm:$0xff]  }
 0x1c7   : > { %10336 = vmatpush3.bf16.msra.mxu0 %v11388_v31 }
 0x1c8   : > { %10358 = vmatpush3.bf16.msra.mxu1 %v11390_v33  ;;  %10337 = vmatprep.subr.bf16.mxu0 %v11391_v34 }
 0x1c9   : > { %10359 = vmatprep.subr.bf16.mxu1 %v11393_v38 }
 0x1cb   : > { %10338 = vmatpush3.bf16.msra.mxu0 %v11392_v36 }
 0x1cc   : > { %10360 = vmatpush3.bf16.msra.mxu1 %v11394_v41  ;;  %10339 = vmatprep.subr.bf16.mxu0 %v11395_v44  ;;  %v11436_v41 = vld [vmem:[%s12112_s4 + $0xc30] sm:$0xff]   ;;  %v11439_v44 = vld [vmem:[%s12112_s4 + $0xc78] sm:$0xff]  }
 0x1cd   : > { %v10037_v35 = vpop.f32.mrb[16].mxu0  ;;  %10361 = vmatprep.subr.bf16.mxu1 %v11397_v49 }
 0x1ce   : > { %v10038_v37 = vpop.f32.mrb[17].mxu0  ;;  %v10059_v42 = vpop.f32.mrb[16].mxu1 }
 0x1cf   : > { %v10039_v39 = vadd.f32 %v10038_v37, %v10037_v35  ;;  %v10040_v40 = vpop.f32.mrb[18].mxu0  ;;  %v10060_v47 = vpop.f32.mrb[17].mxu1  ;;  %10340 = vmatpush3.bf16.msra.mxu0 %v11396_v46  ;;  %v11433_v35 = vld [vmem:[%s12112_s4 + $0xce8] sm:$0xff]   ;;  %v11441_v46 = vld [vmem:[%s12112_s4 + $0xcf8] sm:$0xff]  }
 0x1d0   : > { %v10041_v45 = vpop.f32.mrb[19].mxu0  ;;  %v10061_v48 = vadd.f32 %v10060_v47, %v10059_v42  ;;  %v10062_v50 = vpop.f32.mrb[18].mxu1  ;;  %10362 = vmatpush3.bf16.msra.mxu1 %v11398_v51  ;;  %10341 = vmatprep.subr.bf16.mxu0 %v11399_v54  ;;  %v11434_v37 = vld [vmem:[%s12112_s4 + $0xca8] sm:$0xff]   ;;  %v11435_v40 = vld [vmem:[%s12112_s4 + $0xc70] sm:$0xff]   ;;  %v243_v47 = vld [vmem:[%s12126_s27 + $0xc0] sm:$0xff] }
 0x1d1   : > { %v7238_v43 = vadd.f32 %v10039_v39, %v12503_v3  ;;  %v10063_v52 = vpop.f32.mrb[19].mxu1  ;;  %10363 = vmatprep.subr.bf16.mxu1 %v11401_v56  ;;  %v9004_v3 = vcombine.low %v242_v2, %v242_v2  ;;  %v11437_v42 = vld [vmem:[%s12112_s4 + $0xcf0] sm:$0xff]   ;;  %v11440_v45 = vld [vmem:[%s12112_s4 + $0xc38] sm:$0xff]   ;;  %v9007_v49 = vcombine.high %v243_v47, %v243_v47  ;;  %v11445_v51 = vld [vmem:[%s12112_s4 + $0xd40] sm:$0xff]  }
 0x1d2   : > { %v11444_v50 = vld [vmem:[%s12112_s4 + $0xcb8] sm:$0xff]   ;;  %v244_v52 = vld [vmem:[%s12126_s27 + $0xc8] sm:$0xff] }
 0x1d3   : > { %v12540_v53 = vadd.f32 %v10061_v48, %v7238_v43  ;;  %10342 = vmatpush3.bf16.msra.mxu0 %v11400_v55  ;;  %v11438_v43 = vld [vmem:[%s12112_s4 + $0xcb0] sm:$0xff]   ;;  %v9006_v48 = vcombine.low %v243_v47, %v243_v47  ;;  %v9009_v54 = vcombine.high %v244_v52, %v244_v52  ;;  %v11448_v55 = vld [vmem:[%s12112_s4 + $0xd00] sm:$0xff]   ;;  %v11459_v2 = vld [vmem:[%s12112_s4 + $0xd58] sm:$0xff]  }
 0x1d4   : > { %10364 = vmatpush3.bf16.msra.mxu1 %v11402_v57  ;;  %10343 = vmatprep.subr.bf16.mxu0 %v11403_v58  ;;  %v11449_v56 = vld [vmem:[%s12112_s4 + $0xdc0] sm:$0xff]   ;;  %v11451_v58 = vld [vmem:[%s12112_s4 + $0xd48] sm:$0xff]  }
 0x1d5   : > { %10365 = vmatprep.subr.bf16.mxu1 %v11405_v60  ;;  %v11450_v57 = vld [vmem:[%s12112_s4 + $0xd80] sm:$0xff]   ;;  %v11453_v60 = vld [vmem:[%s12112_s4 + $0xdc8] sm:$0xff]  }
 0x1d6   : > { %v11490_v47 = vld [vmem:[%s12112_s4 + $0xe88] sm:$0xff]  }
 0x1d7   : > { %10344 = vmatpush3.bf16.msra.mxu0 %v11404_v59  ;;  %v11452_v59 = vld [vmem:[%s12112_s4 + $0xd08] sm:$0xff]  }
 0x1d8   : > { %10366 = vmatpush3.bf16.msra.mxu1 %v11408_v0  ;;  %10373 = vmatprep.subr.bf16.mxu0 %v11409_v1  ;;  %v11457_v0 = vld [vmem:[%s12112_s4 + $0xdd0] sm:$0xff]  }
 0x1d9   : > { %10395 = vmatprep.subr.bf16.mxu1 %v11413_v6  ;;  %v11458_v1 = vld [vmem:[%s12112_s4 + $0xd90] sm:$0xff]   ;;  %v11463_v6 = vld [vmem:[%s12112_s4 + $0xd60] sm:$0xff]  }
 0x1da   : > { %7796 = vmatmul.mubr.bf16.vlgmr.msra.gmra.mrb[44].mxu0 %v9002_v62  ;;  %v11455_v62 = vld [vmem:[%s12112_s4 + $0xd50] sm:$0xff]  }
 0x1db   : > { %10374 = vmatpush3.bf16.msra.mxu0 %v11412_v5  ;;  %7836 = vmatmul.mubr.bf16.vlgmr.msra.gmra.mrb[44].mxu1 %v9004_v3  ;;  %v11460_v3 = vld [vmem:[%s12112_s4 + $0xd18] sm:$0xff]  }
 0x1dc   : > { %10396 = vmatpush3.bf16.msra.mxu1 %v11414_v7  ;;  %10375 = vmatprep.subr.bf16.mxu0 %v11415_v8  ;;  %v11462_v5 = vld [vmem:[%s12112_s4 + $0xd98] sm:$0xff]   ;;  %v11464_v8 = vld [vmem:[%s12112_s4 + $0xd20] sm:$0xff]  }
 0x1dd   : > { %10397 = vmatprep.subr.bf16.mxu1 %v11417_v10  ;;  %7875 = vmatprep.mubr.bf16.mxu0 %v9007_v49  ;;  %v11465_v10 = vld [vmem:[%s12112_s4 + $0xde0] sm:$0xff]   ;;  %v11492_v49 = vld [vmem:[%s12112_s4 + $0xe10] sm:$0xff]  }
 0x1de   : > { %7915 = vmatprep.mubr.bf16.mxu1 %v9009_v54  ;;  %v11497_v54 = vld [vmem:[%s12112_s4 + $0xed8] sm:$0xff]  }
 0x1df   : > { %10376 = vmatpush3.bf16.msra.mxu0 %v11416_v9 }
 0x1e0   : > { %10398 = vmatpush3.bf16.msra.mxu1 %v11418_v11  ;;  %10377 = vmatprep.subr.bf16.mxu0 %v11419_v12 }
 0x1e1   : > { %10399 = vmatprep.subr.bf16.mxu1 %v11421_v14 }
 0x1e3   : > { %10378 = vmatpush3.bf16.msra.mxu0 %v11420_v13  ;;  %v11466_v13 = vld [vmem:[%s12112_s4 + $0xda0] sm:$0xff]  }
 0x1e4   : > { %10400 = vmatpush3.bf16.msra.mxu1 %v11422_v15  ;;  %10379 = vmatprep.subr.bf16.mxu0 %v11423_v16  ;;  %v11467_v16 = vld [vmem:[%s12112_s4 + $0xd68] sm:$0xff]  }
 0x1e5   : > { %10401 = vmatprep.subr.bf16.mxu1 %v11425_v18  ;;  %v11468_v18 = vld [vmem:[%s12112_s4 + $0xd28] sm:$0xff]  }
 0x1e7   : > { %10380 = vmatpush3.bf16.msra.mxu0 %v11424_v17 }
 0x1e8   : > { %10402 = vmatpush3.bf16.msra.mxu1 %v11426_v19  ;;  %10381 = vmatprep.subr.bf16.mxu0 %v11427_v20 }
 0x1e9   : > { %10403 = vmatprep.subr.bf16.mxu1 %v11429_v24 }
 0x1eb   : > { %10382 = vmatpush3.bf16.msra.mxu0 %v11428_v22 }
 0x1ec   : > { %10404 = vmatpush3.bf16.msra.mxu1 %v11430_v27  ;;  %10383 = vmatprep.subr.bf16.mxu0 %v11431_v30  ;;  %v11472_v27 = vld [vmem:[%s12112_s4 + $0xd30] sm:$0xff]   ;;  %v11475_v30 = vld [vmem:[%s12112_s4 + $0xd78] sm:$0xff]  }
 0x1ed   : > { %v10081_v21 = vpop.f32.mrb[20].mxu0  ;;  %10405 = vmatprep.subr.bf16.mxu1 %v11433_v35 }
 0x1ee   : > { %v10082_v23 = vpop.f32.mrb[21].mxu0  ;;  %v10103_v28 = vpop.f32.mrb[20].mxu1 }
 0x1ef   : > { %v10083_v25 = vadd.f32 %v10082_v23, %v10081_v21  ;;  %v10084_v26 = vpop.f32.mrb[22].mxu0  ;;  %v10104_v33 = vpop.f32.mrb[21].mxu1  ;;  %10384 = vmatpush3.bf16.msra.mxu0 %v11432_v32  ;;  %v11469_v21 = vld [vmem:[%s12112_s4 + $0xde8] sm:$0xff]   ;;  %v11477_v32 = vld [vmem:[%s12112_s4 + $0xdf8] sm:$0xff]  }
 0x1f0   : > { %v10085_v31 = vpop.f32.mrb[23].mxu0  ;;  %v10105_v34 = vadd.f32 %v10104_v33, %v10103_v28  ;;  %v10106_v36 = vpop.f32.mrb[22].mxu1  ;;  %10406 = vmatpush3.bf16.msra.mxu1 %v11434_v37  ;;  %10385 = vmatprep.subr.bf16.mxu0 %v11435_v40  ;;  %v11470_v23 = vld [vmem:[%s12112_s4 + $0xda8] sm:$0xff]   ;;  %v11471_v26 = vld [vmem:[%s12112_s4 + $0xd70] sm:$0xff]   ;;  %v11481_v37 = vld [vmem:[%s12112_s4 + $0xe40] sm:$0xff]  }
 0x1f1   : > { %v7318_v29 = vadd.f32 %v10083_v25, %v12540_v53  ;;  %v10107_v38 = vpop.f32.mrb[23].mxu1  ;;  %10407 = vmatprep.subr.bf16.mxu1 %v11437_v42  ;;  %v9008_v53 = vcombine.low %v244_v52, %v244_v52  ;;  %v11473_v28 = vld [vmem:[%s12112_s4 + $0xdf0] sm:$0xff]   ;;  %v11476_v31 = vld [vmem:[%s12112_s4 + $0xd38] sm:$0xff]   ;;  %v245_v33 = vld [vmem:[%s12126_s27 + $0xd0] sm:$0xff] }
 0x1f2   : > { %v9011_v35 = vcombine.high %v245_v33, %v245_v33  ;;  %v11480_v36 = vld [vmem:[%s12112_s4 + $0xdb8] sm:$0xff]   ;;  %v246_v38 = vld [vmem:[%s12126_s27 + $0xd8] sm:$0xff]  ;;  %v11485_v42 = vld [vmem:[%s12112_s4 + $0xec0] sm:$0xff]  }
 0x1f3   : > { %v12577_v39 = vadd.f32 %v10105_v34, %v7318_v29  ;;  %10386 = vmatpush3.bf16.msra.mxu0 %v11436_v41  ;;  %v11474_v29 = vld [vmem:[%s12112_s4 + $0xdb0] sm:$0xff]   ;;  %v9010_v34 = vcombine.low %v245_v33, %v245_v33  ;;  %v9013_v40 = vcombine.high %v246_v38, %v246_v38  ;;  %v11484_v41 = vld [vmem:[%s12112_s4 + $0xe00] sm:$0xff]   ;;  %v11495_v52 = vld [vmem:[%s12112_s4 + $0xe58] sm:$0xff]  }
 0x1f4   : > { %10408 = vmatpush3.bf16.msra.mxu1 %v11438_v43  ;;  %10387 = vmatprep.subr.bf16.mxu0 %v11439_v44  ;;  %v11486_v43 = vld [vmem:[%s12112_s4 + $0xe80] sm:$0xff]   ;;  %v11487_v44 = vld [vmem:[%s12112_s4 + $0xe48] sm:$0xff]  }
 0x1f5   : > { %10409 = vmatprep.subr.bf16.mxu1 %v11441_v46  ;;  %v11489_v46 = vld [vmem:[%s12112_s4 + $0xec8] sm:$0xff]  }
 0x1f6   : > { %v11526_v33 = vld [vmem:[%s12112_s4 + $0xf88] sm:$0xff]  }
 0x1f7   : > { %10388 = vmatpush3.bf16.msra.mxu0 %v11440_v45  ;;  %v11488_v45 = vld [vmem:[%s12112_s4 + $0xe08] sm:$0xff]  }
 0x1f8   : > { %10410 = vmatpush3.bf16.msra.mxu1 %v11444_v50  ;;  %10417 = vmatprep.subr.bf16.mxu0 %v11445_v51  ;;  %v11493_v50 = vld [vmem:[%s12112_s4 + $0xed0] sm:$0xff]  }
 0x1f9   : > { %10439 = vmatprep.subr.bf16.mxu1 %v11449_v56  ;;  %v11494_v51 = vld [vmem:[%s12112_s4 + $0xe90] sm:$0xff]   ;;  %v11499_v56 = vld [vmem:[%s12112_s4 + $0xe60] sm:$0xff]  }
 0x1fa   : > { %7876 = vmatmul.mubr.bf16.vlgmr.msra.gmra.mrb[48].mxu0 %v9006_v48  ;;  %v11491_v48 = vld [vmem:[%s12112_s4 + $0xe50] sm:$0xff]  }
 0x1fb   : > { %10418 = vmatpush3.bf16.msra.mxu0 %v11448_v55  ;;  %7916 = vmatmul.mubr.bf16.vlgmr.msra.gmra.mrb[48].mxu1 %v9008_v53  ;;  %v11496_v53 = vld [vmem:[%s12112_s4 + $0xe18] sm:$0xff]  }
 0x1fc   : > { %10440 = vmatpush3.bf16.msra.mxu1 %v11450_v57  ;;  %10419 = vmatprep.subr.bf16.mxu0 %v11451_v58  ;;  %v11498_v55 = vld [vmem:[%s12112_s4 + $0xe98] sm:$0xff]   ;;  %v11500_v57 = vld [vmem:[%s12112_s4 + $0xe20] sm:$0xff]  }
 0x1fd   : > { %10441 = vmatprep.subr.bf16.mxu1 %v11453_v60  ;;  %7955 = vmatprep.mubr.bf16.mxu0 %v9011_v35  ;;  %v11528_v35 = vld [vmem:[%s12112_s4 + $0xf10] sm:$0xff]  }
 0x1fe   : > { %7995 = vmatprep.mubr.bf16.mxu1 %v9013_v40  ;;  %v11533_v40 = vld [vmem:[%s12112_s4 + $0xfd8] sm:$0xff]  }
 0x1ff   : > { %10420 = vmatpush3.bf16.msra.mxu0 %v11452_v59  ;;  %v11501_v59 = vld [vmem:[%s12112_s4 + $0xee0] sm:$0xff]  }
 0x200   : > { %10442 = vmatpush3.bf16.msra.mxu1 %v11454_v61  ;;  %10421 = vmatprep.subr.bf16.mxu0 %v11455_v62  ;;  %v11502_v61 = vld [vmem:[%s12112_s4 + $0xea0] sm:$0xff]  }
 0x201   : > { %10443 = vmatprep.subr.bf16.mxu1 %v11457_v0  ;;  %v11503_v0 = vld [vmem:[%s12112_s4 + $0xe68] sm:$0xff]  }
 0x203   : > { %10422 = vmatpush3.bf16.msra.mxu0 %v11456_v63 }
 0x204   : > { %10444 = vmatpush3.bf16.msra.mxu1 %v11458_v1  ;;  %10423 = vmatprep.subr.bf16.mxu0 %v11459_v2 }
 0x205   : > { %10445 = vmatprep.subr.bf16.mxu1 %v11461_v4 }
 0x207   : > { %10424 = vmatpush3.bf16.msra.mxu0 %v11460_v3  ;;  %v11504_v3 = vld [vmem:[%s12112_s4 + $0xe28] sm:$0xff]  }
 0x208   : > { %10446 = vmatpush3.bf16.msra.mxu1 %v11462_v5  ;;  %10425 = vmatprep.subr.bf16.mxu0 %v11463_v6  ;;  %v11505_v6 = vld [vmem:[%s12112_s4 + $0xee8] sm:$0xff]  }
 0x209   : > { %10447 = vmatprep.subr.bf16.mxu1 %v11465_v10  ;;  %v11507_v10 = vld [vmem:[%s12112_s4 + $0xe70] sm:$0xff]  }
 0x20b   : > { %10426 = vmatpush3.bf16.msra.mxu0 %v11464_v8  ;;  %v11506_v8 = vld [vmem:[%s12112_s4 + $0xea8] sm:$0xff]  }
 0x20c   : > { %10448 = vmatpush3.bf16.msra.mxu1 %v11466_v13  ;;  %10427 = vmatprep.subr.bf16.mxu0 %v11467_v16  ;;  %v11508_v13 = vld [vmem:[%s12112_s4 + $0xe30] sm:$0xff]   ;;  %v11511_v16 = vld [vmem:[%s12112_s4 + $0xe78] sm:$0xff]  }
 0x20d   : > { %v10125_v7 = vpop.f32.mrb[24].mxu0  ;;  %10449 = vmatprep.subr.bf16.mxu1 %v11469_v21 }
 0x20e   : > { %v10126_v9 = vpop.f32.mrb[25].mxu0  ;;  %v10147_v14 = vpop.f32.mrb[24].mxu1 }
 0x20f   : > { %v10127_v11 = vadd.f32 %v10126_v9, %v10125_v7  ;;  %v10128_v12 = vpop.f32.mrb[26].mxu0  ;;  %v10148_v19 = vpop.f32.mrb[25].mxu1  ;;  %10428 = vmatpush3.bf16.msra.mxu0 %v11468_v18  ;;  %v11513_v18 = vld [vmem:[%s12112_s4 + $0xef8] sm:$0xff]  }
 0x210   : > { %v10129_v17 = vpop.f32.mrb[27].mxu0  ;;  %v10149_v20 = vadd.f32 %v10148_v19, %v10147_v14  ;;  %v10150_v22 = vpop.f32.mrb[26].mxu1  ;;  %10450 = vmatpush3.bf16.msra.mxu1 %v11470_v23  ;;  %10429 = vmatprep.subr.bf16.mxu0 %v11471_v26  ;;  %v11509_v14 = vld [vmem:[%s12112_s4 + $0xef0] sm:$0xff]   ;;  %v247_v19 = vld [vmem:[%s12126_s27 + $0xe0] sm:$0xff]  ;;  %v11517_v23 = vld [vmem:[%s12112_s4 + $0xf40] sm:$0xff]  }
 0x211   : > { %v7398_v15 = vadd.f32 %v10127_v11, %v12577_v39  ;;  %v10151_v24 = vpop.f32.mrb[27].mxu1  ;;  %10451 = vmatprep.subr.bf16.mxu1 %v11473_v28  ;;  %v9012_v39 = vcombine.low %v246_v38, %v246_v38  ;;  %v11512_v17 = vld [vmem:[%s12112_s4 + $0xe38] sm:$0xff]   ;;  %v9015_v21 = vcombine.high %v247_v19, %v247_v19  ;;  %v11521_v28 = vld [vmem:[%s12112_s4 + $0xfc0] sm:$0xff]  }
 0x212   : > { %v11516_v22 = vld [vmem:[%s12112_s4 + $0xeb8] sm:$0xff]   ;;  %v248_v24 = vld [vmem:[%s12126_s27 + $0xe8] sm:$0xff] }
 0x213   : > { %v12614_v25 = vadd.f32 %v10149_v20, %v7398_v15  ;;  %10430 = vmatpush3.bf16.msra.mxu0 %v11472_v27  ;;  %v11510_v15 = vld [vmem:[%s12112_s4 + $0xeb0] sm:$0xff]   ;;  %v9014_v20 = vcombine.low %v247_v19, %v247_v19  ;;  %v9017_v26 = vcombine.high %v248_v24, %v248_v24  ;;  %v11520_v27 = vld [vmem:[%s12112_s4 + $0xf00] sm:$0xff]   ;;  %v11531_v38 = vld [vmem:[%s12112_s4 + $0xf58] sm:$0xff]  }
 0x214   : > { %10452 = vmatpush3.bf16.msra.mxu1 %v11474_v29  ;;  %10431 = vmatprep.subr.bf16.mxu0 %v11475_v30  ;;  %v11522_v29 = vld [vmem:[%s12112_s4 + $0xf80] sm:$0xff]   ;;  %v11523_v30 = vld [vmem:[%s12112_s4 + $0xf48] sm:$0xff]  }
 0x215   : > { %10453 = vmatprep.subr.bf16.mxu1 %v11477_v32  ;;  %v11525_v32 = vld [vmem:[%s12112_s4 + $0xfc8] sm:$0xff]  }
 0x216   : > { %v11562_v19 = vld [vmem:[%s12112_s4 + $0x1088] sm:$0xff]  }
 0x217   : > { %10432 = vmatpush3.bf16.msra.mxu0 %v11476_v31  ;;  %v11524_v31 = vld [vmem:[%s12112_s4 + $0xf08] sm:$0xff]  }
 0x218   : > { %10454 = vmatpush3.bf16.msra.mxu1 %v11480_v36  ;;  %10461 = vmatprep.subr.bf16.mxu0 %v11481_v37  ;;  %v11529_v36 = vld [vmem:[%s12112_s4 + $0xfd0] sm:$0xff]  }
 0x219   : > { %10483 = vmatprep.subr.bf16.mxu1 %v11485_v42  ;;  %v11530_v37 = vld [vmem:[%s12112_s4 + $0xf90] sm:$0xff]   ;;  %v11535_v42 = vld [vmem:[%s12112_s4 + $0xf60] sm:$0xff]  }
 0x21a   : > { %7956 = vmatmul.mubr.bf16.vlgmr.msra.gmra.mrb[52].mxu0 %v9010_v34  ;;  %v11527_v34 = vld [vmem:[%s12112_s4 + $0xf50] sm:$0xff]  }
 0x21b   : > { %10462 = vmatpush3.bf16.msra.mxu0 %v11484_v41  ;;  %7996 = vmatmul.mubr.bf16.vlgmr.msra.gmra.mrb[52].mxu1 %v9012_v39  ;;  %v11532_v39 = vld [vmem:[%s12112_s4 + $0xf18] sm:$0xff]  }
 0x21c   : > { %10484 = vmatpush3.bf16.msra.mxu1 %v11486_v43  ;;  %10463 = vmatprep.subr.bf16.mxu0 %v11487_v44  ;;  %v11534_v41 = vld [vmem:[%s12112_s4 + $0xf98] sm:$0xff]   ;;  %v11536_v43 = vld [vmem:[%s12112_s4 + $0xf20] sm:$0xff]  }
 0x21d   : > { %10485 = vmatprep.subr.bf16.mxu1 %v11489_v46  ;;  %8035 = vmatprep.mubr.bf16.mxu0 %v9015_v21  ;;  %v11564_v21 = vld [vmem:[%s12112_s4 + $0x1010] sm:$0xff]  }
 0x21e   : > { %8075 = vmatprep.mubr.bf16.mxu1 %v9017_v26  ;;  %v11569_v26 = vld [vmem:[%s12112_s4 + $0x10d8] sm:$0xff]  }
 0x21f   : > { %10464 = vmatpush3.bf16.msra.mxu0 %v11488_v45  ;;  %v11537_v45 = vld [vmem:[%s12112_s4 + $0xfe0] sm:$0xff]  }
 0x220   : > { %10486 = vmatpush3.bf16.msra.mxu1 %v11490_v47  ;;  %10465 = vmatprep.subr.bf16.mxu0 %v11491_v48  ;;  %v11538_v47 = vld [vmem:[%s12112_s4 + $0xfa0] sm:$0xff]  }
 0x221   : > { %10487 = vmatprep.subr.bf16.mxu1 %v11493_v50  ;;  %v11539_v50 = vld [vmem:[%s12112_s4 + $0xf68] sm:$0xff]  }
 0x223   : > { %10466 = vmatpush3.bf16.msra.mxu0 %v11492_v49 }
 0x224   : > { %10488 = vmatpush3.bf16.msra.mxu1 %v11494_v51  ;;  %10467 = vmatprep.subr.bf16.mxu0 %v11495_v52 }
 0x225   : > { %10489 = vmatprep.subr.bf16.mxu1 %v11497_v54 }
 0x227   : > { %10468 = vmatpush3.bf16.msra.mxu0 %v11496_v53  ;;  %v11540_v53 = vld [vmem:[%s12112_s4 + $0xf28] sm:$0xff]  }
 0x228   : > { %10490 = vmatpush3.bf16.msra.mxu1 %v11498_v55  ;;  %10469 = vmatprep.subr.bf16.mxu0 %v11499_v56  ;;  %v11541_v56 = vld [vmem:[%s12112_s4 + $0xfe8] sm:$0xff]  }
 0x229   : > { %10491 = vmatprep.subr.bf16.mxu1 %v11501_v59 }
 0x22b   : > { %10470 = vmatpush3.bf16.msra.mxu0 %v11500_v57 }
 0x22c   : > { %10492 = vmatpush3.bf16.msra.mxu1 %v11502_v61  ;;  %10471 = vmatprep.subr.bf16.mxu0 %v11503_v0  ;;  %v11543_v61 = vld [vmem:[%s12112_s4 + $0xf70] sm:$0xff]  }
 0x22d   : > { %v10169_v58 = vpop.f32.mrb[28].mxu0  ;;  %10493 = vmatprep.subr.bf16.mxu1 %v11505_v6  ;;  %v11545_v0 = vld [vmem:[%s12112_s4 + $0xff0] sm:$0xff]  }
 0x22e   : > { %v10170_v60 = vpop.f32.mrb[29].mxu0  ;;  %v10191_v1 = vpop.f32.mrb[28].mxu1 }
 0x22f   : > { %v10171_v62 = vadd.f32 %v10170_v60, %v10169_v58  ;;  %v10172_v63 = vpop.f32.mrb[30].mxu0  ;;  %v10192_v5 = vpop.f32.mrb[29].mxu1  ;;  %10472 = vmatpush3.bf16.msra.mxu0 %v11504_v3  ;;  %v11542_v58 = vld [vmem:[%s12112_s4 + $0xfa8] sm:$0xff]   ;;  %v11548_v3 = vld [vmem:[%s12112_s4 + $0xf38] sm:$0xff]  }
 0x230   : > { %v10173_v4 = vpop.f32.mrb[31].mxu0  ;;  %v10193_v7 = vadd.f32 %v10192_v5, %v10191_v1  ;;  %v10194_v9 = vpop.f32.mrb[30].mxu1  ;;  %10494 = vmatpush3.bf16.msra.mxu1 %v11506_v8  ;;  %10473 = vmatprep.subr.bf16.mxu0 %v11507_v10  ;;  %v11544_v63 = vld [vmem:[%s12112_s4 + $0xf30] sm:$0xff]   ;;  %v249_v5 = vld [vmem:[%s12126_s27 + $0xf0] sm:$0xff]  ;;  %v11552_v8 = vld [vmem:[%s12112_s4 + $0xfb8] sm:$0xff]  }
 0x231   : > { %v7478_v2 = vadd.f32 %v10171_v62, %v12614_v25  ;;  %v10195_v11 = vpop.f32.mrb[31].mxu1  ;;  %10495 = vmatprep.subr.bf16.mxu1 %v11509_v14  ;;  %v9016_v25 = vcombine.low %v248_v24, %v248_v24  ;;  %v11546_v1 = vld [vmem:[%s12112_s4 + $0xfb0] sm:$0xff]   ;;  %v11549_v4 = vld [vmem:[%s12112_s4 + $0xff8] sm:$0xff]   ;;  %v9018_v6 = vcombine.low %v249_v5, %v249_v5  ;;  %v11553_v9 = vld [vmem:[%s12112_s4 + $0x1040] sm:$0xff]  }
 0x232   : > { %v250_v10 = vld [vmem:[%s12126_s27 + $0xf8] sm:$0xff]  ;;  %v11557_v14 = vld [vmem:[%s12112_s4 + $0x10c0] sm:$0xff]   ;;  %v11567_v24 = vld [vmem:[%s12112_s4 + $0x1058] sm:$0xff]  }
 0x233   : > { %v12652_v12 = vadd.f32 %v10193_v7, %v7478_v2  ;;  %10474 = vmatpush3.bf16.msra.mxu0 %v11508_v13  ;;  %v11547_v2 = vld [vmem:[%s12112_s4 + $0xf78] sm:$0xff]   ;;  %v9019_v7 = vcombine.high %v249_v5, %v249_v5  ;;  %v9020_v11 = vcombine.low %v250_v10, %v250_v10  ;;  %v11556_v13 = vld [vmem:[%s12112_s4 + $0x1000] sm:$0xff]   ;;  %v11598_v5 = vld [vmem:[%s12112_s4 + $0x1188] sm:$0xff]  }
 0x234   : > { %10496 = vmatpush3.bf16.msra.mxu1 %v11510_v15  ;;  %10475 = vmatprep.subr.bf16.mxu0 %v11511_v16  ;;  %v11558_v15 = vld [vmem:[%s12112_s4 + $0x1080] sm:$0xff]   ;;  %v11559_v16 = vld [vmem:[%s12112_s4 + $0x1048] sm:$0xff]  }
 0x235   : > { %10497 = vmatprep.subr.bf16.mxu1 %v11513_v18  ;;  %v11561_v18 = vld [vmem:[%s12112_s4 + $0x10c8] sm:$0xff]  }
 0x237   : > { %10476 = vmatpush3.bf16.msra.mxu0 %v11512_v17  ;;  %v11560_v17 = vld [vmem:[%s12112_s4 + $0x1008] sm:$0xff]  }
 0x238   : > { %10498 = vmatpush3.bf16.msra.mxu1 %v11516_v22  ;;  %10505 = vmatprep.subr.bf16.mxu0 %v11517_v23  ;;  %v11565_v22 = vld [vmem:[%s12112_s4 + $0x10d0] sm:$0xff]  }
 0x239   : > { %10527 = vmatprep.subr.bf16.mxu1 %v11521_v28  ;;  %v11566_v23 = vld [vmem:[%s12112_s4 + $0x1090] sm:$0xff]   ;;  %v11571_v28 = vld [vmem:[%s12112_s4 + $0x1060] sm:$0xff]  }
 0x23a   : > { %8036 = vmatmul.mubr.bf16.vlgmr.msra.gmra.mrb[56].mxu0 %v9014_v20  ;;  %v11563_v20 = vld [vmem:[%s12112_s4 + $0x1050] sm:$0xff]  }
 0x23b   : > { %10506 = vmatpush3.bf16.msra.mxu0 %v11520_v27  ;;  %8076 = vmatmul.mubr.bf16.vlgmr.msra.gmra.mrb[56].mxu1 %v9016_v25  ;;  %v11568_v25 = vld [vmem:[%s12112_s4 + $0x1018] sm:$0xff]  }
 0x23c   : > { %10528 = vmatpush3.bf16.msra.mxu1 %v11522_v29  ;;  %10507 = vmatprep.subr.bf16.mxu0 %v11523_v30  ;;  %v11570_v27 = vld [vmem:[%s12112_s4 + $0x1098] sm:$0xff]   ;;  %v11572_v30 = vld [vmem:[%s12112_s4 + $0x1020] sm:$0xff]  }
 0x23d   : > { %10529 = vmatprep.subr.bf16.mxu1 %v11525_v32  ;;  %8115 = vmatprep.mubr.bf16.mxu0 %v9019_v7  ;;  %v11573_v32 = vld [vmem:[%s12112_s4 + $0x10e0] sm:$0xff]   ;;  %v11600_v7 = vld [vmem:[%s12112_s4 + $0x1110] sm:$0xff]  }
 0x23f   : > { %10508 = vmatpush3.bf16.msra.mxu0 %v11524_v31 }
 0x240   : > { %10530 = vmatpush3.bf16.msra.mxu1 %v11526_v33  ;;  %10509 = vmatprep.subr.bf16.mxu0 %v11527_v34 }
 0x241   : > { %10531 = vmatprep.subr.bf16.mxu1 %v11529_v36 }
 0x243   : > { %10510 = vmatpush3.bf16.msra.mxu0 %v11528_v35  ;;  %v11574_v35 = vld [vmem:[%s12112_s4 + $0x10a0] sm:$0xff]  }
 0x244   : > { %10532 = vmatpush3.bf16.msra.mxu1 %v11530_v37  ;;  %10511 = vmatprep.subr.bf16.mxu0 %v11531_v38  ;;  %v11575_v38 = vld [vmem:[%s12112_s4 + $0x1068] sm:$0xff]  }
 0x245   : > { %10533 = vmatprep.subr.bf16.mxu1 %v11533_v40  ;;  %v11576_v40 = vld [vmem:[%s12112_s4 + $0x1028] sm:$0xff]  }
 0x247   : > { %10512 = vmatpush3.bf16.msra.mxu0 %v11532_v39 }
 0x248   : > { %10534 = vmatpush3.bf16.msra.mxu1 %v11534_v41  ;;  %10513 = vmatprep.subr.bf16.mxu0 %v11535_v42 }
 0x249   : > { %10535 = vmatprep.subr.bf16.mxu1 %v11537_v45  ;;  %v11578_v45 = vld [vmem:[%s12112_s4 + $0x10a8] sm:$0xff]  }
 0x24b   : > { %10514 = vmatpush3.bf16.msra.mxu0 %v11536_v43  ;;  %v11577_v43 = vld [vmem:[%s12112_s4 + $0x10e8] sm:$0xff]  }
 0x24c   : > { %10536 = vmatpush3.bf16.msra.mxu1 %v11538_v47  ;;  %10515 = vmatprep.subr.bf16.mxu0 %v11539_v50  ;;  %v11581_v50 = vld [vmem:[%s12112_s4 + $0x10f0] sm:$0xff]  }
 0x24d   : > { %v10213_v44 = vpop.f32.mrb[32].mxu0  ;;  %10537 = vmatprep.subr.bf16.mxu1 %v11541_v56 }
 0x24e   : > { %v10214_v46 = vpop.f32.mrb[33].mxu0  ;;  %v10235_v51 = vpop.f32.mrb[32].mxu1 }
 0x24f   : > { %v10215_v48 = vadd.f32 %v10214_v46, %v10213_v44  ;;  %v10216_v49 = vpop.f32.mrb[34].mxu0  ;;  %v10236_v55 = vpop.f32.mrb[33].mxu1  ;;  %10516 = vmatpush3.bf16.msra.mxu0 %v11540_v53  ;;  %v11584_v53 = vld [vmem:[%s12112_s4 + $0x1038] sm:$0xff]  }
 0x250   : > { %v10217_v54 = vpop.f32.mrb[35].mxu0  ;;  %v10237_v57 = vadd.f32 %v10236_v55, %v10235_v51  ;;  %v10238_v59 = vpop.f32.mrb[34].mxu1  ;;  %10538 = vmatpush3.bf16.msra.mxu1 %v11542_v58  ;;  %10517 = vmatprep.subr.bf16.mxu0 %v11543_v61  ;;  %v11580_v49 = vld [vmem:[%s12112_s4 + $0x1030] sm:$0xff]   ;;  %v251_v55 = vld [vmem:[%s12126_s27 + $0x100] sm:$0xff] }
 0x251   : > { %v7558_v52 = vadd.f32 %v10215_v48, %v12652_v12  ;;  %v10239_v62 = vpop.f32.mrb[35].mxu1  ;;  %10539 = vmatprep.subr.bf16.mxu1 %v11545_v0  ;;  %v9021_v12 = vcombine.high %v250_v10, %v250_v10  ;;  %v11579_v48 = vld [vmem:[%s12112_s4 + $0x1070] sm:$0xff]   ;;  %v11585_v54 = vld [vmem:[%s12112_s4 + $0x10f8] sm:$0xff]   ;;  %v9022_v56 = vcombine.low %v251_v55, %v251_v55  ;;  %v11589_v59 = vld [vmem:[%s12112_s4 + $0x1140] sm:$0xff]  }
 0x252   : > { %v11582_v51 = vld [vmem:[%s12112_s4 + $0x10b0] sm:$0xff]   ;;  %v11588_v58 = vld [vmem:[%s12112_s4 + $0x10b8] sm:$0xff]   ;;  %v11593_v0 = vld [vmem:[%s12112_s4 + $0x11c0] sm:$0xff]  }
 0x253   : > { %v12688_v60 = vadd.f32 %v10237_v57, %v7558_v52  ;;  %10518 = vmatpush3.bf16.msra.mxu0 %v11544_v63  ;;  %8155 = vmatprep.mubr.bf16.mxu1 %v9021_v12  ;;  %v11583_v52 = vld [vmem:[%s12112_s4 + $0x1078] sm:$0xff]   ;;  %v9023_v57 = vcombine.high %v251_v55, %v251_v55  ;;  %v11592_v63 = vld [vmem:[%s12112_s4 + $0x1100] sm:$0xff]   ;;  %v11634_v55 = vld [vmem:[%s12112_s4 + $0x1288] sm:$0xff]  }
 0x254   : > { %10540 = vmatpush3.bf16.msra.mxu1 %v11546_v1  ;;  %10519 = vmatprep.subr.bf16.mxu0 %v11547_v2  ;;  %v11594_v1 = vld [vmem:[%s12112_s4 + $0x1180] sm:$0xff]   ;;  %v11595_v2 = vld [vmem:[%s12112_s4 + $0x1148] sm:$0xff]   ;;  %v11603_v10 = vld [vmem:[%s12112_s4 + $0x1158] sm:$0xff]  }
 0x255   : > { %10541 = vmatprep.subr.bf16.mxu1 %v11549_v4  ;;  %v11597_v4 = vld [vmem:[%s12112_s4 + $0x11c8] sm:$0xff]   ;;  %v11605_v12 = vld [vmem:[%s12112_s4 + $0x11d8] sm:$0xff]  }
 0x257   : > { %10520 = vmatpush3.bf16.msra.mxu0 %v11548_v3  ;;  %v11596_v3 = vld [vmem:[%s12112_s4 + $0x1108] sm:$0xff]  }
 0x258   : > { %10542 = vmatpush3.bf16.msra.mxu1 %v11552_v8  ;;  %10549 = vmatprep.subr.bf16.mxu0 %v11553_v9  ;;  %v11601_v8 = vld [vmem:[%s12112_s4 + $0x11d0] sm:$0xff]  }
 0x259   : > { %10571 = vmatprep.subr.bf16.mxu1 %v11557_v14  ;;  %v11602_v9 = vld [vmem:[%s12112_s4 + $0x1190] sm:$0xff]   ;;  %v11607_v14 = vld [vmem:[%s12112_s4 + $0x1160] sm:$0xff]  }
 0x25a   : > { %8116 = vmatmul.mubr.bf16.vlgmr.msra.gmra.mrb[60].mxu0 %v9018_v6  ;;  %v11599_v6 = vld [vmem:[%s12112_s4 + $0x1150] sm:$0xff]  }
 0x25b   : > { %10550 = vmatpush3.bf16.msra.mxu0 %v11556_v13  ;;  %8156 = vmatmul.mubr.bf16.vlgmr.msra.gmra.mrb[60].mxu1 %v9020_v11  ;;  %v11604_v11 = vld [vmem:[%s12112_s4 + $0x1118] sm:$0xff]  }
 0x25c   : > { %10572 = vmatpush3.bf16.msra.mxu1 %v11558_v15  ;;  %10551 = vmatprep.subr.bf16.mxu0 %v11559_v16  ;;  %v11606_v13 = vld [vmem:[%s12112_s4 + $0x1198] sm:$0xff]   ;;  %v11608_v15 = vld [vmem:[%s12112_s4 + $0x1120] sm:$0xff]  }
 0x25d   : > { %10573 = vmatprep.subr.bf16.mxu1 %v11561_v18  ;;  %8195 = vmatprep.mubr.bf16.mxu0 %v9023_v57  ;;  %v11636_v57 = vld [vmem:[%s12112_s4 + $0x1210] sm:$0xff]  }
 0x25f   : > { %10552 = vmatpush3.bf16.msra.mxu0 %v11560_v17  ;;  %v11609_v17 = vld [vmem:[%s12112_s4 + $0x11e0] sm:$0xff]  }
 0x260   : > { %10574 = vmatpush3.bf16.msra.mxu1 %v11562_v19  ;;  %10553 = vmatprep.subr.bf16.mxu0 %v11563_v20  ;;  %v11610_v19 = vld [vmem:[%s12112_s4 + $0x11a0] sm:$0xff]  }
 0x261   : > { %10575 = vmatprep.subr.bf16.mxu1 %v11565_v22  ;;  %v11611_v22 = vld [vmem:[%s12112_s4 + $0x1168] sm:$0xff]  }
 0x263   : > { %10554 = vmatpush3.bf16.msra.mxu0 %v11564_v21 }
 0x264   : > { %10576 = vmatpush3.bf16.msra.mxu1 %v11566_v23  ;;  %10555 = vmatprep.subr.bf16.mxu0 %v11567_v24 }
 0x265   : > { %10577 = vmatprep.subr.bf16.mxu1 %v11569_v26 }
 0x267   : > { %10556 = vmatpush3.bf16.msra.mxu0 %v11568_v25  ;;  %v11612_v25 = vld [vmem:[%s12112_s4 + $0x1128] sm:$0xff]  }
 0x268   : > { %10578 = vmatpush3.bf16.msra.mxu1 %v11570_v27  ;;  %10557 = vmatprep.subr.bf16.mxu0 %v11571_v28  ;;  %v11613_v28 = vld [vmem:[%s12112_s4 + $0x11e8] sm:$0xff]  }
 0x269   : > { %10579 = vmatprep.subr.bf16.mxu1 %v11573_v32  ;;  %v11615_v32 = vld [vmem:[%s12112_s4 + $0x1170] sm:$0xff]  }
 0x26b   : > { %10558 = vmatpush3.bf16.msra.mxu0 %v11572_v30  ;;  %v11614_v30 = vld [vmem:[%s12112_s4 + $0x11a8] sm:$0xff]  }
 0x26c   : > { %10580 = vmatpush3.bf16.msra.mxu1 %v11574_v35  ;;  %10559 = vmatprep.subr.bf16.mxu0 %v11575_v38  ;;  %v11616_v35 = vld [vmem:[%s12112_s4 + $0x1130] sm:$0xff]   ;;  %v11619_v38 = vld [vmem:[%s12112_s4 + $0x1178] sm:$0xff]  }
 0x26d   : > { %v10257_v29 = vpop.f32.mrb[36].mxu0  ;;  %10581 = vmatprep.subr.bf16.mxu1 %v11577_v43 }
 0x26e   : > { %v10258_v31 = vpop.f32.mrb[37].mxu0  ;;  %v10279_v36 = vpop.f32.mrb[36].mxu1 }
 0x26f   : > { %v10259_v33 = vadd.f32 %v10258_v31, %v10257_v29  ;;  %v10260_v34 = vpop.f32.mrb[38].mxu0  ;;  %v10280_v41 = vpop.f32.mrb[37].mxu1  ;;  %10560 = vmatpush3.bf16.msra.mxu0 %v11576_v40  ;;  %v11621_v40 = vld [vmem:[%s12112_s4 + $0x11f8] sm:$0xff]  }
 0x270   : > { %v10261_v39 = vpop.f32.mrb[39].mxu0  ;;  %v10281_v42 = vadd.f32 %v10280_v41, %v10279_v36  ;;  %v10282_v44 = vpop.f32.mrb[38].mxu1  ;;  %10582 = vmatpush3.bf16.msra.mxu1 %v11578_v45  ;;  %10561 = vmatprep.subr.bf16.mxu0 %v11579_v48  ;;  %v11617_v36 = vld [vmem:[%s12112_s4 + $0x11f0] sm:$0xff]   ;;  %v253_v41 = vld [vmem:[%s12126_s27 + $0x110] sm:$0xff]  ;;  %v11625_v45 = vld [vmem:[%s12112_s4 + $0x1240] sm:$0xff]  }
 0x271   : > { %v7638_v37 = vadd.f32 %v10259_v33, %v12688_v60  ;;  %v10283_v46 = vpop.f32.mrb[39].mxu1  ;;  %10583 = vmatprep.subr.bf16.mxu1 %v11581_v50  ;;  %v252_v60 = vld [vmem:[%s12126_s27 + $0x108] sm:$0xff]  ;;  %v11620_v39 = vld [vmem:[%s12112_s4 + $0x1138] sm:$0xff]   ;;  %v9027_v43 = vcombine.high %v253_v41, %v253_v41 }
 0x272   : > { %v9024_v61 = vcombine.low %v252_v60, %v252_v60  ;;  %v9025_v62 = vcombine.high %v252_v60, %v252_v60  ;;  %v11624_v44 = vld [vmem:[%s12112_s4 + $0x11b8] sm:$0xff]   ;;  %v254_v46 = vld [vmem:[%s12126_s27 + $0x118] sm:$0xff]  ;;  %v11629_v50 = vld [vmem:[%s12112_s4 + $0x12c0] sm:$0xff]  }
 0x273   : > { %v12725_v47 = vadd.f32 %v10281_v42, %v7638_v37  ;;  %10562 = vmatpush3.bf16.msra.mxu0 %v11580_v49  ;;  %v11618_v37 = vld [vmem:[%s12112_s4 + $0x11b0] sm:$0xff]   ;;  %v9026_v42 = vcombine.low %v253_v41, %v253_v41  ;;  %v9029_v48 = vcombine.high %v254_v46, %v254_v46  ;;  %v11628_v49 = vld [vmem:[%s12112_s4 + $0x1200] sm:$0xff]   ;;  %v11639_v60 = vld [vmem:[%s12112_s4 + $0x1258] sm:$0xff]  }
 0x274   : > { %10584 = vmatpush3.bf16.msra.mxu1 %v11582_v51  ;;  %10563 = vmatprep.subr.bf16.mxu0 %v11583_v52  ;;  %v11630_v51 = vld [vmem:[%s12112_s4 + $0x1280] sm:$0xff]   ;;  %v11631_v52 = vld [vmem:[%s12112_s4 + $0x1248] sm:$0xff]  }
 0x275   : > { %10585 = vmatprep.subr.bf16.mxu1 %v11585_v54  ;;  %8235 = vmatprep.mubr.bf16.mxu1 %v9025_v62  ;;  %v11633_v54 = vld [vmem:[%s12112_s4 + $0x12c8] sm:$0xff]   ;;  %v11641_v62 = vld [vmem:[%s12112_s4 + $0x12d8] sm:$0xff]  }
 0x276   : > { %v11670_v41 = vld [vmem:[%s12112_s4 + $0x1388] sm:$0xff]  }
 0x277   : > { %10564 = vmatpush3.bf16.msra.mxu0 %v11584_v53  ;;  %v11632_v53 = vld [vmem:[%s12112_s4 + $0x1208] sm:$0xff]  }
 0x278   : > { %10586 = vmatpush3.bf16.msra.mxu1 %v11588_v58  ;;  %10593 = vmatprep.subr.bf16.mxu0 %v11589_v59  ;;  %v11637_v58 = vld [vmem:[%s12112_s4 + $0x12d0] sm:$0xff]  }
 0x279   : > { %10615 = vmatprep.subr.bf16.mxu1 %v11593_v0  ;;  %v11638_v59 = vld [vmem:[%s12112_s4 + $0x1290] sm:$0xff]   ;;  %v11643_v0 = vld [vmem:[%s12112_s4 + $0x1260] sm:$0xff]  }
 0x27a   : > { %8196 = vmatmul.mubr.bf16.vlgmr.msra.gmra.mrb[64].mxu0 %v9022_v56  ;;  %v11635_v56 = vld [vmem:[%s12112_s4 + $0x1250] sm:$0xff]  }
 0x27b   : > { %10594 = vmatpush3.bf16.msra.mxu0 %v11592_v63  ;;  %8236 = vmatmul.mubr.bf16.vlgmr.msra.gmra.mrb[64].mxu1 %v9024_v61  ;;  %v11640_v61 = vld [vmem:[%s12112_s4 + $0x1218] sm:$0xff]  }
 0x27c   : > { %10616 = vmatpush3.bf16.msra.mxu1 %v11594_v1  ;;  %10595 = vmatprep.subr.bf16.mxu0 %v11595_v2  ;;  %v11642_v63 = vld [vmem:[%s12112_s4 + $0x1298] sm:$0xff]   ;;  %v11644_v1 = vld [vmem:[%s12112_s4 + $0x1220] sm:$0xff]  }
 0x27d   : > { %10617 = vmatprep.subr.bf16.mxu1 %v11597_v4  ;;  %8275 = vmatprep.mubr.bf16.mxu0 %v9027_v43  ;;  %v11672_v43 = vld [vmem:[%s12112_s4 + $0x1310] sm:$0xff]  }
 0x27e   : > { %8315 = vmatprep.mubr.bf16.mxu1 %v9029_v48  ;;  %v11677_v48 = vld [vmem:[%s12112_s4 + $0x13d8] sm:$0xff]  }
 0x27f   : > { %10596 = vmatpush3.bf16.msra.mxu0 %v11596_v3  ;;  %v11645_v3 = vld [vmem:[%s12112_s4 + $0x12e0] sm:$0xff]  }
 0x280   : > { %10618 = vmatpush3.bf16.msra.mxu1 %v11598_v5  ;;  %10597 = vmatprep.subr.bf16.mxu0 %v11599_v6  ;;  %v11646_v5 = vld [vmem:[%s12112_s4 + $0x12a0] sm:$0xff]  }
 0x281   : > { %10619 = vmatprep.subr.bf16.mxu1 %v11601_v8  ;;  %v11647_v8 = vld [vmem:[%s12112_s4 + $0x1268] sm:$0xff]  }
 0x283   : > { %10598 = vmatpush3.bf16.msra.mxu0 %v11600_v7 }
 0x284   : > { %10620 = vmatpush3.bf16.msra.mxu1 %v11602_v9  ;;  %10599 = vmatprep.subr.bf16.mxu0 %v11603_v10 }
 0x285   : > { %10621 = vmatprep.subr.bf16.mxu1 %v11605_v12 }
 0x287   : > { %10600 = vmatpush3.bf16.msra.mxu0 %v11604_v11  ;;  %v11648_v11 = vld [vmem:[%s12112_s4 + $0x1228] sm:$0xff]  }
 0x288   : > { %10622 = vmatpush3.bf16.msra.mxu1 %v11606_v13  ;;  %10601 = vmatprep.subr.bf16.mxu0 %v11607_v14  ;;  %v11649_v14 = vld [vmem:[%s12112_s4 + $0x12e8] sm:$0xff]  }
 0x289   : > { %10623 = vmatprep.subr.bf16.mxu1 %v11609_v17 }
 0x28b   : > { %10602 = vmatpush3.bf16.msra.mxu0 %v11608_v15 }
 0x28c   : > { %10624 = vmatpush3.bf16.msra.mxu1 %v11610_v19  ;;  %10603 = vmatprep.subr.bf16.mxu0 %v11611_v22  ;;  %v11651_v19 = vld [vmem:[%s12112_s4 + $0x1270] sm:$0xff]  }
 0x28d   : > { %v10301_v16 = vpop.f32.mrb[40].mxu0  ;;  %10625 = vmatprep.subr.bf16.mxu1 %v11613_v28  ;;  %v11653_v22 = vld [vmem:[%s12112_s4 + $0x12f0] sm:$0xff]  }
 0x28e   : > { %v10302_v18 = vpop.f32.mrb[41].mxu0  ;;  %v10323_v23 = vpop.f32.mrb[40].mxu1 }
 0x28f   : > { %v10303_v20 = vadd.f32 %v10302_v18, %v10301_v16  ;;  %v10304_v21 = vpop.f32.mrb[42].mxu0  ;;  %v10324_v27 = vpop.f32.mrb[41].mxu1  ;;  %10604 = vmatpush3.bf16.msra.mxu0 %v11612_v25  ;;  %v11650_v16 = vld [vmem:[%s12112_s4 + $0x12a8] sm:$0xff]   ;;  %v11656_v25 = vld [vmem:[%s12112_s4 + $0x1238] sm:$0xff]  }
 0x290   : > { %v10305_v26 = vpop.f32.mrb[43].mxu0  ;;  %v10325_v29 = vadd.f32 %v10324_v27, %v10323_v23  ;;  %v10326_v31 = vpop.f32.mrb[42].mxu1  ;;  %10626 = vmatpush3.bf16.msra.mxu1 %v11614_v30  ;;  %10605 = vmatprep.subr.bf16.mxu0 %v11615_v32  ;;  %v11652_v21 = vld [vmem:[%s12112_s4 + $0x1230] sm:$0xff]   ;;  %v255_v27 = vld [vmem:[%s12126_s27 + $0x120] sm:$0xff]  ;;  %v256_v32 = vld [vmem:[%s12126_s27 + $0x128] sm:$0xff] }
 0x291   : > { %v7718_v24 = vadd.f32 %v10303_v20, %v12725_v47  ;;  %v10327_v33 = vpop.f32.mrb[43].mxu1  ;;  %10627 = vmatprep.subr.bf16.mxu1 %v11617_v36  ;;  %v9028_v47 = vcombine.low %v254_v46, %v254_v46  ;;  %v11654_v23 = vld [vmem:[%s12112_s4 + $0x12b0] sm:$0xff]   ;;  %v11657_v26 = vld [vmem:[%s12112_s4 + $0x12f8] sm:$0xff]   ;;  %v9030_v28 = vcombine.low %v255_v27, %v255_v27  ;;  %v11661_v31 = vld [vmem:[%s12112_s4 + $0x1340] sm:$0xff]  }
 0x292   : > { %v11660_v30 = vld [vmem:[%s12112_s4 + $0x12b8] sm:$0xff]   ;;  %v9032_v33 = vcombine.low %v256_v32, %v256_v32  ;;  %v11665_v36 = vld [vmem:[%s12112_s4 + $0x13c0] sm:$0xff]  }
 0x293   : > { %v12763_v34 = vadd.f32 %v10325_v29, %v7718_v24  ;;  %10606 = vmatpush3.bf16.msra.mxu0 %v11616_v35  ;;  %v11655_v24 = vld [vmem:[%s12112_s4 + $0x1278] sm:$0xff]   ;;  %v9031_v29 = vcombine.high %v255_v27, %v255_v27  ;;  %v11664_v35 = vld [vmem:[%s12112_s4 + $0x1300] sm:$0xff]   ;;  %v11706_v27 = vld [vmem:[%s12112_s4 + $0x1488] sm:$0xff]  }
 0x294   : > { %10628 = vmatpush3.bf16.msra.mxu1 %v11618_v37  ;;  %10607 = vmatprep.subr.bf16.mxu0 %v11619_v38  ;;  %v11666_v37 = vld [vmem:[%s12112_s4 + $0x1380] sm:$0xff]   ;;  %v11667_v38 = vld [vmem:[%s12112_s4 + $0x1348] sm:$0xff]   ;;  %v11675_v46 = vld [vmem:[%s12112_s4 + $0x1358] sm:$0xff]  }
 0x295   : > { %10629 = vmatprep.subr.bf16.mxu1 %v11621_v40  ;;  %v11669_v40 = vld [vmem:[%s12112_s4 + $0x13c8] sm:$0xff]  }
 0x297   : > { %10608 = vmatpush3.bf16.msra.mxu0 %v11620_v39  ;;  %v11668_v39 = vld [vmem:[%s12112_s4 + $0x1308] sm:$0xff]  }
 0x298   : > { %10630 = vmatpush3.bf16.msra.mxu1 %v11624_v44  ;;  %10637 = vmatprep.subr.bf16.mxu0 %v11625_v45  ;;  %v11673_v44 = vld [vmem:[%s12112_s4 + $0x13d0] sm:$0xff]  }
 0x299   : > { %10659 = vmatprep.subr.bf16.mxu1 %v11629_v50  ;;  %v11674_v45 = vld [vmem:[%s12112_s4 + $0x1390] sm:$0xff]   ;;  %v11679_v50 = vld [vmem:[%s12112_s4 + $0x1360] sm:$0xff]  }
 0x29a   : > { %8276 = vmatmul.mubr.bf16.vlgmr.msra.gmra.mrb[68].mxu0 %v9026_v42  ;;  %v11671_v42 = vld [vmem:[%s12112_s4 + $0x1350] sm:$0xff]  }
 0x29b   : > { %10638 = vmatpush3.bf16.msra.mxu0 %v11628_v49  ;;  %8316 = vmatmul.mubr.bf16.vlgmr.msra.gmra.mrb[68].mxu1 %v9028_v47  ;;  %v11676_v47 = vld [vmem:[%s12112_s4 + $0x1318] sm:$0xff]  }
 0x29c   : > { %10660 = vmatpush3.bf16.msra.mxu1 %v11630_v51  ;;  %10639 = vmatprep.subr.bf16.mxu0 %v11631_v52  ;;  %v11678_v49 = vld [vmem:[%s12112_s4 + $0x1398] sm:$0xff]   ;;  %v11680_v52 = vld [vmem:[%s12112_s4 + $0x1320] sm:$0xff]  }
 0x29d   : > { %10661 = vmatprep.subr.bf16.mxu1 %v11633_v54  ;;  %8355 = vmatprep.mubr.bf16.mxu0 %v9031_v29  ;;  %v11681_v54 = vld [vmem:[%s12112_s4 + $0x13e0] sm:$0xff]   ;;  %v11708_v29 = vld [vmem:[%s12112_s4 + $0x1410] sm:$0xff]  }
 0x29f   : > { %10640 = vmatpush3.bf16.msra.mxu0 %v11632_v53 }
 0x2a0   : > { %10662 = vmatpush3.bf16.msra.mxu1 %v11634_v55  ;;  %10641 = vmatprep.subr.bf16.mxu0 %v11635_v56 }
 0x2a1   : > { %10663 = vmatprep.subr.bf16.mxu1 %v11637_v58 }
 0x2a3   : > { %10642 = vmatpush3.bf16.msra.mxu0 %v11636_v57  ;;  %v11682_v57 = vld [vmem:[%s12112_s4 + $0x13a0] sm:$0xff]  }
 0x2a4   : > { %10664 = vmatpush3.bf16.msra.mxu1 %v11638_v59  ;;  %10643 = vmatprep.subr.bf16.mxu0 %v11639_v60  ;;  %v11683_v60 = vld [vmem:[%s12112_s4 + $0x1368] sm:$0xff]  }
 0x2a5   : > { %10665 = vmatprep.subr.bf16.mxu1 %v11641_v62  ;;  %v11684_v62 = vld [vmem:[%s12112_s4 + $0x1328] sm:$0xff]  }
 0x2a7   : > { %10644 = vmatpush3.bf16.msra.mxu0 %v11640_v61 }
 0x2a8   : > { %10666 = vmatpush3.bf16.msra.mxu1 %v11642_v63  ;;  %10645 = vmatprep.subr.bf16.mxu0 %v11643_v0 }
 0x2a9   : > { %10667 = vmatprep.subr.bf16.mxu1 %v11645_v3  ;;  %v11686_v3 = vld [vmem:[%s12112_s4 + $0x13a8] sm:$0xff]  }
 0x2ab   : > { %10646 = vmatpush3.bf16.msra.mxu0 %v11644_v1  ;;  %v11685_v1 = vld [vmem:[%s12112_s4 + $0x13e8] sm:$0xff]  }
 0x2ac   : > { %10668 = vmatpush3.bf16.msra.mxu1 %v11646_v5  ;;  %10647 = vmatprep.subr.bf16.mxu0 %v11647_v8  ;;  %v11689_v8 = vld [vmem:[%s12112_s4 + $0x13f0] sm:$0xff]  }
 0x2ad   : > { %v10345_v2 = vpop.f32.mrb[44].mxu0  ;;  %10669 = vmatprep.subr.bf16.mxu1 %v11649_v14 }
 0x2ae   : > { %v10346_v4 = vpop.f32.mrb[45].mxu0  ;;  %v10367_v9 = vpop.f32.mrb[44].mxu1 }
 0x2af   : > { %v10347_v6 = vadd.f32 %v10346_v4, %v10345_v2  ;;  %v10348_v7 = vpop.f32.mrb[46].mxu0  ;;  %v10368_v13 = vpop.f32.mrb[45].mxu1  ;;  %10648 = vmatpush3.bf16.msra.mxu0 %v11648_v11  ;;  %v11692_v11 = vld [vmem:[%s12112_s4 + $0x1338] sm:$0xff]  }
 0x2b0   : > { %v10349_v12 = vpop.f32.mrb[47].mxu0  ;;  %v10369_v15 = vadd.f32 %v10368_v13, %v10367_v9  ;;  %v10370_v17 = vpop.f32.mrb[46].mxu1  ;;  %10670 = vmatpush3.bf16.msra.mxu1 %v11650_v16  ;;  %10649 = vmatprep.subr.bf16.mxu0 %v11651_v19  ;;  %v11688_v7 = vld [vmem:[%s12112_s4 + $0x1330] sm:$0xff]   ;;  %v257_v13 = vld [vmem:[%s12126_s27 + $0x130] sm:$0xff]  ;;  %v11696_v16 = vld [vmem:[%s12112_s4 + $0x13b8] sm:$0xff]  }
 0x2b1   : > { %v7798_v10 = vadd.f32 %v10347_v6, %v12763_v34  ;;  %v10371_v20 = vpop.f32.mrb[47].mxu1  ;;  %10671 = vmatprep.subr.bf16.mxu1 %v11653_v22  ;;  %v9033_v34 = vcombine.high %v256_v32, %v256_v32  ;;  %v11687_v6 = vld [vmem:[%s12112_s4 + $0x1370] sm:$0xff]   ;;  %v11693_v12 = vld [vmem:[%s12112_s4 + $0x13f8] sm:$0xff]   ;;  %v9034_v14 = vcombine.low %v257_v13, %v257_v13  ;;  %v11697_v17 = vld [vmem:[%s12112_s4 + $0x1440] sm:$0xff]  }
 0x2b2   : > { %v11690_v9 = vld [vmem:[%s12112_s4 + $0x13b0] sm:$0xff]   ;;  %v11701_v22 = vld [vmem:[%s12112_s4 + $0x14c0] sm:$0xff]   ;;  %v11711_v32 = vld [vmem:[%s12112_s4 + $0x1458] sm:$0xff]  }
 0x2b3   : > { %v12799_v18 = vadd.f32 %v10369_v15, %v7798_v10  ;;  %10650 = vmatpush3.bf16.msra.mxu0 %v11652_v21  ;;  %8395 = vmatprep.mubr.bf16.mxu1 %v9033_v34  ;;  %v11691_v10 = vld [vmem:[%s12112_s4 + $0x1378] sm:$0xff]   ;;  %v9035_v15 = vcombine.high %v257_v13, %v257_v13  ;;  %v11700_v21 = vld [vmem:[%s12112_s4 + $0x1400] sm:$0xff]   ;;  %v11742_v13 = vld [vmem:[%s12112_s4 + $0x1588] sm:$0xff]  }
 0x2b4   : > { %10672 = vmatpush3.bf16.msra.mxu1 %v11654_v23  ;;  %10651 = vmatprep.subr.bf16.mxu0 %v11655_v24  ;;  %v11702_v23 = vld [vmem:[%s12112_s4 + $0x1480] sm:$0xff]   ;;  %v11703_v24 = vld [vmem:[%s12112_s4 + $0x1448] sm:$0xff]   ;;  %v11713_v34 = vld [vmem:[%s12112_s4 + $0x14d8] sm:$0xff]  }
 0x2b5   : > { %10673 = vmatprep.subr.bf16.mxu1 %v11657_v26  ;;  %v11705_v26 = vld [vmem:[%s12112_s4 + $0x14c8] sm:$0xff]  }
 0x2b7   : > { %10652 = vmatpush3.bf16.msra.mxu0 %v11656_v25  ;;  %v11704_v25 = vld [vmem:[%s12112_s4 + $0x1408] sm:$0xff]  }
 0x2b8   : > { %10674 = vmatpush3.bf16.msra.mxu1 %v11660_v30  ;;  %10681 = vmatprep.subr.bf16.mxu0 %v11661_v31  ;;  %v11709_v30 = vld [vmem:[%s12112_s4 + $0x14d0] sm:$0xff]  }
 0x2b9   : > { %10703 = vmatprep.subr.bf16.mxu1 %v11665_v36  ;;  %v11710_v31 = vld [vmem:[%s12112_s4 + $0x1490] sm:$0xff]   ;;  %v11715_v36 = vld [vmem:[%s12112_s4 + $0x1460] sm:$0xff]  }
 0x2ba   : > { %8356 = vmatmul.mubr.bf16.vlgmr.msra.gmra.mrb[72].mxu0 %v9030_v28  ;;  %v11707_v28 = vld [vmem:[%s12112_s4 + $0x1450] sm:$0xff]  }
 0x2bb   : > { %10682 = vmatpush3.bf16.msra.mxu0 %v11664_v35  ;;  %8396 = vmatmul.mubr.bf16.vlgmr.msra.gmra.mrb[72].mxu1 %v9032_v33  ;;  %v11712_v33 = vld [vmem:[%s12112_s4 + $0x1418] sm:$0xff]  }
 0x2bc   : > { %10704 = vmatpush3.bf16.msra.mxu1 %v11666_v37  ;;  %10683 = vmatprep.subr.bf16.mxu0 %v11667_v38  ;;  %v11714_v35 = vld [vmem:[%s12112_s4 + $0x1498] sm:$0xff]   ;;  %v11716_v37 = vld [vmem:[%s12112_s4 + $0x1420] sm:$0xff]  }
 0x2bd   : > { %10705 = vmatprep.subr.bf16.mxu1 %v11669_v40  ;;  %8435 = vmatprep.mubr.bf16.mxu0 %v9035_v15  ;;  %v11744_v15 = vld [vmem:[%s12112_s4 + $0x1510] sm:$0xff]  }
 0x2bf   : > { %10684 = vmatpush3.bf16.msra.mxu0 %v11668_v39  ;;  %v11717_v39 = vld [vmem:[%s12112_s4 + $0x14e0] sm:$0xff]  }
 0x2c0   : > { %10706 = vmatpush3.bf16.msra.mxu1 %v11670_v41  ;;  %10685 = vmatprep.subr.bf16.mxu0 %v11671_v42  ;;  %v11718_v41 = vld [vmem:[%s12112_s4 + $0x14a0] sm:$0xff]  }
 0x2c1   : > { %10707 = vmatprep.subr.bf16.mxu1 %v11673_v44  ;;  %v11719_v44 = vld [vmem:[%s12112_s4 + $0x1468] sm:$0xff]  }
 0x2c3   : > { %10686 = vmatpush3.bf16.msra.mxu0 %v11672_v43 }
 0x2c4   : > { %10708 = vmatpush3.bf16.msra.mxu1 %v11674_v45  ;;  %10687 = vmatprep.subr.bf16.mxu0 %v11675_v46 }
 0x2c5   : > { %10709 = vmatprep.subr.bf16.mxu1 %v11677_v48 }
 0x2c7   : > { %10688 = vmatpush3.bf16.msra.mxu0 %v11676_v47  ;;  %v11720_v47 = vld [vmem:[%s12112_s4 + $0x1428] sm:$0xff]  }
 0x2c8   : > { %10710 = vmatpush3.bf16.msra.mxu1 %v11678_v49  ;;  %10689 = vmatprep.subr.bf16.mxu0 %v11679_v50  ;;  %v11721_v50 = vld [vmem:[%s12112_s4 + $0x14e8] sm:$0xff]  }
 0x2c9   : > { %10711 = vmatprep.subr.bf16.mxu1 %v11681_v54  ;;  %v11723_v54 = vld [vmem:[%s12112_s4 + $0x1470] sm:$0xff]  }
 0x2cb   : > { %10690 = vmatpush3.bf16.msra.mxu0 %v11680_v52  ;;  %v11722_v52 = vld [vmem:[%s12112_s4 + $0x14a8] sm:$0xff]  }
 0x2cc   : > { %10712 = vmatpush3.bf16.msra.mxu1 %v11682_v57  ;;  %10691 = vmatprep.subr.bf16.mxu0 %v11683_v60  ;;  %v11724_v57 = vld [vmem:[%s12112_s4 + $0x1430] sm:$0xff]   ;;  %v11727_v60 = vld [vmem:[%s12112_s4 + $0x1478] sm:$0xff]  }
 0x2cd   : > { %v10389_v51 = vpop.f32.mrb[48].mxu0  ;;  %10713 = vmatprep.subr.bf16.mxu1 %v11685_v1 }
 0x2ce   : > { %v10390_v53 = vpop.f32.mrb[49].mxu0  ;;  %v10411_v58 = vpop.f32.mrb[48].mxu1 }
 0x2cf   : > { %v10391_v55 = vadd.f32 %v10390_v53, %v10389_v51  ;;  %v10392_v56 = vpop.f32.mrb[50].mxu0  ;;  %v10412_v63 = vpop.f32.mrb[49].mxu1  ;;  %10692 = vmatpush3.bf16.msra.mxu0 %v11684_v62  ;;  %v11729_v62 = vld [vmem:[%s12112_s4 + $0x14f8] sm:$0xff]  }
 0x2d0   : > { %v10393_v61 = vpop.f32.mrb[51].mxu0  ;;  %v10413_v0 = vadd.f32 %v10412_v63, %v10411_v58  ;;  %v10414_v2 = vpop.f32.mrb[50].mxu1  ;;  %10714 = vmatpush3.bf16.msra.mxu1 %v11686_v3  ;;  %10693 = vmatprep.subr.bf16.mxu0 %v11687_v6  ;;  %v11725_v58 = vld [vmem:[%s12112_s4 + $0x14f0] sm:$0xff]   ;;  %v259_v63 = vld [vmem:[%s12126_s27 + $0x140] sm:$0xff]  ;;  %v11733_v3 = vld [vmem:[%s12112_s4 + $0x1540] sm:$0xff]  }
 0x2d1   : > { %v7878_v59 = vadd.f32 %v10391_v55, %v12799_v18  ;;  %v10415_v4 = vpop.f32.mrb[51].mxu1  ;;  %10715 = vmatprep.subr.bf16.mxu1 %v11689_v8  ;;  %v258_v18 = vld [vmem:[%s12126_s27 + $0x138] sm:$0xff]  ;;  %v11728_v61 = vld [vmem:[%s12112_s4 + $0x1438] sm:$0xff]   ;;  %v9039_v1 = vcombine.high %v259_v63, %v259_v63  ;;  %v11737_v8 = vld [vmem:[%s12112_s4 + $0x15c0] sm:$0xff]  }
 0x2d2   : > { %v9036_v19 = vcombine.low %v258_v18, %v258_v18  ;;  %v9037_v20 = vcombine.high %v258_v18, %v258_v18  ;;  %v11732_v2 = vld [vmem:[%s12112_s4 + $0x14b8] sm:$0xff]   ;;  %v260_v4 = vld [vmem:[%s12126_s27 + $0x148] sm:$0xff] }
 0x2d3   : > { %v12836_v5 = vadd.f32 %v10413_v0, %v7878_v59  ;;  %10694 = vmatpush3.bf16.msra.mxu0 %v11688_v7  ;;  %v11726_v59 = vld [vmem:[%s12112_s4 + $0x14b0] sm:$0xff]   ;;  %v9038_v0 = vcombine.low %v259_v63, %v259_v63  ;;  %v9041_v6 = vcombine.high %v260_v4, %v260_v4  ;;  %v11736_v7 = vld [vmem:[%s12112_s4 + $0x1500] sm:$0xff]   ;;  %v11747_v18 = vld [vmem:[%s12112_s4 + $0x1558] sm:$0xff]  }
 0x2d4   : > { %10716 = vmatpush3.bf16.msra.mxu1 %v11690_v9  ;;  %10695 = vmatprep.subr.bf16.mxu0 %v11691_v10  ;;  %v11738_v9 = vld [vmem:[%s12112_s4 + $0x1580] sm:$0xff]   ;;  %v11739_v10 = vld [vmem:[%s12112_s4 + $0x1548] sm:$0xff]  }
 0x2d5   : > { %10717 = vmatprep.subr.bf16.mxu1 %v11693_v12  ;;  %8475 = vmatprep.mubr.bf16.mxu1 %v9037_v20  ;;  %v11741_v12 = vld [vmem:[%s12112_s4 + $0x15c8] sm:$0xff]   ;;  %v11749_v20 = vld [vmem:[%s12112_s4 + $0x15d8] sm:$0xff]  }
 0x2d6   : > { %v11778_v63 = vld [vmem:[%s12112_s4 + $0x1688] sm:$0xff]  }
 0x2d7   : > { %10696 = vmatpush3.bf16.msra.mxu0 %v11692_v11  ;;  %v11740_v11 = vld [vmem:[%s12112_s4 + $0x1508] sm:$0xff]  }
 0x2d8   : > { %10718 = vmatpush3.bf16.msra.mxu1 %v11696_v16  ;;  %10725 = vmatprep.subr.bf16.mxu0 %v11697_v17  ;;  %v11745_v16 = vld [vmem:[%s12112_s4 + $0x15d0] sm:$0xff]  }
 0x2d9   : > { %10747 = vmatprep.subr.bf16.mxu1 %v11701_v22  ;;  %v11746_v17 = vld [vmem:[%s12112_s4 + $0x1590] sm:$0xff]   ;;  %v11751_v22 = vld [vmem:[%s12112_s4 + $0x1560] sm:$0xff]  }
 0x2da   : > { %8436 = vmatmul.mubr.bf16.vlgmr.msra.gmra.mrb[76].mxu0 %v9034_v14  ;;  %v11743_v14 = vld [vmem:[%s12112_s4 + $0x1550] sm:$0xff]  }
 0x2db   : > { %10726 = vmatpush3.bf16.msra.mxu0 %v11700_v21  ;;  %8476 = vmatmul.mubr.bf16.vlgmr.msra.gmra.mrb[76].mxu1 %v9036_v19  ;;  %v11748_v19 = vld [vmem:[%s12112_s4 + $0x1518] sm:$0xff]  }
 0x2dc   : > { %10748 = vmatpush3.bf16.msra.mxu1 %v11702_v23  ;;  %10727 = vmatprep.subr.bf16.mxu0 %v11703_v24  ;;  %v11750_v21 = vld [vmem:[%s12112_s4 + $0x1598] sm:$0xff]   ;;  %v11752_v23 = vld [vmem:[%s12112_s4 + $0x1520] sm:$0xff]  }
 0x2dd   : > { %10749 = vmatprep.subr.bf16.mxu1 %v11705_v26  ;;  %8515 = vmatprep.mubr.bf16.mxu0 %v9039_v1  ;;  %v11780_v1 = vld [vmem:[%s12112_s4 + $0x1610] sm:$0xff]  }
 0x2de   : > { %8555 = vmatprep.mubr.bf16.mxu1 %v9041_v6  ;;  %v11785_v6 = vld [vmem:[%s12112_s4 + $0x16d8] sm:$0xff]  }
 0x2df   : > { %10728 = vmatpush3.bf16.msra.mxu0 %v11704_v25  ;;  %v11753_v25 = vld [vmem:[%s12112_s4 + $0x15e0] sm:$0xff]  }
 0x2e0   : > { %10750 = vmatpush3.bf16.msra.mxu1 %v11706_v27  ;;  %10729 = vmatprep.subr.bf16.mxu0 %v11707_v28  ;;  %v11754_v27 = vld [vmem:[%s12112_s4 + $0x15a0] sm:$0xff]  }
 0x2e1   : > { %10751 = vmatprep.subr.bf16.mxu1 %v11709_v30  ;;  %v11755_v30 = vld [vmem:[%s12112_s4 + $0x1568] sm:$0xff]  }
 0x2e3   : > { %10730 = vmatpush3.bf16.msra.mxu0 %v11708_v29 }
 0x2e4   : > { %10752 = vmatpush3.bf16.msra.mxu1 %v11710_v31  ;;  %10731 = vmatprep.subr.bf16.mxu0 %v11711_v32 }
 0x2e5   : > { %10753 = vmatprep.subr.bf16.mxu1 %v11713_v34 }
 0x2e7   : > { %10732 = vmatpush3.bf16.msra.mxu0 %v11712_v33  ;;  %v11756_v33 = vld [vmem:[%s12112_s4 + $0x1528] sm:$0xff]  }
 0x2e8   : > { %10754 = vmatpush3.bf16.msra.mxu1 %v11714_v35  ;;  %10733 = vmatprep.subr.bf16.mxu0 %v11715_v36  ;;  %v11757_v36 = vld [vmem:[%s12112_s4 + $0x15e8] sm:$0xff]  }
 0x2e9   : > { %10755 = vmatprep.subr.bf16.mxu1 %v11717_v39 }
 0x2eb   : > { %10734 = vmatpush3.bf16.msra.mxu0 %v11716_v37 }
 0x2ec   : > { %10756 = vmatpush3.bf16.msra.mxu1 %v11718_v41  ;;  %10735 = vmatprep.subr.bf16.mxu0 %v11719_v44  ;;  %v11759_v41 = vld [vmem:[%s12112_s4 + $0x1570] sm:$0xff]  }
 0x2ed   : > { %v10433_v38 = vpop.f32.mrb[52].mxu0  ;;  %10757 = vmatprep.subr.bf16.mxu1 %v11721_v50  ;;  %v11761_v44 = vld [vmem:[%s12112_s4 + $0x15f0] sm:$0xff]  }
 0x2ee   : > { %v10434_v40 = vpop.f32.mrb[53].mxu0  ;;  %v10455_v45 = vpop.f32.mrb[52].mxu1 }
 0x2ef   : > { %v10435_v42 = vadd.f32 %v10434_v40, %v10433_v38  ;;  %v10436_v43 = vpop.f32.mrb[54].mxu0  ;;  %v10456_v49 = vpop.f32.mrb[53].mxu1  ;;  %10736 = vmatpush3.bf16.msra.mxu0 %v11720_v47  ;;  %v11758_v38 = vld [vmem:[%s12112_s4 + $0x15a8] sm:$0xff]   ;;  %v11764_v47 = vld [vmem:[%s12112_s4 + $0x1538] sm:$0xff]  }
 0x2f0   : > { %v10437_v48 = vpop.f32.mrb[55].mxu0  ;;  %v10457_v51 = vadd.f32 %v10456_v49, %v10455_v45  ;;  %v10458_v53 = vpop.f32.mrb[54].mxu1  ;;  %10758 = vmatpush3.bf16.msra.mxu1 %v11722_v52  ;;  %10737 = vmatprep.subr.bf16.mxu0 %v11723_v54  ;;  %v11760_v43 = vld [vmem:[%s12112_s4 + $0x1530] sm:$0xff]   ;;  %v261_v49 = vld [vmem:[%s12126_s27 + $0x150] sm:$0xff]  ;;  %v11768_v52 = vld [vmem:[%s12112_s4 + $0x15b8] sm:$0xff]  }
 0x2f1   : > { %v7958_v46 = vadd.f32 %v10435_v42, %v12836_v5  ;;  %v10459_v55 = vpop.f32.mrb[55].mxu1  ;;  %10759 = vmatprep.subr.bf16.mxu1 %v11725_v58  ;;  %v9040_v5 = vcombine.low %v260_v4, %v260_v4  ;;  %v11762_v45 = vld [vmem:[%s12112_s4 + $0x15b0] sm:$0xff]   ;;  %v11765_v48 = vld [vmem:[%s12112_s4 + $0x15f8] sm:$0xff]   ;;  %v9042_v50 = vcombine.low %v261_v49, %v261_v49  ;;  %v11769_v53 = vld [vmem:[%s12112_s4 + $0x1640] sm:$0xff]  }
 0x2f2   : > { %v262_v54 = vld [vmem:[%s12126_s27 + $0x158] sm:$0xff]  ;;  %v11773_v58 = vld [vmem:[%s12112_s4 + $0x16c0] sm:$0xff]   ;;  %v11783_v4 = vld [vmem:[%s12112_s4 + $0x1658] sm:$0xff]  }
 0x2f3   : > { %v12874_v56 = vadd.f32 %v10457_v51, %v7958_v46  ;;  %10738 = vmatpush3.bf16.msra.mxu0 %v11724_v57  ;;  %v11763_v46 = vld [vmem:[%s12112_s4 + $0x1578] sm:$0xff]   ;;  %v9043_v51 = vcombine.high %v261_v49, %v261_v49  ;;  %v9044_v55 = vcombine.low %v262_v54, %v262_v54  ;;  %v11772_v57 = vld [vmem:[%s12112_s4 + $0x1600] sm:$0xff]   ;;  %v11814_v49 = vld [vmem:[%s12112_s4 + $0x1788] sm:$0xff]  }
 0x2f4   : > { %10760 = vmatpush3.bf16.msra.mxu1 %v11726_v59  ;;  %10739 = vmatprep.subr.bf16.mxu0 %v11727_v60  ;;  %v11774_v59 = vld [vmem:[%s12112_s4 + $0x1680] sm:$0xff]   ;;  %v11775_v60 = vld [vmem:[%s12112_s4 + $0x1648] sm:$0xff]  }
 0x2f5   : > { %10761 = vmatprep.subr.bf16.mxu1 %v11729_v62  ;;  %v11777_v62 = vld [vmem:[%s12112_s4 + $0x16c8] sm:$0xff]  }
 0x2f7   : > { %10740 = vmatpush3.bf16.msra.mxu0 %v11728_v61  ;;  %v11776_v61 = vld [vmem:[%s12112_s4 + $0x1608] sm:$0xff]  }
 0x2f8   : > { %10762 = vmatpush3.bf16.msra.mxu1 %v11732_v2  ;;  %10769 = vmatprep.subr.bf16.mxu0 %v11733_v3  ;;  %v11781_v2 = vld [vmem:[%s12112_s4 + $0x16d0] sm:$0xff]  }
 0x2f9   : > { %10791 = vmatprep.subr.bf16.mxu1 %v11737_v8  ;;  %v11782_v3 = vld [vmem:[%s12112_s4 + $0x1690] sm:$0xff]   ;;  %v11787_v8 = vld [vmem:[%s12112_s4 + $0x1660] sm:$0xff]  }
 0x2fa   : > { %8516 = vmatmul.mubr.bf16.vlgmr.msra.gmra.mrb[80].mxu0 %v9038_v0  ;;  %v11779_v0 = vld [vmem:[%s12112_s4 + $0x1650] sm:$0xff]  }
 0x2fb   : > { %10770 = vmatpush3.bf16.msra.mxu0 %v11736_v7  ;;  %8556 = vmatmul.mubr.bf16.vlgmr.msra.gmra.mrb[80].mxu1 %v9040_v5  ;;  %v11784_v5 = vld [vmem:[%s12112_s4 + $0x1618] sm:$0xff]  }
 0x2fc   : > { %10792 = vmatpush3.bf16.msra.mxu1 %v11738_v9  ;;  %10771 = vmatprep.subr.bf16.mxu0 %v11739_v10  ;;  %v11786_v7 = vld [vmem:[%s12112_s4 + $0x1698] sm:$0xff]   ;;  %v11788_v10 = vld [vmem:[%s12112_s4 + $0x1620] sm:$0xff]  }
 0x2fd   : > { %10793 = vmatprep.subr.bf16.mxu1 %v11741_v12  ;;  %8595 = vmatprep.mubr.bf16.mxu0 %v9043_v51  ;;  %v11789_v12 = vld [vmem:[%s12112_s4 + $0x16e0] sm:$0xff]   ;;  %v11816_v51 = vld [vmem:[%s12112_s4 + $0x1710] sm:$0xff]  }
 0x2ff   : > { %10772 = vmatpush3.bf16.msra.mxu0 %v11740_v11 }
 0x300   : > { %10794 = vmatpush3.bf16.msra.mxu1 %v11742_v13  ;;  %10773 = vmatprep.subr.bf16.mxu0 %v11743_v14 }
 0x301   : > { %10795 = vmatprep.subr.bf16.mxu1 %v11745_v16 }
 0x303   : > { %10774 = vmatpush3.bf16.msra.mxu0 %v11744_v15  ;;  %v11790_v15 = vld [vmem:[%s12112_s4 + $0x16a0] sm:$0xff]  }
 0x304   : > { %10796 = vmatpush3.bf16.msra.mxu1 %v11746_v17  ;;  %10775 = vmatprep.subr.bf16.mxu0 %v11747_v18  ;;  %v11791_v18 = vld [vmem:[%s12112_s4 + $0x1668] sm:$0xff]  }
 0x305   : > { %10797 = vmatprep.subr.bf16.mxu1 %v11749_v20  ;;  %v11792_v20 = vld [vmem:[%s12112_s4 + $0x1628] sm:$0xff]  }
 0x307   : > { %10776 = vmatpush3.bf16.msra.mxu0 %v11748_v19 }
 0x308   : > { %10798 = vmatpush3.bf16.msra.mxu1 %v11750_v21  ;;  %10777 = vmatprep.subr.bf16.mxu0 %v11751_v22 }
 0x309   : > { %10799 = vmatprep.subr.bf16.mxu1 %v11753_v25  ;;  %v11794_v25 = vld [vmem:[%s12112_s4 + $0x16a8] sm:$0xff]  }
 0x30b   : > { %10778 = vmatpush3.bf16.msra.mxu0 %v11752_v23  ;;  %v11793_v23 = vld [vmem:[%s12112_s4 + $0x16e8] sm:$0xff]  }
 0x30c   : > { %10800 = vmatpush3.bf16.msra.mxu1 %v11754_v27  ;;  %10779 = vmatprep.subr.bf16.mxu0 %v11755_v30  ;;  %v11797_v30 = vld [vmem:[%s12112_s4 + $0x16f0] sm:$0xff]  }
 0x30d   : > { %v10477_v24 = vpop.f32.mrb[56].mxu0  ;;  %10801 = vmatprep.subr.bf16.mxu1 %v11757_v36 }
 0x30e   : > { %v10478_v26 = vpop.f32.mrb[57].mxu0  ;;  %v10499_v31 = vpop.f32.mrb[56].mxu1 }
 0x30f   : > { %v10479_v28 = vadd.f32 %v10478_v26, %v10477_v24  ;;  %v10480_v29 = vpop.f32.mrb[58].mxu0  ;;  %v10500_v35 = vpop.f32.mrb[57].mxu1  ;;  %10780 = vmatpush3.bf16.msra.mxu0 %v11756_v33  ;;  %v11800_v33 = vld [vmem:[%s12112_s4 + $0x1638] sm:$0xff]  }
 0x310   : > { %v10481_v34 = vpop.f32.mrb[59].mxu0  ;;  %v10501_v37 = vadd.f32 %v10500_v35, %v10499_v31  ;;  %v10502_v39 = vpop.f32.mrb[58].mxu1  ;;  %10802 = vmatpush3.bf16.msra.mxu1 %v11758_v38  ;;  %10781 = vmatprep.subr.bf16.mxu0 %v11759_v41  ;;  %v11796_v29 = vld [vmem:[%s12112_s4 + $0x1630] sm:$0xff]   ;;  %v263_v35 = vld [vmem:[%s12126_s27 + $0x160] sm:$0xff] }
 0x311   : > { %v8038_v32 = vadd.f32 %v10479_v28, %v12874_v56  ;;  %v10503_v42 = vpop.f32.mrb[59].mxu1  ;;  %10803 = vmatprep.subr.bf16.mxu1 %v11761_v44  ;;  %v9045_v56 = vcombine.high %v262_v54, %v262_v54  ;;  %v11795_v28 = vld [vmem:[%s12112_s4 + $0x1670] sm:$0xff]   ;;  %v11801_v34 = vld [vmem:[%s12112_s4 + $0x16f8] sm:$0xff]   ;;  %v9046_v36 = vcombine.low %v263_v35, %v263_v35  ;;  %v11805_v39 = vld [vmem:[%s12112_s4 + $0x1740] sm:$0xff]  }
 0x312   : > { %v11798_v31 = vld [vmem:[%s12112_s4 + $0x16b0] sm:$0xff]   ;;  %v11804_v38 = vld [vmem:[%s12112_s4 + $0x16b8] sm:$0xff]   ;;  %v11809_v44 = vld [vmem:[%s12112_s4 + $0x17c0] sm:$0xff]  }
 0x313   : > { %v12910_v40 = vadd.f32 %v10501_v37, %v8038_v32  ;;  %10782 = vmatpush3.bf16.msra.mxu0 %v11760_v43  ;;  %8635 = vmatprep.mubr.bf16.mxu1 %v9045_v56  ;;  %v11799_v32 = vld [vmem:[%s12112_s4 + $0x1678] sm:$0xff]   ;;  %v9047_v37 = vcombine.high %v263_v35, %v263_v35  ;;  %v11808_v43 = vld [vmem:[%s12112_s4 + $0x1700] sm:$0xff]  }
 0x314   : > { %10804 = vmatpush3.bf16.msra.mxu1 %v11762_v45  ;;  %10783 = vmatprep.subr.bf16.mxu0 %v11763_v46  ;;  %v11810_v45 = vld [vmem:[%s12112_s4 + $0x1780] sm:$0xff]   ;;  %v11811_v46 = vld [vmem:[%s12112_s4 + $0x1748] sm:$0xff]   ;;  %v11819_v54 = vld [vmem:[%s12112_s4 + $0x1758] sm:$0xff]  }
 0x315   : > { %10805 = vmatprep.subr.bf16.mxu1 %v11765_v48  ;;  %v11813_v48 = vld [vmem:[%s12112_s4 + $0x17c8] sm:$0xff]   ;;  %v11821_v56 = vld [vmem:[%s12112_s4 + $0x17d8] sm:$0xff]  }
 0x316   : > { %v11850_v35 = vld [vmem:[%s12112_s4 + $0x1818] sm:$0xff]  }
 0x317   : > { %10784 = vmatpush3.bf16.msra.mxu0 %v11764_v47  ;;  %v11812_v47 = vld [vmem:[%s12112_s4 + $0x1708] sm:$0xff]  }
 0x318   : > { %10806 = vmatpush3.bf16.msra.mxu1 %v11768_v52  ;;  %10813 = vmatprep.subr.bf16.mxu0 %v11769_v53  ;;  %v11817_v52 = vld [vmem:[%s12112_s4 + $0x17d0] sm:$0xff]  }
 0x319   : > { %10835 = vmatprep.subr.bf16.mxu1 %v11773_v58  ;;  %v11818_v53 = vld [vmem:[%s12112_s4 + $0x1790] sm:$0xff]   ;;  %v11823_v58 = vld [vmem:[%s12112_s4 + $0x1760] sm:$0xff]  }
 0x31a   : > { %8596 = vmatmul.mubr.bf16.vlgmr.msra.gmra.mrb[84].mxu0 %v9042_v50  ;;  %v11815_v50 = vld [vmem:[%s12112_s4 + $0x1750] sm:$0xff]  }
 0x31b   : > { %10814 = vmatpush3.bf16.msra.mxu0 %v11772_v57  ;;  %8636 = vmatmul.mubr.bf16.vlgmr.msra.gmra.mrb[84].mxu1 %v9044_v55  ;;  %v11820_v55 = vld [vmem:[%s12112_s4 + $0x1718] sm:$0xff]  }
 0x31c   : > { %10836 = vmatpush3.bf16.msra.mxu1 %v11774_v59  ;;  %10815 = vmatprep.subr.bf16.mxu0 %v11775_v60  ;;  %v11822_v57 = vld [vmem:[%s12112_s4 + $0x1798] sm:$0xff]   ;;  %v11824_v59 = vld [vmem:[%s12112_s4 + $0x1720] sm:$0xff]  }
 0x31d   : > { %10837 = vmatprep.subr.bf16.mxu1 %v11777_v62  ;;  %8675 = vmatprep.mubr.bf16.mxu0 %v9047_v37  ;;  %v11852_v37 = vld [vmem:[%s12112_s4 + $0x1820] sm:$0xff]  }
 0x31f   : > { %10816 = vmatpush3.bf16.msra.mxu0 %v11776_v61  ;;  %v11825_v61 = vld [vmem:[%s12112_s4 + $0x17e0] sm:$0xff]  }
 0x320   : > { %10838 = vmatpush3.bf16.msra.mxu1 %v11778_v63  ;;  %10817 = vmatprep.subr.bf16.mxu0 %v11779_v0  ;;  %v11826_v63 = vld [vmem:[%s12112_s4 + $0x17a0] sm:$0xff]  }
 0x321   : > { %10839 = vmatprep.subr.bf16.mxu1 %v11781_v2  ;;  %v11827_v2 = vld [vmem:[%s12112_s4 + $0x1768] sm:$0xff]  }
 0x323   : > { %10818 = vmatpush3.bf16.msra.mxu0 %v11780_v1 }
 0x324   : > { %10840 = vmatpush3.bf16.msra.mxu1 %v11782_v3  ;;  %10819 = vmatprep.subr.bf16.mxu0 %v11783_v4 }
 0x325   : > { %10841 = vmatprep.subr.bf16.mxu1 %v11785_v6 }
 0x327   : > { %10820 = vmatpush3.bf16.msra.mxu0 %v11784_v5  ;;  %v11828_v5 = vld [vmem:[%s12112_s4 + $0x1728] sm:$0xff]  }
 0x328   : > { %10842 = vmatpush3.bf16.msra.mxu1 %v11786_v7  ;;  %10821 = vmatprep.subr.bf16.mxu0 %v11787_v8  ;;  %v11829_v8 = vld [vmem:[%s12112_s4 + $0x17e8] sm:$0xff]  }
 0x329   : > { %10843 = vmatprep.subr.bf16.mxu1 %v11789_v12  ;;  %v11831_v12 = vld [vmem:[%s12112_s4 + $0x1770] sm:$0xff]  }
 0x32b   : > { %10822 = vmatpush3.bf16.msra.mxu0 %v11788_v10  ;;  %v11830_v10 = vld [vmem:[%s12112_s4 + $0x17a8] sm:$0xff]  }
 0x32c   : > { %10844 = vmatpush3.bf16.msra.mxu1 %v11790_v15  ;;  %10823 = vmatprep.subr.bf16.mxu0 %v11791_v18  ;;  %v11832_v15 = vld [vmem:[%s12112_s4 + $0x1730] sm:$0xff]   ;;  %v11835_v18 = vld [vmem:[%s12112_s4 + $0x1778] sm:$0xff]  }
 0x32d   : > { %v10521_v9 = vpop.f32.mrb[60].mxu0  ;;  %10845 = vmatprep.subr.bf16.mxu1 %v11793_v23 }
 0x32e   : > { %v10522_v11 = vpop.f32.mrb[61].mxu0  ;;  %v10543_v16 = vpop.f32.mrb[60].mxu1 }
 0x32f   : > { %v10523_v13 = vadd.f32 %v10522_v11, %v10521_v9  ;;  %v10524_v14 = vpop.f32.mrb[62].mxu0  ;;  %v10544_v21 = vpop.f32.mrb[61].mxu1  ;;  %10824 = vmatpush3.bf16.msra.mxu0 %v11792_v20  ;;  %v11837_v20 = vld [vmem:[%s12112_s4 + $0x17f8] sm:$0xff]  }
 0x330   : > { %v10525_v19 = vpop.f32.mrb[63].mxu0  ;;  %v10545_v22 = vadd.f32 %v10544_v21, %v10543_v16  ;;  %v10546_v24 = vpop.f32.mrb[62].mxu1  ;;  %10846 = vmatpush3.bf16.msra.mxu1 %v11794_v25  ;;  %10825 = vmatprep.subr.bf16.mxu0 %v11795_v28  ;;  %v11833_v16 = vld [vmem:[%s12112_s4 + $0x17f0] sm:$0xff]   ;;  %v265_v21 = vld [vmem:[%s12126_s27 + $0x170] sm:$0xff]  ;;  %v11841_v25 = vld [vmem:[%s12112_s4 + $0x1840] sm:$0xff]  }
 0x331   : > { %v8118_v17 = vadd.f32 %v10523_v13, %v12910_v40  ;;  %v10547_v26 = vpop.f32.mrb[63].mxu1  ;;  %10847 = vmatprep.subr.bf16.mxu1 %v11797_v30  ;;  %v264_v40 = vld [vmem:[%s12126_s27 + $0x168] sm:$0xff]  ;;  %v11836_v19 = vld [vmem:[%s12112_s4 + $0x1738] sm:$0xff]   ;;  %v9051_v23 = vcombine.high %v265_v21, %v265_v21  ;;  %v11845_v30 = vld [vmem:[%s12112_s4 + $0x1848] sm:$0xff]  }
 0x332   : > { %v9048_v41 = vcombine.low %v264_v40, %v264_v40  ;;  %v9049_v42 = vcombine.high %v264_v40, %v264_v40  ;;  %v11840_v24 = vld [vmem:[%s12112_s4 + $0x17b8] sm:$0xff]   ;;  %v266_v26 = vld [vmem:[%s12126_s27 + $0x178] sm:$0xff] }
 0x333   : > { %v12947_v27 = vadd.f32 %v10545_v22, %v8118_v17  ;;  %10826 = vmatpush3.bf16.msra.mxu0 %v11796_v29  ;;  %v11834_v17 = vld [vmem:[%s12112_s4 + $0x17b0] sm:$0xff]   ;;  %v9050_v22 = vcombine.low %v265_v21, %v265_v21  ;;  %v9053_v28 = vcombine.high %v266_v26, %v266_v26  ;;  %v11844_v29 = vld [vmem:[%s12112_s4 + $0x1800] sm:$0xff]  }
 0x334   : > { %10848 = vmatpush3.bf16.msra.mxu1 %v11798_v31  ;;  %10827 = vmatprep.subr.bf16.mxu0 %v11799_v32  ;;  %v11846_v31 = vld [vmem:[%s12112_s4 + $0x1808] sm:$0xff]   ;;  %v11847_v32 = vld [vmem:[%s12112_s4 + $0x1850] sm:$0xff]  }
 0x335   : > { %10849 = vmatprep.subr.bf16.mxu1 %v11801_v34  ;;  %8715 = vmatprep.mubr.bf16.mxu1 %v9049_v42  ;;  %v11849_v34 = vld [vmem:[%s12112_s4 + $0x1858] sm:$0xff]  }
 0x337   : > { %10828 = vmatpush3.bf16.msra.mxu0 %v11800_v33  ;;  %v11848_v33 = vld [vmem:[%s12112_s4 + $0x1810] sm:$0xff]  }
 0x338   : > { %10850 = vmatpush3.bf16.msra.mxu1 %v11804_v38  ;;  %10857 = vmatprep.subr.bf16.mxu0 %v11805_v39  ;;  %v267_v38 = vld [vmem:[%s12126_s27 + $0x180] sm:$0xff]  ;;  %v11853_v39 = vld [vmem:[%s12112_s4 + $0x1868] sm:$0xff]  }
 0x339   : > { %10879 = vmatprep.subr.bf16.mxu1 %v11809_v44  ;;  %v9055_v40 = vcombine.high %v267_v38, %v267_v38 }
 0x33a   : > { %8676 = vmatmul.mubr.bf16.vlgmr.msra.gmra.mrb[88].mxu0 %v9046_v36  ;;  %v11851_v36 = vld [vmem:[%s12112_s4 + $0x1860] sm:$0xff]  }
 0x33b   : > { %10858 = vmatpush3.bf16.msra.mxu0 %v11808_v43  ;;  %8716 = vmatmul.mubr.bf16.vlgmr.msra.gmra.mrb[88].mxu1 %v9048_v41 }
 0x33c   : > { %10880 = vmatpush3.bf16.msra.mxu1 %v11810_v45  ;;  %10859 = vmatprep.subr.bf16.mxu0 %v11811_v46  ;;  %v11854_v46 = vld [vmem:[%s12112_s4 + $0x1828] sm:$0xff]  }
 0x33d   : > { %10881 = vmatprep.subr.bf16.mxu1 %v11813_v48  ;;  %8755 = vmatprep.mubr.bf16.mxu0 %v9051_v23 }
 0x33e   : > { %8795 = vmatprep.mubr.bf16.mxu1 %v9053_v28 }
 0x33f   : > { %10860 = vmatpush3.bf16.msra.mxu0 %v11812_v47 }
 0x340   : > { %10882 = vmatpush3.bf16.msra.mxu1 %v11814_v49  ;;  %10861 = vmatprep.subr.bf16.mxu0 %v11815_v50  ;;  %v11855_v49 = vld [vmem:[%s12112_s4 + $0x1870] sm:$0xff]  }
 0x341   : > { %10883 = vmatprep.subr.bf16.mxu1 %v11817_v52 }
 0x343   : > { %10862 = vmatpush3.bf16.msra.mxu0 %v11816_v51 }
 0x344   : > { %10884 = vmatpush3.bf16.msra.mxu1 %v11818_v53  ;;  %10863 = vmatprep.subr.bf16.mxu0 %v11819_v54 }
 0x345   : > { %10885 = vmatprep.subr.bf16.mxu1 %v11821_v56  ;;  %v11857_v56 = vld [vmem:[%s12112_s4 + $0x1878] sm:$0xff]  }
 0x347   : > { %10864 = vmatpush3.bf16.msra.mxu0 %v11820_v55  ;;  %v11856_v55 = vld [vmem:[%s12112_s4 + $0x1830] sm:$0xff]  }
 0x348   : > { %10886 = vmatpush3.bf16.msra.mxu1 %v11822_v57  ;;  %10865 = vmatprep.subr.bf16.mxu0 %v11823_v58  ;;  %v11858_v57 = vld [vmem:[%s12112_s4 + $0x1838] sm:$0xff]   ;;  %v9054_v58 = vcombine.low %v267_v38, %v267_v38 }
 0x349   : > { %10887 = vmatprep.subr.bf16.mxu1 %v11825_v61 }
 0x34b   : > { %10866 = vmatpush3.bf16.msra.mxu0 %v11824_v59 }
 0x34c   : > { %10888 = vmatpush3.bf16.msra.mxu1 %v11826_v63  ;;  %10867 = vmatprep.subr.bf16.mxu0 %v11827_v2 }
 0x34d   : > { %v10565_v60 = vpop.f32.mrb[64].mxu0  ;;  %10889 = vmatprep.subr.bf16.mxu1 %v11829_v8 }
 0x34e   : > { %v10566_v62 = vpop.f32.mrb[65].mxu0  ;;  %v10587_v3 = vpop.f32.mrb[64].mxu1 }
 0x34f   : > { %v10567_v0 = vadd.f32 %v10566_v62, %v10565_v60  ;;  %v10568_v1 = vpop.f32.mrb[66].mxu0  ;;  %v10588_v7 = vpop.f32.mrb[65].mxu1  ;;  %10868 = vmatpush3.bf16.msra.mxu0 %v11828_v5 }
 0x350   : > { %v10569_v6 = vpop.f32.mrb[67].mxu0  ;;  %v10589_v9 = vadd.f32 %v10588_v7, %v10587_v3  ;;  %v10590_v11 = vpop.f32.mrb[66].mxu1  ;;  %10890 = vmatpush3.bf16.msra.mxu1 %v11830_v10  ;;  %10869 = vmatprep.subr.bf16.mxu0 %v11831_v12 }
 0x351   : > { %v8198_v4 = vadd.f32 %v10567_v0, %v12947_v27  ;;  %v10591_v13 = vpop.f32.mrb[67].mxu1  ;;  %10891 = vmatprep.subr.bf16.mxu1 %v11833_v16  ;;  %v9052_v27 = vcombine.low %v266_v26, %v266_v26 }
 0x353   : > { %v8238_v14 = vadd.f32 %v10589_v9, %v8198_v4  ;;  %10870 = vmatpush3.bf16.msra.mxu0 %v11832_v15 }
 0x354   : > { %10892 = vmatpush3.bf16.msra.mxu1 %v11834_v17  ;;  %10871 = vmatprep.subr.bf16.mxu0 %v11835_v18 }
 0x355   : > { %10893 = vmatprep.subr.bf16.mxu1 %v11837_v20 }
 0x357   : > { %10872 = vmatpush3.bf16.msra.mxu0 %v11836_v19 }
 0x358   : > { %10894 = vmatpush3.bf16.msra.mxu1 %v11840_v24  ;;  %10901 = vmatprep.subr.bf16.mxu0 %v11841_v25 }
 0x35a   : > { %8756 = vmatmul.mubr.bf16.vlgmr.msra.gmra.mrb[92].mxu0 %v9050_v22 }
 0x35b   : > { %10902 = vmatpush3.bf16.msra.mxu0 %v11844_v29  ;;  %8796 = vmatmul.mubr.bf16.vlgmr.msra.gmra.mrb[92].mxu1 %v9052_v27 }
 0x35c   : > { %10903 = vmatprep.subr.bf16.mxu0 %v11845_v30  ;;  %8835 = vmatprep.mubr.bf16.mxu0 %v9055_v40 }
 0x35f   : > { %10904 = vmatpush3.bf16.msra.mxu0 %v11846_v31 }
 0x360   : > { %10905 = vmatprep.subr.bf16.mxu0 %v11847_v32 }
 0x363   : > { %10906 = vmatpush3.bf16.msra.mxu0 %v11848_v33 }
 0x364   : > { %10907 = vmatprep.subr.bf16.mxu0 %v11849_v34 }
 0x367   : > { %10908 = vmatpush3.bf16.msra.mxu0 %v11850_v35 }
 0x368   : > { %10909 = vmatprep.subr.bf16.mxu0 %v11851_v36 }
 0x36b   : > { %10910 = vmatpush3.bf16.msra.mxu0 %v11852_v37 }
 0x36c   : > { %10911 = vmatprep.subr.bf16.mxu0 %v11853_v39 }
 0x36d   : > { %v10609_v41 = vpop.f32.mrb[68].mxu0 }
 0x36e   : > { %v10610_v42 = vpop.f32.mrb[69].mxu0  ;;  %v10631_v45 = vpop.f32.mrb[68].mxu1 }
 0x36f   : > { %v10611_v43 = vadd.f32 %v10610_v42, %v10609_v41  ;;  %v10612_v44 = vpop.f32.mrb[70].mxu0  ;;  %v10632_v48 = vpop.f32.mrb[69].mxu1  ;;  %10912 = vmatpush3.bf16.msra.mxu0 %v11854_v46 }
 0x370   : > { %v10613_v47 = vpop.f32.mrb[71].mxu0  ;;  %v10633_v51 = vadd.f32 %v10632_v48, %v10631_v45  ;;  %v10634_v52 = vpop.f32.mrb[70].mxu1  ;;  %10913 = vmatprep.subr.bf16.mxu0 %v11855_v49 }
 0x371   : > { %v8278_v50 = vadd.f32 %v10611_v43, %v8238_v14  ;;  %v10635_v53 = vpop.f32.mrb[71].mxu1 }
 0x373   : > { %v8318_v54 = vadd.f32 %v10633_v51, %v8278_v50  ;;  %10914 = vmatpush3.bf16.msra.mxu0 %v11856_v55 }
 0x374   : > { %10915 = vmatprep.subr.bf16.mxu0 %v11857_v56 }
 0x377   : > { %10916 = vmatpush3.bf16.msra.mxu0 %v11858_v57 }
 0x37a   : > { %8836 = vmatmul.mubr.bf16.vlgmr.msra.gmra.mrb[96].mxu0 %v9054_v58 }
 0x38d   : > { %v10653_v59 = vpop.f32.mrb[72].mxu0 }
 0x38e   : > { %v10654_v60 = vpop.f32.mrb[73].mxu0  ;;  %v10675_v63 = vpop.f32.mrb[72].mxu1 }
 0x38f   : > { %v10655_v61 = vadd.f32 %v10654_v60, %v10653_v59  ;;  %v10656_v62 = vpop.f32.mrb[74].mxu0  ;;  %v10676_v2 = vpop.f32.mrb[73].mxu1 }
 0x390   : > { %v10657_v0 = vpop.f32.mrb[75].mxu0  ;;  %v10677_v3 = vadd.f32 %v10676_v2, %v10675_v63  ;;  %v10678_v4 = vpop.f32.mrb[74].mxu1 }
 0x391   : > { %v8358_v1 = vadd.f32 %v10655_v61, %v8318_v54  ;;  %v10679_v5 = vpop.f32.mrb[75].mxu1 }
 0x393   : > { %v8398_v6 = vadd.f32 %v10677_v3, %v8358_v1 }
 0x3ad   : > { %v10697_v7 = vpop.f32.mrb[76].mxu0 }
 0x3ae   : > { %v10698_v8 = vpop.f32.mrb[77].mxu0  ;;  %v10719_v11 = vpop.f32.mrb[76].mxu1 }
 0x3af   : > { %v10699_v9 = vadd.f32 %v10698_v8, %v10697_v7  ;;  %v10700_v10 = vpop.f32.mrb[78].mxu0  ;;  %v10720_v13 = vpop.f32.mrb[77].mxu1  ;;  %v218_v7 = vld [vmem:[#allocation2] sm:$0xff] }
 0x3b0   : > { %v10701_v12 = vpop.f32.mrb[79].mxu0  ;;  %v10721_v15 = vadd.f32 %v10720_v13, %v10719_v11  ;;  %v10722_v16 = vpop.f32.mrb[78].mxu1 }
 0x3b1   : > { %v8438_v14 = vadd.f32 %v10699_v9, %v8398_v6  ;;  %v10723_v17 = vpop.f32.mrb[79].mxu1  ;;  %v9841_v12 = vld [vmem:[#allocation5] ss:$0 sm:$0xff] (!%p9840_p4) }
 0x3b3   : > { %v8478_v18 = vadd.f32 %v10721_v15, %v8438_v14 }
 0x3cd   : > { %v10741_v19 = vpop.f32.mrb[80].mxu0 }
 0x3ce   : > { %v10742_v20 = vpop.f32.mrb[81].mxu0  ;;  %v10763_v23 = vpop.f32.mrb[80].mxu1 }
 0x3cf   : > { %v10743_v21 = vadd.f32 %v10742_v20, %v10741_v19  ;;  %v10744_v22 = vpop.f32.mrb[82].mxu0  ;;  %v10764_v25 = vpop.f32.mrb[81].mxu1  ;;  %v11968_v20 = vmov (!%p9840_p4), 0  }
 0x3d0   : > { %v10745_v24 = vpop.f32.mrb[83].mxu0  ;;  %v10765_v27 = vadd.f32 %v10764_v25, %v10763_v23  ;;  %v10766_v28 = vpop.f32.mrb[82].mxu1  ;;  %11861 = vset.pattern.permute.xlu1 (!%p9840_p4), %v11968_v20  ;;  %11862 = vset.pattern.permute.xlu0 (!%p9840_p4), %v11968_v20 }
 0x3d1   : > { %v8518_v26 = vadd.f32 %v10743_v21, %v8478_v18  ;;  %v10767_v29 = vpop.f32.mrb[83].mxu1 }
 0x3d3   : > { %v8558_v30 = vadd.f32 %v10765_v27, %v8518_v26 }
 0x3ed   : > { %v10785_v31 = vpop.f32.mrb[84].mxu0 }
 0x3ee   : > { %v10786_v32 = vpop.f32.mrb[85].mxu0  ;;  %v10807_v35 = vpop.f32.mrb[84].mxu1 }
 0x3ef   : > { %v10787_v33 = vadd.f32 %v10786_v32, %v10785_v31  ;;  %v10788_v34 = vpop.f32.mrb[86].mxu0  ;;  %v10808_v38 = vpop.f32.mrb[85].mxu1 }
 0x3f0   : > { %v10789_v36 = vpop.f32.mrb[87].mxu0  ;;  %v10809_v39 = vadd.f32 %v10808_v38, %v10807_v35  ;;  %v10810_v40 = vpop.f32.mrb[86].mxu1 }
 0x3f1   : > { %v8598_v37 = vadd.f32 %v10787_v33, %v8558_v30  ;;  %v10811_v41 = vpop.f32.mrb[87].mxu1 }
 0x3f3   : > { %v8638_v42 = vadd.f32 %v10809_v39, %v8598_v37 }
 0x40d   : > { %v10829_v43 = vpop.f32.mrb[88].mxu0 }
 0x40e   : > { %v10830_v44 = vpop.f32.mrb[89].mxu0  ;;  %v10851_v47 = vpop.f32.mrb[88].mxu1 }
 0x40f   : > { %v10831_v45 = vadd.f32 %v10830_v44, %v10829_v43  ;;  %v10832_v46 = vpop.f32.mrb[90].mxu0  ;;  %v10852_v49 = vpop.f32.mrb[89].mxu1 }
 0x410   : > { %v10833_v48 = vpop.f32.mrb[91].mxu0  ;;  %v10853_v51 = vadd.f32 %v10852_v49, %v10851_v47  ;;  %v10854_v52 = vpop.f32.mrb[90].mxu1 }
 0x411   : > { %v8678_v50 = vadd.f32 %v10831_v45, %v8638_v42  ;;  %v10855_v53 = vpop.f32.mrb[91].mxu1 }
 0x413   : > { %v8718_v54 = vadd.f32 %v10853_v51, %v8678_v50 }
 0x42d   : > { %v10873_v55 = vpop.f32.mrb[92].mxu0 }
 0x42e   : > { %v10874_v56 = vpop.f32.mrb[93].mxu0  ;;  %v10895_v59 = vpop.f32.mrb[92].mxu1 }
 0x42f   : > { %v10875_v57 = vadd.f32 %v10874_v56, %v10873_v55  ;;  %v10876_v58 = vpop.f32.mrb[94].mxu0  ;;  %v10896_v61 = vpop.f32.mrb[93].mxu1 }
 0x430   : > { %v10877_v60 = vpop.f32.mrb[95].mxu0  ;;  %v10897_v63 = vadd.f32 %v10896_v61, %v10895_v59  ;;  %v10898_v0 = vpop.f32.mrb[94].mxu1 }
 0x431   : > { %v8758_v62 = vadd.f32 %v10875_v57, %v8718_v54  ;;  %v10899_v1 = vpop.f32.mrb[95].mxu1 }
 0x433   : > { %v8798_v2 = vadd.f32 %v10897_v63, %v8758_v62 }
 0x44d   : > { %v10917_v3 = vpop.f32.mrb[96].mxu0 }
 0x44e   : > { %v10918_v4 = vpop.f32.mrb[97].mxu0 }
 0x44f   : > { %v10919_v5 = vadd.f32 %v10918_v4, %v10917_v3  ;;  %v10920_v6 = vpop.f32.mrb[98].mxu0  ;;  %8848 = sbr.rel (%p9840_p4) target bundleno = 1416 (0x588), region = 48 }
 0x450   : > { %v10921_v8 = vpop.f32.mrb[99].mxu0 }
 0x451   : > { %v8838_v9 = vadd.f32 %v10919_v5, %v8798_v2 }
 0x453   : > { %v8843_v10 = vadd.f32 %v8838_v9, %v218_v7 }
 0x455   : > { %8844 = vst [vmem:[#allocation2] sm:$0xff] %v8843_v10 }
 0x45c   : > { %v8849_v11 = vld [vmem:[#allocation2] sm:$0xff] }
 0x45d   : > { %v8857_v13 = vadd.f32 %v9841_v12, %v8849_v11 }
 0x45f   : > { %v8866_v14 = vmul.f32 %v8857_v13, %v8857_v13  ;;  %v8859_v15 = vrot.slane %v8857_v13, 2 }
 0x461   : > { %v8871_v16 = vsel %vm8870_vm0, %v8866_v14, 0.0  ;;  %v8861_v17 = vmul.f32 %v8859_v15, %v8857_v13  ;;  %v8867_v18 = vsel %vm8862_vm1, %v8866_v14, 0.0 }
 0x462   : > { %8872 = vadd.xlane.f32.xlu0 %v8871_v16 }
 0x463   : > { %v8863_v19 = vsel %vm8862_vm1, %v8861_v17, 0.0 }
 0x464   : > { %8864 = vadd.xlane.f32.xlu1 %v8863_v19 }
 0x466   : > { %8868 = vadd.xlane.f32.xlu0 %v8867_v18 }
 0x4ef   : > { %v8873_v21 = vpop.xlane.xlu0 %8872 }
 0x4f0   : > { %v8875_v22 = vrot.slane %v8873_v21, 2 }
 0x4f1   : > { %v8865_v26 = vpop.xlane.xlu1 %8864 }
 0x4f3   : > { %v8869_v23 = vpop.xlane.xlu0 %8868 }
 0x4f4   : > { %v8877_v24 = vmul.f32 %v8875_v22, %v8869_v23 }
 0x4f6   : > { %v8878_v25 = vmax.f32 %v8877_v24, 1e-16 }
 0x4f8   : > { %11863 = vrsqrt.f32 %v8878_v25 }
 0x502   : > { %v11864_v27 = vpop.eup %11863 }
 0x503   : > { %v8880_v28 = vmul.f32 %v11864_v27, %v8865_v26 }
 0x505   : > { %v8881_v29 = vsub.f32 1.0, %v8880_v28 }
 0x507   : > { %8884 = vperm.xlu1 %11861, %v8881_v29  }
 0x586   : > { %v8885_v30 = vpop.permute.xlu1 %8884 }
 0x587   : > { %8887 = vst [vmem:[%s13031_s3] sm:$0x3] %v8885_v30 }
 0x588 PF: > { %p14_p7 = scmp.ge.s32.totalorder %s12011_s17, 5   ;;  %s13047_s12 = smov %s11953_s13 }
 0x589   : > { %s13048_s13 = smov %s11957_s14  ;;  %s13049_s14 = smov %s12021_s20 }
 0x58a   : > { %s13050_s15 = smov %s12011_s17  ;;  %16 = sbr.rel (!%p14_p7) target bundleno = 4 (0x4), region = 83 }
 0x591   :  { %8899 = vsyncpa [#allocation4], 1 }
 0x592   :  { %8901 = vsyncpa [#allocation4 + $0x1], 1 }
 0x593   :  { %8902 = vsyncpa [#allocation6], 1 }

</bundles_post_ra>
